<compile_context>
chip_gen: v6e
topology: v6e:2x2x1
jax: 0.10.0
libtpu: 0.0.40
codegen_flags: <defaults>
</compile_context>

<pallas_src>
import functools

import jax
import jax.numpy as jnp
from jax.experimental import pallas as pl
from jax.experimental.pallas import tpu as pltpu

NEG_SLOPE = 0.01      # F.leaky_relu default negative_slope
H_IN = 18             # spatial size implied by linear_1 = Linear(64*2*2, 512):
                      # 18 -> conv(16) -> pool(8) -> conv(6) -> conv(4) -> pool(2)
C_IN, C1, C2, C3, F1 = 3, 32, 64, 64, 512
K1 = 3 * 3 * C_IN     # conv1 im2col depth (27)
K1P = 32              # padded contraction depth for a clean lane layout


# ---------------------------------------------------------------------------
# Fused forward kernel
# ---------------------------------------------------------------------------
def _fused_cnn_kernel(x_ref, w1_ref, b1_ref, w2_ref, b2_ref, w3_ref, b3_ref,
                      wl1_ref, bl1_ref, wl2_ref, bl2_ref, out_ref,
                      h1_ref, t1_ref, p1_ref, h2_ref, h3_ref, p2_ref, *, n):
    bf16 = jnp.bfloat16
    f32 = jnp.float32

    def leaky(v):
        return jnp.where(v >= 0, v, NEG_SLOPE * v)

    # ---- conv1 + leaky_relu as ONE MXU dot over the im2col'd input ---------
    # x_ref: (n*256, 32) bf16 (27 real im2col columns + zero pad),
    # w1_ref: (32, 32) bf16.  Output rows are compact (img, h, w) on a
    # 16-wide grid: row = img*256 + h*16 + w.
    h1 = jnp.dot(x_ref[...], w1_ref[...], preferred_element_type=f32)
    h1_ref[...] = leaky(h1 + b1_ref[...])                    # (n*256, 32) f32

    # ---- max-pool 2x2 #1: (n,16,16,32) -> (n,8,8,32) ------------------------
    # Vertical max with contiguous 16-row reads into t1, then ONE global
    # stride-2 horizontal max (even vs odd w) that lands directly in the
    # compact p1 layout: p1 row = img*64 + h'*8 + w'.
    for k in range(8 * n):                      # one (img, even-h) pair each
        base = 32 * k
        t1_ref[pl.ds(16 * k, 16), :] = jnp.maximum(
            h1_ref[pl.ds(base, 16), :], h1_ref[pl.ds(base + 16, 16), :])
    p1_ref[...] = jnp.maximum(
        t1_ref[pl.ds(0, 64 * n, 2), :],
        t1_ref[pl.ds(1, 64 * n, 2), :]).astype(p1_ref.dtype)   # bf16 store

    # ---- conv2 / conv3 as 9 shifted MXU dots on the flat 8-wide grid --------
    # A 3x3 VALID tap (kh, kw) is the row offset kh*8 + kw; rows whose (h, w)
    # fall outside the valid window hold garbage that is never read downstream.
    def wide_conv(src_ref, w_ref, b_ref, dst_ref, rows):
        cout = w_ref.shape[2]
        acc = jnp.zeros((rows, cout), f32)
        for kh in range(3):
            for kw in range(3):
                off = kh * 8 + kw
                acc = acc + jnp.dot(src_ref[pl.ds(off, rows), :],   # bf16 src
                                    w_ref[kh * 3 + kw],
                                    preferred_element_type=f32)
        dst_ref[...] = leaky(acc + b_ref[...]).astype(dst_ref.dtype)

    r2 = n * 64 - 18     # conv2 rows (valid where h < 6, w < 6)
    r3 = n * 64 - 36     # conv3 rows (valid where h < 4, w < 4)
    wide_conv(p1_ref, w2_ref, b2_ref, h2_ref, r2)     # (r2, 64) bf16
    wide_conv(h2_ref, w3_ref, b3_ref, h3_ref, r3)     # (r3, 64) f32

    # ---- max-pool 2x2 #2, batch-vectorized: (n,4,4,64) -> (n,2,2,64) --------
    # Each (i, j, a, b) tap is one batch-strided (n, 64) read (stride 64 rows
    # between images); the 4-tap max for output position t = i*2+j is stored
    # into lane slice [64*t, 64*t+64) of the (n, 256) p2 scratch so linear_1
    # becomes a single K=256 dot (wl1 is pre-permuted to match this packing).
    for i in range(2):
        for j in range(2):
            t = i * 2 + j
            m = None
            for a in range(2):
                for b in range(2):
                    r0 = (2 * i + a) * 8 + (2 * j + b)
                    v = h3_ref[pl.ds(r0, n, 64), :]              # (n, 64) f32
                    m = v if m is None else jnp.maximum(m, v)
            p2_ref[:, 64 * t:64 * (t + 1)] = m

    # ---- linear_1 as a single K=256 MXU dot + ReLU --------------------------
    h4 = jnp.maximum(
        jnp.dot(p2_ref[...].astype(bf16), wl1_ref[...],
                preferred_element_type=f32) + bl1_ref[...], 0.0)   # (n, 512)

    # ---- linear_2 as VPU multiply + lane reduction, then stable sigmoid -----
    z = jnp.sum(h4 * wl2_ref[...], axis=1, keepdims=True) + bl2_ref[...]
    ez = jnp.exp(-jnp.abs(z))
    out_ref[...] = jnp.where(z >= 0, 1.0 / (1.0 + ez), ez / (1.0 + ez))


# ---------------------------------------------------------------------------
# Parameter prep (once, outside jit) and wrapper
# ---------------------------------------------------------------------------
def prepare_params(params):
    """Repack PyTorch-layout weights into the kernel layout (bf16 for MXU)."""
    def conv_w(w_oihw):
        cout, cin, kh, kw = w_oihw.shape
        return (jnp.transpose(w_oihw, (2, 3, 1, 0))       # (KH, KW, Cin, Cout)
                .reshape(kh * kw, cin, cout).astype(jnp.bfloat16))

    # conv1: (32, 3, 3, 3) -> (27, 32) with row = kh*9 + kw*3 + cin, matching
    # the wrapper's im2col column order; zero-padded to 32 contraction rows.
    w1 = jnp.transpose(params["conv1_w"], (2, 3, 1, 0)).reshape(K1, C1)
    w1 = jnp.pad(w1, ((0, K1P - K1), (0, 0))).astype(jnp.bfloat16)

    # lin1_w: (512, 256), PyTorch NCHW-flatten columns ordered c*4 + h*2 + w.
    # Repack to ONE (256, 512) matrix whose row = (h*2 + w)*64 + c, matching
    # the lane packing of the p2 scratch.
    wl1 = (params["lin1_w"].reshape(F1, C3, 2, 2)          # (out, c, h, w)
           .transpose(2, 3, 1, 0)                          # (h, w, c, out)
           .reshape(4 * C3, F1).astype(jnp.bfloat16))
    return {
        "w1": w1, "b1": params["conv1_b"].reshape(1, C1),
        "w2": conv_w(params["conv2_w"]), "b2": params["conv2_b"].reshape(1, C2),
        "w3": conv_w(params["conv3_w"]), "b3": params["conv3_b"].reshape(1, C3),
        "wl1": wl1, "bl1": params["lin1_b"].reshape(1, F1),
        "wl2": params["lin2_w"].reshape(1, F1).astype(jnp.float32),
        "bl2": params["lin2_b"].reshape(1, 1),
    }


def cnn_classifier_forward(prepped, x_nchw):
    n = x_nchw.shape[0]
    assert x_nchw.shape[1:] == (C_IN, H_IN, H_IN), x_nchw.shape

    # im2col for conv1 (the only XLA-side layout glue): (n, 18, 18, 3) ->
    # (n*256, 27) with column = kh*9 + kw*3 + cin, zero-padded to 32 lanes.
    xh = jnp.transpose(x_nchw, (0, 2, 3, 1)).astype(jnp.float32)
    cols = [xh[:, kh:kh + 16, kw:kw + 16, :]
            for kh in range(3) for kw in range(3)]
    x2d = jnp.concatenate(cols, axis=-1).reshape(n * 256, K1)
    x2d = jnp.pad(x2d, ((0, 0), (0, K1P - K1))).astype(jnp.bfloat16)

    r2, r3 = n * 64 - 18, n * 64 - 36
    assert r3 + 18 == r2 and r2 + 18 == n * 64   # wide-conv tap bounds (8-grid)

    kernel = functools.partial(_fused_cnn_kernel, n=n)
    # TODO(synk): for batch >> 8 add a leading batch grid axis with
    # dimension_semantics=("parallel",) to engage v7x's second TensorCore and
    # pipeline the input DMA; at batch=2 a single grid-less call is optimal.
    return pl.pallas_call(
        kernel,
        out_shape=jax.ShapeDtypeStruct((n, 1), jnp.float32),
        in_specs=[pl.BlockSpec(memory_space=pltpu.MemorySpace.VMEM)] * 11,
        out_specs=pl.BlockSpec(memory_space=pltpu.MemorySpace.VMEM),
        scratch_shapes=[
            pltpu.VMEM((n * 256, C1), jnp.float32),   # h1: conv1 out (16-grid)
            pltpu.VMEM((n * 128, C1), jnp.float32),   # t1: vertical-max temp
            pltpu.VMEM((n * 64, C1), jnp.bfloat16),   # p1: pooled conv1 (8-grid)
            pltpu.VMEM((r2, C2), jnp.bfloat16),       # h2: conv2 out (8-grid)
            pltpu.VMEM((r3, C3), jnp.float32),        # h3: conv3 out (8-grid)
            pltpu.VMEM((n, 4 * C3), jnp.float32),     # p2: pooled conv3, lane-packed
        ],
    )(x2d, prepped["w1"], prepped["b1"], prepped["w2"], prepped["b2"],
      prepped["w3"], prepped["b3"], prepped["wl1"], prepped["bl1"],
      prepped["wl2"], prepped["bl2"])


# ---------------------------------------------------------------------------
# Pure-JAX reference (exact PyTorch forward semantics) for self-checking
# ---------------------------------------------------------------------------
def reference_forward(params, x_nchw):
    def leaky(v):
        return jnp.where(v >= 0, v, NEG_SLOPE * v)

    def conv(v_nhwc, w_oihw, b):
        w_hwio = jnp.transpose(w_oihw, (2, 3, 1, 0))
        y = jax.lax.conv_general_dilated(
            v_nhwc, w_hwio, window_strides=(1, 1), padding="VALID",
            dimension_numbers=("NHWC", "HWIO", "NHWC"))
        return y + b.reshape(1, 1, 1, -1)

    def pool(v):
        b, h, w, c = v.shape
        return jnp.max(v.reshape(b, h // 2, 2, w // 2, 2, c), axis=(2, 4))

    v = jnp.transpose(x_nchw, (0, 2, 3, 1))
    v = pool(leaky(conv(v, params["conv1_w"], params["conv1_b"])))
    v = leaky(conv(v, params["conv2_w"], params["conv2_b"]))
    v = pool(leaky(conv(v, params["conv3_w"], params["conv3_b"])))
    v = jnp.transpose(v, (0, 3, 1, 2)).reshape(v.shape[0], -1)   # NCHW flatten
    v = jnp.maximum(v @ params["lin1_w"].T + params["lin1_b"], 0.0)
    v = v @ params["lin2_w"].T + params["lin2_b"]
    return jax.nn.sigmoid(v)


# ---------------------------------------------------------------------------
# Deterministic PyTorch-default-style init
# ---------------------------------------------------------------------------
def init_params(key):
    ks = jax.random.split(key, 10)

    def u(k, shape, fan_in):
        bound = 1.0 / float(fan_in) ** 0.5
        return jax.random.uniform(k, shape, jnp.float32, -bound, bound)

    return {
        "conv1_w": u(ks[0], (C1, C_IN, 3, 3), C_IN * 9),
        "conv1_b": u(ks[1], (C1,), C_IN * 9),
        "conv2_w": u(ks[2], (C2, C1, 3, 3), C1 * 9),
        "conv2_b": u(ks[3], (C2,), C1 * 9),
        "conv3_w": u(ks[4], (C3, C2, 3, 3), C2 * 9),
        "conv3_b": u(ks[5], (C3,), C2 * 9),
        "lin1_w": u(ks[6], (F1, C3 * 2 * 2), C3 * 2 * 2),   # (out, in) like nn.Linear
        "lin1_b": u(ks[7], (F1,), C3 * 2 * 2),
        "lin2_w": u(ks[8], (1, F1), F1),
        "lin2_b": u(ks[9], (1,), F1),
    }


if __name__ == "__main__":
    key = jax.random.PRNGKey(0)
    pkey, xkey = jax.random.split(key)
    params = init_params(pkey)
    x = jax.random.normal(xkey, (2, C_IN, H_IN, H_IN), jnp.float32)

    prepped = prepare_params(params)
    fwd = jax.jit(cnn_classifier_forward)
    out = jax.block_until_ready(fwd(prepped, x))

    assert out.shape == (2, 1), out.shape
    assert bool(jnp.all(jnp.isfinite(out)))
    assert bool(jnp.all((out >= 0.0) & (out <= 1.0)))   # sigmoid range

    ref = jax.block_until_ready(jax.jit(reference_forward)(params, x))
    assert bool(jnp.max(jnp.abs(out - ref)) < 5e-2), (out, ref)

    print("KERNEL_OK")
</pallas_src>

<mosaic_0001>
module attributes {stable_mosaic.version = 11 : i64} {
  func.func @_fused_cnn_kernel(%arg0: memref<512x32xbf16, #tpu.memory_space<vmem>>, %arg1: memref<32x32xbf16, #tpu.memory_space<vmem>>, %arg2: memref<1x32xf32, #tpu.memory_space<vmem>>, %arg3: memref<9x32x64xbf16, #tpu.memory_space<vmem>>, %arg4: memref<1x64xf32, #tpu.memory_space<vmem>>, %arg5: memref<9x64x64xbf16, #tpu.memory_space<vmem>>, %arg6: memref<1x64xf32, #tpu.memory_space<vmem>>, %arg7: memref<256x512xbf16, #tpu.memory_space<vmem>>, %arg8: memref<1x512xf32, #tpu.memory_space<vmem>>, %arg9: memref<1x512xf32, #tpu.memory_space<vmem>>, %arg10: memref<1x1xf32, #tpu.memory_space<vmem>>, %arg11: memref<2x1xf32, #tpu.memory_space<vmem>>, %arg12: memref<512x32xf32, #tpu.memory_space<vmem>>, %arg13: memref<256x32xf32, #tpu.memory_space<vmem>>, %arg14: memref<128x32xbf16, #tpu.memory_space<vmem>>, %arg15: memref<110x64xbf16, #tpu.memory_space<vmem>>, %arg16: memref<92x64xf32, #tpu.memory_space<vmem>>, %arg17: memref<2x256xf32, #tpu.memory_space<vmem>>) attributes {dimension_semantics = [], scalar_prefetch = 0 : i64, scratch_operands = 6 : i64, tpu.core_type = #tpu.core_type<tc>} {
    %c0 = arith.constant 0 : index
    %c0_0 = arith.constant 0 : index
    %0 = vector.load %arg0[%c0, %c0_0] : memref<512x32xbf16, #tpu.memory_space<vmem>>, vector<512x32xbf16>
    %c0_1 = arith.constant 0 : index
    %c0_2 = arith.constant 0 : index
    %1 = vector.load %arg1[%c0_1, %c0_2] : memref<32x32xbf16, #tpu.memory_space<vmem>>, vector<32x32xbf16>
    %cst = arith.constant dense<0.000000e+00> : vector<512x32xf32>
    %2 = tpu.matmul %0, %1, %cst {dimension_numbers = #tpu.dot_dimension_numbers<[1], [0], [0], [1], [0, 0, 1, 1], [], []>} : vector<512x32xbf16>, vector<32x32xbf16>, vector<512x32xf32> -> vector<512x32xf32>
    %c0_3 = arith.constant 0 : index
    %c0_4 = arith.constant 0 : index
    %3 = vector.load %arg2[%c0_3, %c0_4] : memref<1x32xf32, #tpu.memory_space<vmem>>, vector<1x32xf32>
    %4 = vector.broadcast %3 : vector<1x32xf32> to vector<512x32xf32>
    %5 = arith.addf %2, %4 : vector<512x32xf32>
    %cst_5 = arith.constant 0.000000e+00 : f32
    %6 = vector.broadcast %cst_5 : f32 to vector<512x32xf32>
    %7 = arith.cmpf oge, %5, %6 : vector<512x32xf32>
    %cst_6 = arith.constant 0.00999999977 : f32
    %8 = vector.broadcast %cst_6 : f32 to vector<512x32xf32>
    %9 = arith.mulf %8, %5 : vector<512x32xf32>
    %10 = arith.select %7, %5, %9 : vector<512x32xi1>, vector<512x32xf32>
    %c0_7 = arith.constant 0 : index
    %c0_8 = arith.constant 0 : index
    %11 = vector.load %arg12[%c0_7, %c0_8] : memref<512x32xf32, #tpu.memory_space<vmem>>, vector<512x32xf32>
    tpu.vector_store %arg12[%c0_7, %c0_8], %10 {strides = array<i32>} : memref<512x32xf32, #tpu.memory_space<vmem>>, vector<512x32xf32>,
    %c0_9 = arith.constant 0 : index
    %c0_10 = arith.constant 0 : index
    %12 = vector.load %arg12[%c0_9, %c0_10] : memref<512x32xf32, #tpu.memory_space<vmem>>, vector<16x32xf32>
    %c16 = arith.constant 16 : index
    %c0_11 = arith.constant 0 : index
    %13 = vector.load %arg12[%c16, %c0_11] : memref<512x32xf32, #tpu.memory_space<vmem>>, vector<16x32xf32>
    %14 = arith.maximumf %12, %13 : vector<16x32xf32>
    %c0_12 = arith.constant 0 : index
    %c0_13 = arith.constant 0 : index
    %15 = vector.load %arg13[%c0_12, %c0_13] : memref<256x32xf32, #tpu.memory_space<vmem>>, vector<16x32xf32>
    tpu.vector_store %arg13[%c0_12, %c0_13], %14 {strides = array<i32>} : memref<256x32xf32, #tpu.memory_space<vmem>>, vector<16x32xf32>,
    %c32 = arith.constant 32 : index
    %c0_14 = arith.constant 0 : index
    %16 = vector.load %arg12[%c32, %c0_14] : memref<512x32xf32, #tpu.memory_space<vmem>>, vector<16x32xf32>
    %c48 = arith.constant 48 : index
    %c0_15 = arith.constant 0 : index
    %17 = vector.load %arg12[%c48, %c0_15] : memref<512x32xf32, #tpu.memory_space<vmem>>, vector<16x32xf32>
    %18 = arith.maximumf %16, %17 : vector<16x32xf32>
    %c16_16 = arith.constant 16 : index
    %c0_17 = arith.constant 0 : index
    %19 = vector.load %arg13[%c16_16, %c0_17] : memref<256x32xf32, #tpu.memory_space<vmem>>, vector<16x32xf32>
    tpu.vector_store %arg13[%c16_16, %c0_17], %18 {strides = array<i32>} : memref<256x32xf32, #tpu.memory_space<vmem>>, vector<16x32xf32>,
    %c64 = arith.constant 64 : index
    %c0_18 = arith.constant 0 : index
    %20 = vector.load %arg12[%c64, %c0_18] : memref<512x32xf32, #tpu.memory_space<vmem>>, vector<16x32xf32>
    %c80 = arith.constant 80 : index
    %c0_19 = arith.constant 0 : index
    %21 = vector.load %arg12[%c80, %c0_19] : memref<512x32xf32, #tpu.memory_space<vmem>>, vector<16x32xf32>
    %22 = arith.maximumf %20, %21 : vector<16x32xf32>
    %c32_20 = arith.constant 32 : index
    %c0_21 = arith.constant 0 : index
    %23 = vector.load %arg13[%c32_20, %c0_21] : memref<256x32xf32, #tpu.memory_space<vmem>>, vector<16x32xf32>
    tpu.vector_store %arg13[%c32_20, %c0_21], %22 {strides = array<i32>} : memref<256x32xf32, #tpu.memory_space<vmem>>, vector<16x32xf32>,
    %c96 = arith.constant 96 : index
    %c0_22 = arith.constant 0 : index
    %24 = vector.load %arg12[%c96, %c0_22] : memref<512x32xf32, #tpu.memory_space<vmem>>, vector<16x32xf32>
    %c112 = arith.constant 112 : index
    %c0_23 = arith.constant 0 : index
    %25 = vector.load %arg12[%c112, %c0_23] : memref<512x32xf32, #tpu.memory_space<vmem>>, vector<16x32xf32>
    %26 = arith.maximumf %24, %25 : vector<16x32xf32>
    %c48_24 = arith.constant 48 : index
    %c0_25 = arith.constant 0 : index
    %27 = vector.load %arg13[%c48_24, %c0_25] : memref<256x32xf32, #tpu.memory_space<vmem>>, vector<16x32xf32>
    tpu.vector_store %arg13[%c48_24, %c0_25], %26 {strides = array<i32>} : memref<256x32xf32, #tpu.memory_space<vmem>>, vector<16x32xf32>,
    %c128 = arith.constant 128 : index
    %c0_26 = arith.constant 0 : index
    %28 = vector.load %arg12[%c128, %c0_26] : memref<512x32xf32, #tpu.memory_space<vmem>>, vector<16x32xf32>
    %c144 = arith.constant 144 : index
    %c0_27 = arith.constant 0 : index
    %29 = vector.load %arg12[%c144, %c0_27] : memref<512x32xf32, #tpu.memory_space<vmem>>, vector<16x32xf32>
    %30 = arith.maximumf %28, %29 : vector<16x32xf32>
    %c64_28 = arith.constant 64 : index
    %c0_29 = arith.constant 0 : index
    %31 = vector.load %arg13[%c64_28, %c0_29] : memref<256x32xf32, #tpu.memory_space<vmem>>, vector<16x32xf32>
    tpu.vector_store %arg13[%c64_28, %c0_29], %30 {strides = array<i32>} : memref<256x32xf32, #tpu.memory_space<vmem>>, vector<16x32xf32>,
    %c160 = arith.constant 160 : index
    %c0_30 = arith.constant 0 : index
    %32 = vector.load %arg12[%c160, %c0_30] : memref<512x32xf32, #tpu.memory_space<vmem>>, vector<16x32xf32>
    %c176 = arith.constant 176 : index
    %c0_31 = arith.constant 0 : index
    %33 = vector.load %arg12[%c176, %c0_31] : memref<512x32xf32, #tpu.memory_space<vmem>>, vector<16x32xf32>
    %34 = arith.maximumf %32, %33 : vector<16x32xf32>
    %c80_32 = arith.constant 80 : index
    %c0_33 = arith.constant 0 : index
    %35 = vector.load %arg13[%c80_32, %c0_33] : memref<256x32xf32, #tpu.memory_space<vmem>>, vector<16x32xf32>
    tpu.vector_store %arg13[%c80_32, %c0_33], %34 {strides = array<i32>} : memref<256x32xf32, #tpu.memory_space<vmem>>, vector<16x32xf32>,
    %c192 = arith.constant 192 : index
    %c0_34 = arith.constant 0 : index
    %36 = vector.load %arg12[%c192, %c0_34] : memref<512x32xf32, #tpu.memory_space<vmem>>, vector<16x32xf32>
    %c208 = arith.constant 208 : index
    %c0_35 = arith.constant 0 : index
    %37 = vector.load %arg12[%c208, %c0_35] : memref<512x32xf32, #tpu.memory_space<vmem>>, vector<16x32xf32>
    %38 = arith.maximumf %36, %37 : vector<16x32xf32>
    %c96_36 = arith.constant 96 : index
    %c0_37 = arith.constant 0 : index
    %39 = vector.load %arg13[%c96_36, %c0_37] : memref<256x32xf32, #tpu.memory_space<vmem>>, vector<16x32xf32>
    tpu.vector_store %arg13[%c96_36, %c0_37], %38 {strides = array<i32>} : memref<256x32xf32, #tpu.memory_space<vmem>>, vector<16x32xf32>,
    %c224 = arith.constant 224 : index
    %c0_38 = arith.constant 0 : index
    %40 = vector.load %arg12[%c224, %c0_38] : memref<512x32xf32, #tpu.memory_space<vmem>>, vector<16x32xf32>
    %c240 = arith.constant 240 : index
    %c0_39 = arith.constant 0 : index
    %41 = vector.load %arg12[%c240, %c0_39] : memref<512x32xf32, #tpu.memory_space<vmem>>, vector<16x32xf32>
    %42 = arith.maximumf %40, %41 : vector<16x32xf32>
    %c112_40 = arith.constant 112 : index
    %c0_41 = arith.constant 0 : index
    %43 = vector.load %arg13[%c112_40, %c0_41] : memref<256x32xf32, #tpu.memory_space<vmem>>, vector<16x32xf32>
    tpu.vector_store %arg13[%c112_40, %c0_41], %42 {strides = array<i32>} : memref<256x32xf32, #tpu.memory_space<vmem>>, vector<16x32xf32>,
    %c256 = arith.constant 256 : index
    %c0_42 = arith.constant 0 : index
    %44 = vector.load %arg12[%c256, %c0_42] : memref<512x32xf32, #tpu.memory_space<vmem>>, vector<16x32xf32>
    %c272 = arith.constant 272 : index
    %c0_43 = arith.constant 0 : index
    %45 = vector.load %arg12[%c272, %c0_43] : memref<512x32xf32, #tpu.memory_space<vmem>>, vector<16x32xf32>
    %46 = arith.maximumf %44, %45 : vector<16x32xf32>
    %c128_44 = arith.constant 128 : index
    %c0_45 = arith.constant 0 : index
    %47 = vector.load %arg13[%c128_44, %c0_45] : memref<256x32xf32, #tpu.memory_space<vmem>>, vector<16x32xf32>
    tpu.vector_store %arg13[%c128_44, %c0_45], %46 {strides = array<i32>} : memref<256x32xf32, #tpu.memory_space<vmem>>, vector<16x32xf32>,
    %c288 = arith.constant 288 : index
    %c0_46 = arith.constant 0 : index
    %48 = vector.load %arg12[%c288, %c0_46] : memref<512x32xf32, #tpu.memory_space<vmem>>, vector<16x32xf32>
    %c304 = arith.constant 304 : index
    %c0_47 = arith.constant 0 : index
    %49 = vector.load %arg12[%c304, %c0_47] : memref<512x32xf32, #tpu.memory_space<vmem>>, vector<16x32xf32>
    %50 = arith.maximumf %48, %49 : vector<16x32xf32>
    %c144_48 = arith.constant 144 : index
    %c0_49 = arith.constant 0 : index
    %51 = vector.load %arg13[%c144_48, %c0_49] : memref<256x32xf32, #tpu.memory_space<vmem>>, vector<16x32xf32>
    tpu.vector_store %arg13[%c144_48, %c0_49], %50 {strides = array<i32>} : memref<256x32xf32, #tpu.memory_space<vmem>>, vector<16x32xf32>,
    %c320 = arith.constant 320 : index
    %c0_50 = arith.constant 0 : index
    %52 = vector.load %arg12[%c320, %c0_50] : memref<512x32xf32, #tpu.memory_space<vmem>>, vector<16x32xf32>
    %c336 = arith.constant 336 : index
    %c0_51 = arith.constant 0 : index
    %53 = vector.load %arg12[%c336, %c0_51] : memref<512x32xf32, #tpu.memory_space<vmem>>, vector<16x32xf32>
    %54 = arith.maximumf %52, %53 : vector<16x32xf32>
    %c160_52 = arith.constant 160 : index
    %c0_53 = arith.constant 0 : index
    %55 = vector.load %arg13[%c160_52, %c0_53] : memref<256x32xf32, #tpu.memory_space<vmem>>, vector<16x32xf32>
    tpu.vector_store %arg13[%c160_52, %c0_53], %54 {strides = array<i32>} : memref<256x32xf32, #tpu.memory_space<vmem>>, vector<16x32xf32>,
    %c352 = arith.constant 352 : index
    %c0_54 = arith.constant 0 : index
    %56 = vector.load %arg12[%c352, %c0_54] : memref<512x32xf32, #tpu.memory_space<vmem>>, vector<16x32xf32>
    %c368 = arith.constant 368 : index
    %c0_55 = arith.constant 0 : index
    %57 = vector.load %arg12[%c368, %c0_55] : memref<512x32xf32, #tpu.memory_space<vmem>>, vector<16x32xf32>
    %58 = arith.maximumf %56, %57 : vector<16x32xf32>
    %c176_56 = arith.constant 176 : index
    %c0_57 = arith.constant 0 : index
    %59 = vector.load %arg13[%c176_56, %c0_57] : memref<256x32xf32, #tpu.memory_space<vmem>>, vector<16x32xf32>
    tpu.vector_store %arg13[%c176_56, %c0_57], %58 {strides = array<i32>} : memref<256x32xf32, #tpu.memory_space<vmem>>, vector<16x32xf32>,
    %c384 = arith.constant 384 : index
    %c0_58 = arith.constant 0 : index
    %60 = vector.load %arg12[%c384, %c0_58] : memref<512x32xf32, #tpu.memory_space<vmem>>, vector<16x32xf32>
    %c400 = arith.constant 400 : index
    %c0_59 = arith.constant 0 : index
    %61 = vector.load %arg12[%c400, %c0_59] : memref<512x32xf32, #tpu.memory_space<vmem>>, vector<16x32xf32>
    %62 = arith.maximumf %60, %61 : vector<16x32xf32>
    %c192_60 = arith.constant 192 : index
    %c0_61 = arith.constant 0 : index
    %63 = vector.load %arg13[%c192_60, %c0_61] : memref<256x32xf32, #tpu.memory_space<vmem>>, vector<16x32xf32>
    tpu.vector_store %arg13[%c192_60, %c0_61], %62 {strides = array<i32>} : memref<256x32xf32, #tpu.memory_space<vmem>>, vector<16x32xf32>,
    %c416 = arith.constant 416 : index
    %c0_62 = arith.constant 0 : index
    %64 = vector.load %arg12[%c416, %c0_62] : memref<512x32xf32, #tpu.memory_space<vmem>>, vector<16x32xf32>
    %c432 = arith.constant 432 : index
    %c0_63 = arith.constant 0 : index
    %65 = vector.load %arg12[%c432, %c0_63] : memref<512x32xf32, #tpu.memory_space<vmem>>, vector<16x32xf32>
    %66 = arith.maximumf %64, %65 : vector<16x32xf32>
    %c208_64 = arith.constant 208 : index
    %c0_65 = arith.constant 0 : index
    %67 = vector.load %arg13[%c208_64, %c0_65] : memref<256x32xf32, #tpu.memory_space<vmem>>, vector<16x32xf32>
    tpu.vector_store %arg13[%c208_64, %c0_65], %66 {strides = array<i32>} : memref<256x32xf32, #tpu.memory_space<vmem>>, vector<16x32xf32>,
    %c448 = arith.constant 448 : index
    %c0_66 = arith.constant 0 : index
    %68 = vector.load %arg12[%c448, %c0_66] : memref<512x32xf32, #tpu.memory_space<vmem>>, vector<16x32xf32>
    %c464 = arith.constant 464 : index
    %c0_67 = arith.constant 0 : index
    %69 = vector.load %arg12[%c464, %c0_67] : memref<512x32xf32, #tpu.memory_space<vmem>>, vector<16x32xf32>
    %70 = arith.maximumf %68, %69 : vector<16x32xf32>
    %c224_68 = arith.constant 224 : index
    %c0_69 = arith.constant 0 : index
    %71 = vector.load %arg13[%c224_68, %c0_69] : memref<256x32xf32, #tpu.memory_space<vmem>>, vector<16x32xf32>
    tpu.vector_store %arg13[%c224_68, %c0_69], %70 {strides = array<i32>} : memref<256x32xf32, #tpu.memory_space<vmem>>, vector<16x32xf32>,
    %c480 = arith.constant 480 : index
    %c0_70 = arith.constant 0 : index
    %72 = vector.load %arg12[%c480, %c0_70] : memref<512x32xf32, #tpu.memory_space<vmem>>, vector<16x32xf32>
    %c496 = arith.constant 496 : index
    %c0_71 = arith.constant 0 : index
    %73 = vector.load %arg12[%c496, %c0_71] : memref<512x32xf32, #tpu.memory_space<vmem>>, vector<16x32xf32>
    %74 = arith.maximumf %72, %73 : vector<16x32xf32>
    %c240_72 = arith.constant 240 : index
    %c0_73 = arith.constant 0 : index
    %75 = vector.load %arg13[%c240_72, %c0_73] : memref<256x32xf32, #tpu.memory_space<vmem>>, vector<16x32xf32>
    tpu.vector_store %arg13[%c240_72, %c0_73], %74 {strides = array<i32>} : memref<256x32xf32, #tpu.memory_space<vmem>>, vector<16x32xf32>,
    %c0_74 = arith.constant 0 : index
    %c0_75 = arith.constant 0 : index
    %76 = tpu.strided_load %arg13[%c0_74, %c0_75] {strides = array<i32: 2, 1>} : memref<256x32xf32, #tpu.memory_space<vmem>>, vector<128x32xf32>
    %c1 = arith.constant 1 : index
    %c0_76 = arith.constant 0 : index
    %77 = tpu.strided_load %arg13[%c1, %c0_76] {strides = array<i32: 2, 1>} : memref<256x32xf32, #tpu.memory_space<vmem>>, vector<128x32xf32>
    %78 = arith.maximumf %76, %77 : vector<128x32xf32>
    %79 = arith.truncf %78 : vector<128x32xf32> to vector<128x32xbf16>
    %c0_77 = arith.constant 0 : index
    %c0_78 = arith.constant 0 : index
    %80 = vector.load %arg14[%c0_77, %c0_78] : memref<128x32xbf16, #tpu.memory_space<vmem>>, vector<128x32xbf16>
    tpu.vector_store %arg14[%c0_77, %c0_78], %79 {strides = array<i32>} : memref<128x32xbf16, #tpu.memory_space<vmem>>, vector<128x32xbf16>,
    %cst_79 = arith.constant 0.000000e+00 : f32
    %81 = vector.broadcast %cst_79 : f32 to vector<110x64xf32>
    %c0_80 = arith.constant 0 : index
    %c0_81 = arith.constant 0 : index
    %82 = vector.load %arg14[%c0_80, %c0_81] : memref<128x32xbf16, #tpu.memory_space<vmem>>, vector<110x32xbf16>
    %c0_82 = arith.constant 0 : index
    %c0_83 = arith.constant 0 : index
    %c0_84 = arith.constant 0 : index
    %83 = vector.load %arg3[%c0_82, %c0_83, %c0_84] : memref<9x32x64xbf16, #tpu.memory_space<vmem>>, vector<1x32x64xbf16>
    %84 = vector.shape_cast %83 : vector<1x32x64xbf16> to vector<32x64xbf16>
    %cst_85 = arith.constant dense<0.000000e+00> : vector<110x64xf32>
    %85 = tpu.matmul %82, %84, %cst_85 {dimension_numbers = #tpu.dot_dimension_numbers<[1], [0], [0], [1], [0, 0, 1, 1], [], []>} : vector<110x32xbf16>, vector<32x64xbf16>, vector<110x64xf32> -> vector<110x64xf32>
    %86 = arith.addf %81, %85 : vector<110x64xf32>
    %c1_86 = arith.constant 1 : index
    %c0_87 = arith.constant 0 : index
    %87 = vector.load %arg14[%c1_86, %c0_87] : memref<128x32xbf16, #tpu.memory_space<vmem>>, vector<110x32xbf16>
    %c1_88 = arith.constant 1 : index
    %c0_89 = arith.constant 0 : index
    %c0_90 = arith.constant 0 : index
    %88 = vector.load %arg3[%c1_88, %c0_89, %c0_90] : memref<9x32x64xbf16, #tpu.memory_space<vmem>>, vector<1x32x64xbf16>
    %89 = vector.shape_cast %88 : vector<1x32x64xbf16> to vector<32x64xbf16>
    %cst_91 = arith.constant dense<0.000000e+00> : vector<110x64xf32>
    %90 = tpu.matmul %87, %89, %cst_91 {dimension_numbers = #tpu.dot_dimension_numbers<[1], [0], [0], [1], [0, 0, 1, 1], [], []>} : vector<110x32xbf16>, vector<32x64xbf16>, vector<110x64xf32> -> vector<110x64xf32>
    %91 = arith.addf %86, %90 : vector<110x64xf32>
    %c2 = arith.constant 2 : index
    %c0_92 = arith.constant 0 : index
    %92 = vector.load %arg14[%c2, %c0_92] : memref<128x32xbf16, #tpu.memory_space<vmem>>, vector<110x32xbf16>
    %c2_93 = arith.constant 2 : index
    %c0_94 = arith.constant 0 : index
    %c0_95 = arith.constant 0 : index
    %93 = vector.load %arg3[%c2_93, %c0_94, %c0_95] : memref<9x32x64xbf16, #tpu.memory_space<vmem>>, vector<1x32x64xbf16>
    %94 = vector.shape_cast %93 : vector<1x32x64xbf16> to vector<32x64xbf16>
    %cst_96 = arith.constant dense<0.000000e+00> : vector<110x64xf32>
    %95 = tpu.matmul %92, %94, %cst_96 {dimension_numbers = #tpu.dot_dimension_numbers<[1], [0], [0], [1], [0, 0, 1, 1], [], []>} : vector<110x32xbf16>, vector<32x64xbf16>, vector<110x64xf32> -> vector<110x64xf32>
    %96 = arith.addf %91, %95 : vector<110x64xf32>
    %c8 = arith.constant 8 : index
    %c0_97 = arith.constant 0 : index
    %97 = vector.load %arg14[%c8, %c0_97] : memref<128x32xbf16, #tpu.memory_space<vmem>>, vector<110x32xbf16>
    %c3 = arith.constant 3 : index
    %c0_98 = arith.constant 0 : index
    %c0_99 = arith.constant 0 : index
    %98 = vector.load %arg3[%c3, %c0_98, %c0_99] : memref<9x32x64xbf16, #tpu.memory_space<vmem>>, vector<1x32x64xbf16>
    %99 = vector.shape_cast %98 : vector<1x32x64xbf16> to vector<32x64xbf16>
    %cst_100 = arith.constant dense<0.000000e+00> : vector<110x64xf32>
    %100 = tpu.matmul %97, %99, %cst_100 {dimension_numbers = #tpu.dot_dimension_numbers<[1], [0], [0], [1], [0, 0, 1, 1], [], []>} : vector<110x32xbf16>, vector<32x64xbf16>, vector<110x64xf32> -> vector<110x64xf32>
    %101 = arith.addf %96, %100 : vector<110x64xf32>
    %c9 = arith.constant 9 : index
    %c0_101 = arith.constant 0 : index
    %102 = vector.load %arg14[%c9, %c0_101] : memref<128x32xbf16, #tpu.memory_space<vmem>>, vector<110x32xbf16>
    %c4 = arith.constant 4 : index
    %c0_102 = arith.constant 0 : index
    %c0_103 = arith.constant 0 : index
    %103 = vector.load %arg3[%c4, %c0_102, %c0_103] : memref<9x32x64xbf16, #tpu.memory_space<vmem>>, vector<1x32x64xbf16>
    %104 = vector.shape_cast %103 : vector<1x32x64xbf16> to vector<32x64xbf16>
    %cst_104 = arith.constant dense<0.000000e+00> : vector<110x64xf32>
    %105 = tpu.matmul %102, %104, %cst_104 {dimension_numbers = #tpu.dot_dimension_numbers<[1], [0], [0], [1], [0, 0, 1, 1], [], []>} : vector<110x32xbf16>, vector<32x64xbf16>, vector<110x64xf32> -> vector<110x64xf32>
    %106 = arith.addf %101, %105 : vector<110x64xf32>
    %c10 = arith.constant 10 : index
    %c0_105 = arith.constant 0 : index
    %107 = vector.load %arg14[%c10, %c0_105] : memref<128x32xbf16, #tpu.memory_space<vmem>>, vector<110x32xbf16>
    %c5 = arith.constant 5 : index
    %c0_106 = arith.constant 0 : index
    %c0_107 = arith.constant 0 : index
    %108 = vector.load %arg3[%c5, %c0_106, %c0_107] : memref<9x32x64xbf16, #tpu.memory_space<vmem>>, vector<1x32x64xbf16>
    %109 = vector.shape_cast %108 : vector<1x32x64xbf16> to vector<32x64xbf16>
    %cst_108 = arith.constant dense<0.000000e+00> : vector<110x64xf32>
    %110 = tpu.matmul %107, %109, %cst_108 {dimension_numbers = #tpu.dot_dimension_numbers<[1], [0], [0], [1], [0, 0, 1, 1], [], []>} : vector<110x32xbf16>, vector<32x64xbf16>, vector<110x64xf32> -> vector<110x64xf32>
    %111 = arith.addf %106, %110 : vector<110x64xf32>
    %c16_109 = arith.constant 16 : index
    %c0_110 = arith.constant 0 : index
    %112 = vector.load %arg14[%c16_109, %c0_110] : memref<128x32xbf16, #tpu.memory_space<vmem>>, vector<110x32xbf16>
    %c6 = arith.constant 6 : index
    %c0_111 = arith.constant 0 : index
    %c0_112 = arith.constant 0 : index
    %113 = vector.load %arg3[%c6, %c0_111, %c0_112] : memref<9x32x64xbf16, #tpu.memory_space<vmem>>, vector<1x32x64xbf16>
    %114 = vector.shape_cast %113 : vector<1x32x64xbf16> to vector<32x64xbf16>
    %cst_113 = arith.constant dense<0.000000e+00> : vector<110x64xf32>
    %115 = tpu.matmul %112, %114, %cst_113 {dimension_numbers = #tpu.dot_dimension_numbers<[1], [0], [0], [1], [0, 0, 1, 1], [], []>} : vector<110x32xbf16>, vector<32x64xbf16>, vector<110x64xf32> -> vector<110x64xf32>
    %116 = arith.addf %111, %115 : vector<110x64xf32>
    %c17 = arith.constant 17 : index
    %c0_114 = arith.constant 0 : index
    %117 = vector.load %arg14[%c17, %c0_114] : memref<128x32xbf16, #tpu.memory_space<vmem>>, vector<110x32xbf16>
    %c7 = arith.constant 7 : index
    %c0_115 = arith.constant 0 : index
    %c0_116 = arith.constant 0 : index
    %118 = vector.load %arg3[%c7, %c0_115, %c0_116] : memref<9x32x64xbf16, #tpu.memory_space<vmem>>, vector<1x32x64xbf16>
    %119 = vector.shape_cast %118 : vector<1x32x64xbf16> to vector<32x64xbf16>
    %cst_117 = arith.constant dense<0.000000e+00> : vector<110x64xf32>
    %120 = tpu.matmul %117, %119, %cst_117 {dimension_numbers = #tpu.dot_dimension_numbers<[1], [0], [0], [1], [0, 0, 1, 1], [], []>} : vector<110x32xbf16>, vector<32x64xbf16>, vector<110x64xf32> -> vector<110x64xf32>
    %121 = arith.addf %116, %120 : vector<110x64xf32>
    %c18 = arith.constant 18 : index
    %c0_118 = arith.constant 0 : index
    %122 = vector.load %arg14[%c18, %c0_118] : memref<128x32xbf16, #tpu.memory_space<vmem>>, vector<110x32xbf16>
    %c8_119 = arith.constant 8 : index
    %c0_120 = arith.constant 0 : index
    %c0_121 = arith.constant 0 : index
    %123 = vector.load %arg3[%c8_119, %c0_120, %c0_121] : memref<9x32x64xbf16, #tpu.memory_space<vmem>>, vector<1x32x64xbf16>
    %124 = vector.shape_cast %123 : vector<1x32x64xbf16> to vector<32x64xbf16>
    %cst_122 = arith.constant dense<0.000000e+00> : vector<110x64xf32>
    %125 = tpu.matmul %122, %124, %cst_122 {dimension_numbers = #tpu.dot_dimension_numbers<[1], [0], [0], [1], [0, 0, 1, 1], [], []>} : vector<110x32xbf16>, vector<32x64xbf16>, vector<110x64xf32> -> vector<110x64xf32>
    %126 = arith.addf %121, %125 : vector<110x64xf32>
    %c0_123 = arith.constant 0 : index
    %c0_124 = arith.constant 0 : index
    %127 = vector.load %arg4[%c0_123, %c0_124] : memref<1x64xf32, #tpu.memory_space<vmem>>, vector<1x64xf32>
    %128 = vector.broadcast %127 : vector<1x64xf32> to vector<110x64xf32>
    %129 = arith.addf %126, %128 : vector<110x64xf32>
    %cst_125 = arith.constant 0.000000e+00 : f32
    %130 = vector.broadcast %cst_125 : f32 to vector<110x64xf32>
    %131 = arith.cmpf oge, %129, %130 : vector<110x64xf32>
    %cst_126 = arith.constant 0.00999999977 : f32
    %132 = vector.broadcast %cst_126 : f32 to vector<110x64xf32>
    %133 = arith.mulf %132, %129 : vector<110x64xf32>
    %134 = arith.select %131, %129, %133 : vector<110x64xi1>, vector<110x64xf32>
    %135 = arith.truncf %134 : vector<110x64xf32> to vector<110x64xbf16>
    %c0_127 = arith.constant 0 : index
    %c0_128 = arith.constant 0 : index
    %136 = vector.load %arg15[%c0_127, %c0_128] : memref<110x64xbf16, #tpu.memory_space<vmem>>, vector<110x64xbf16>
    tpu.vector_store %arg15[%c0_127, %c0_128], %135 {strides = array<i32>} : memref<110x64xbf16, #tpu.memory_space<vmem>>, vector<110x64xbf16>,
    %cst_129 = arith.constant 0.000000e+00 : f32
    %137 = vector.broadcast %cst_129 : f32 to vector<92x64xf32>
    %c0_130 = arith.constant 0 : index
    %c0_131 = arith.constant 0 : index
    %138 = vector.load %arg15[%c0_130, %c0_131] : memref<110x64xbf16, #tpu.memory_space<vmem>>, vector<92x64xbf16>
    %c0_132 = arith.constant 0 : index
    %c0_133 = arith.constant 0 : index
    %c0_134 = arith.constant 0 : index
    %139 = vector.load %arg5[%c0_132, %c0_133, %c0_134] : memref<9x64x64xbf16, #tpu.memory_space<vmem>>, vector<1x64x64xbf16>
    %140 = vector.shape_cast %139 : vector<1x64x64xbf16> to vector<64x64xbf16>
    %cst_135 = arith.constant dense<0.000000e+00> : vector<92x64xf32>
    %141 = tpu.matmul %138, %140, %cst_135 {dimension_numbers = #tpu.dot_dimension_numbers<[1], [0], [0], [1], [0, 0, 1, 1], [], []>} : vector<92x64xbf16>, vector<64x64xbf16>, vector<92x64xf32> -> vector<92x64xf32>
    %142 = arith.addf %137, %141 : vector<92x64xf32>
    %c1_136 = arith.constant 1 : index
    %c0_137 = arith.constant 0 : index
    %143 = vector.load %arg15[%c1_136, %c0_137] : memref<110x64xbf16, #tpu.memory_space<vmem>>, vector<92x64xbf16>
    %c1_138 = arith.constant 1 : index
    %c0_139 = arith.constant 0 : index
    %c0_140 = arith.constant 0 : index
    %144 = vector.load %arg5[%c1_138, %c0_139, %c0_140] : memref<9x64x64xbf16, #tpu.memory_space<vmem>>, vector<1x64x64xbf16>
    %145 = vector.shape_cast %144 : vector<1x64x64xbf16> to vector<64x64xbf16>
    %cst_141 = arith.constant dense<0.000000e+00> : vector<92x64xf32>
    %146 = tpu.matmul %143, %145, %cst_141 {dimension_numbers = #tpu.dot_dimension_numbers<[1], [0], [0], [1], [0, 0, 1, 1], [], []>} : vector<92x64xbf16>, vector<64x64xbf16>, vector<92x64xf32> -> vector<92x64xf32>
    %147 = arith.addf %142, %146 : vector<92x64xf32>
    %c2_142 = arith.constant 2 : index
    %c0_143 = arith.constant 0 : index
    %148 = vector.load %arg15[%c2_142, %c0_143] : memref<110x64xbf16, #tpu.memory_space<vmem>>, vector<92x64xbf16>
    %c2_144 = arith.constant 2 : index
    %c0_145 = arith.constant 0 : index
    %c0_146 = arith.constant 0 : index
    %149 = vector.load %arg5[%c2_144, %c0_145, %c0_146] : memref<9x64x64xbf16, #tpu.memory_space<vmem>>, vector<1x64x64xbf16>
    %150 = vector.shape_cast %149 : vector<1x64x64xbf16> to vector<64x64xbf16>
    %cst_147 = arith.constant dense<0.000000e+00> : vector<92x64xf32>
    %151 = tpu.matmul %148, %150, %cst_147 {dimension_numbers = #tpu.dot_dimension_numbers<[1], [0], [0], [1], [0, 0, 1, 1], [], []>} : vector<92x64xbf16>, vector<64x64xbf16>, vector<92x64xf32> -> vector<92x64xf32>
    %152 = arith.addf %147, %151 : vector<92x64xf32>
    %c8_148 = arith.constant 8 : index
    %c0_149 = arith.constant 0 : index
    %153 = vector.load %arg15[%c8_148, %c0_149] : memref<110x64xbf16, #tpu.memory_space<vmem>>, vector<92x64xbf16>
    %c3_150 = arith.constant 3 : index
    %c0_151 = arith.constant 0 : index
    %c0_152 = arith.constant 0 : index
    %154 = vector.load %arg5[%c3_150, %c0_151, %c0_152] : memref<9x64x64xbf16, #tpu.memory_space<vmem>>, vector<1x64x64xbf16>
    %155 = vector.shape_cast %154 : vector<1x64x64xbf16> to vector<64x64xbf16>
    %cst_153 = arith.constant dense<0.000000e+00> : vector<92x64xf32>
    %156 = tpu.matmul %153, %155, %cst_153 {dimension_numbers = #tpu.dot_dimension_numbers<[1], [0], [0], [1], [0, 0, 1, 1], [], []>} : vector<92x64xbf16>, vector<64x64xbf16>, vector<92x64xf32> -> vector<92x64xf32>
    %157 = arith.addf %152, %156 : vector<92x64xf32>
    %c9_154 = arith.constant 9 : index
    %c0_155 = arith.constant 0 : index
    %158 = vector.load %arg15[%c9_154, %c0_155] : memref<110x64xbf16, #tpu.memory_space<vmem>>, vector<92x64xbf16>
    %c4_156 = arith.constant 4 : index
    %c0_157 = arith.constant 0 : index
    %c0_158 = arith.constant 0 : index
    %159 = vector.load %arg5[%c4_156, %c0_157, %c0_158] : memref<9x64x64xbf16, #tpu.memory_space<vmem>>, vector<1x64x64xbf16>
    %160 = vector.shape_cast %159 : vector<1x64x64xbf16> to vector<64x64xbf16>
    %cst_159 = arith.constant dense<0.000000e+00> : vector<92x64xf32>
    %161 = tpu.matmul %158, %160, %cst_159 {dimension_numbers = #tpu.dot_dimension_numbers<[1], [0], [0], [1], [0, 0, 1, 1], [], []>} : vector<92x64xbf16>, vector<64x64xbf16>, vector<92x64xf32> -> vector<92x64xf32>
    %162 = arith.addf %157, %161 : vector<92x64xf32>
    %c10_160 = arith.constant 10 : index
    %c0_161 = arith.constant 0 : index
    %163 = vector.load %arg15[%c10_160, %c0_161] : memref<110x64xbf16, #tpu.memory_space<vmem>>, vector<92x64xbf16>
    %c5_162 = arith.constant 5 : index
    %c0_163 = arith.constant 0 : index
    %c0_164 = arith.constant 0 : index
    %164 = vector.load %arg5[%c5_162, %c0_163, %c0_164] : memref<9x64x64xbf16, #tpu.memory_space<vmem>>, vector<1x64x64xbf16>
    %165 = vector.shape_cast %164 : vector<1x64x64xbf16> to vector<64x64xbf16>
    %cst_165 = arith.constant dense<0.000000e+00> : vector<92x64xf32>
    %166 = tpu.matmul %163, %165, %cst_165 {dimension_numbers = #tpu.dot_dimension_numbers<[1], [0], [0], [1], [0, 0, 1, 1], [], []>} : vector<92x64xbf16>, vector<64x64xbf16>, vector<92x64xf32> -> vector<92x64xf32>
    %167 = arith.addf %162, %166 : vector<92x64xf32>
    %c16_166 = arith.constant 16 : index
    %c0_167 = arith.constant 0 : index
    %168 = vector.load %arg15[%c16_166, %c0_167] : memref<110x64xbf16, #tpu.memory_space<vmem>>, vector<92x64xbf16>
    %c6_168 = arith.constant 6 : index
    %c0_169 = arith.constant 0 : index
    %c0_170 = arith.constant 0 : index
    %169 = vector.load %arg5[%c6_168, %c0_169, %c0_170] : memref<9x64x64xbf16, #tpu.memory_space<vmem>>, vector<1x64x64xbf16>
    %170 = vector.shape_cast %169 : vector<1x64x64xbf16> to vector<64x64xbf16>
    %cst_171 = arith.constant dense<0.000000e+00> : vector<92x64xf32>
    %171 = tpu.matmul %168, %170, %cst_171 {dimension_numbers = #tpu.dot_dimension_numbers<[1], [0], [0], [1], [0, 0, 1, 1], [], []>} : vector<92x64xbf16>, vector<64x64xbf16>, vector<92x64xf32> -> vector<92x64xf32>
    %172 = arith.addf %167, %171 : vector<92x64xf32>
    %c17_172 = arith.constant 17 : index
    %c0_173 = arith.constant 0 : index
    %173 = vector.load %arg15[%c17_172, %c0_173] : memref<110x64xbf16, #tpu.memory_space<vmem>>, vector<92x64xbf16>
    %c7_174 = arith.constant 7 : index
    %c0_175 = arith.constant 0 : index
    %c0_176 = arith.constant 0 : index
    %174 = vector.load %arg5[%c7_174, %c0_175, %c0_176] : memref<9x64x64xbf16, #tpu.memory_space<vmem>>, vector<1x64x64xbf16>
    %175 = vector.shape_cast %174 : vector<1x64x64xbf16> to vector<64x64xbf16>
    %cst_177 = arith.constant dense<0.000000e+00> : vector<92x64xf32>
    %176 = tpu.matmul %173, %175, %cst_177 {dimension_numbers = #tpu.dot_dimension_numbers<[1], [0], [0], [1], [0, 0, 1, 1], [], []>} : vector<92x64xbf16>, vector<64x64xbf16>, vector<92x64xf32> -> vector<92x64xf32>
    %177 = arith.addf %172, %176 : vector<92x64xf32>
    %c18_178 = arith.constant 18 : index
    %c0_179 = arith.constant 0 : index
    %178 = vector.load %arg15[%c18_178, %c0_179] : memref<110x64xbf16, #tpu.memory_space<vmem>>, vector<92x64xbf16>
    %c8_180 = arith.constant 8 : index
    %c0_181 = arith.constant 0 : index
    %c0_182 = arith.constant 0 : index
    %179 = vector.load %arg5[%c8_180, %c0_181, %c0_182] : memref<9x64x64xbf16, #tpu.memory_space<vmem>>, vector<1x64x64xbf16>
    %180 = vector.shape_cast %179 : vector<1x64x64xbf16> to vector<64x64xbf16>
    %cst_183 = arith.constant dense<0.000000e+00> : vector<92x64xf32>
    %181 = tpu.matmul %178, %180, %cst_183 {dimension_numbers = #tpu.dot_dimension_numbers<[1], [0], [0], [1], [0, 0, 1, 1], [], []>} : vector<92x64xbf16>, vector<64x64xbf16>, vector<92x64xf32> -> vector<92x64xf32>
    %182 = arith.addf %177, %181 : vector<92x64xf32>
    %c0_184 = arith.constant 0 : index
    %c0_185 = arith.constant 0 : index
    %183 = vector.load %arg6[%c0_184, %c0_185] : memref<1x64xf32, #tpu.memory_space<vmem>>, vector<1x64xf32>
    %184 = vector.broadcast %183 : vector<1x64xf32> to vector<92x64xf32>
    %185 = arith.addf %182, %184 : vector<92x64xf32>
    %cst_186 = arith.constant 0.000000e+00 : f32
    %186 = vector.broadcast %cst_186 : f32 to vector<92x64xf32>
    %187 = arith.cmpf oge, %185, %186 : vector<92x64xf32>
    %cst_187 = arith.constant 0.00999999977 : f32
    %188 = vector.broadcast %cst_187 : f32 to vector<92x64xf32>
    %189 = arith.mulf %188, %185 : vector<92x64xf32>
    %190 = arith.select %187, %185, %189 : vector<92x64xi1>, vector<92x64xf32>
    %c0_188 = arith.constant 0 : index
    %c0_189 = arith.constant 0 : index
    %191 = vector.load %arg16[%c0_188, %c0_189] : memref<92x64xf32, #tpu.memory_space<vmem>>, vector<92x64xf32>
    tpu.vector_store %arg16[%c0_188, %c0_189], %190 {strides = array<i32>} : memref<92x64xf32, #tpu.memory_space<vmem>>, vector<92x64xf32>,
    %c0_190 = arith.constant 0 : index
    %c0_191 = arith.constant 0 : index
    %192 = tpu.strided_load %arg16[%c0_190, %c0_191] {strides = array<i32: 64, 1>} : memref<92x64xf32, #tpu.memory_space<vmem>>, vector<2x64xf32>
    %c1_192 = arith.constant 1 : index
    %c0_193 = arith.constant 0 : index
    %193 = tpu.strided_load %arg16[%c1_192, %c0_193] {strides = array<i32: 64, 1>} : memref<92x64xf32, #tpu.memory_space<vmem>>, vector<2x64xf32>
    %194 = arith.maximumf %192, %193 : vector<2x64xf32>
    %c8_194 = arith.constant 8 : index
    %c0_195 = arith.constant 0 : index
    %195 = tpu.strided_load %arg16[%c8_194, %c0_195] {strides = array<i32: 64, 1>} : memref<92x64xf32, #tpu.memory_space<vmem>>, vector<2x64xf32>
    %196 = arith.maximumf %194, %195 : vector<2x64xf32>
    %c9_196 = arith.constant 9 : index
    %c0_197 = arith.constant 0 : index
    %197 = tpu.strided_load %arg16[%c9_196, %c0_197] {strides = array<i32: 64, 1>} : memref<92x64xf32, #tpu.memory_space<vmem>>, vector<2x64xf32>
    %198 = arith.maximumf %196, %197 : vector<2x64xf32>
    %c0_198 = arith.constant 0 : index
    %c0_199 = arith.constant 0 : index
    %199 = vector.load %arg17[%c0_198, %c0_199] : memref<2x256xf32, #tpu.memory_space<vmem>>, vector<2x64xf32>
    tpu.vector_store %arg17[%c0_198, %c0_199], %198 {strides = array<i32>} : memref<2x256xf32, #tpu.memory_space<vmem>>, vector<2x64xf32>,
    %c2_200 = arith.constant 2 : index
    %c0_201 = arith.constant 0 : index
    %200 = tpu.strided_load %arg16[%c2_200, %c0_201] {strides = array<i32: 64, 1>} : memref<92x64xf32, #tpu.memory_space<vmem>>, vector<2x64xf32>
    %c3_202 = arith.constant 3 : index
    %c0_203 = arith.constant 0 : index
    %201 = tpu.strided_load %arg16[%c3_202, %c0_203] {strides = array<i32: 64, 1>} : memref<92x64xf32, #tpu.memory_space<vmem>>, vector<2x64xf32>
    %202 = arith.maximumf %200, %201 : vector<2x64xf32>
    %c10_204 = arith.constant 10 : index
    %c0_205 = arith.constant 0 : index
    %203 = tpu.strided_load %arg16[%c10_204, %c0_205] {strides = array<i32: 64, 1>} : memref<92x64xf32, #tpu.memory_space<vmem>>, vector<2x64xf32>
    %204 = arith.maximumf %202, %203 : vector<2x64xf32>
    %c11 = arith.constant 11 : index
    %c0_206 = arith.constant 0 : index
    %205 = tpu.strided_load %arg16[%c11, %c0_206] {strides = array<i32: 64, 1>} : memref<92x64xf32, #tpu.memory_space<vmem>>, vector<2x64xf32>
    %206 = arith.maximumf %204, %205 : vector<2x64xf32>
    %c0_207 = arith.constant 0 : index
    %c64_208 = arith.constant 64 : index
    %207 = vector.load %arg17[%c0_207, %c64_208] : memref<2x256xf32, #tpu.memory_space<vmem>>, vector<2x64xf32>
    tpu.vector_store %arg17[%c0_207, %c64_208], %206 {strides = array<i32>} : memref<2x256xf32, #tpu.memory_space<vmem>>, vector<2x64xf32>,
    %c16_209 = arith.constant 16 : index
    %c0_210 = arith.constant 0 : index
    %208 = tpu.strided_load %arg16[%c16_209, %c0_210] {strides = array<i32: 64, 1>} : memref<92x64xf32, #tpu.memory_space<vmem>>, vector<2x64xf32>
    %c17_211 = arith.constant 17 : index
    %c0_212 = arith.constant 0 : index
    %209 = tpu.strided_load %arg16[%c17_211, %c0_212] {strides = array<i32: 64, 1>} : memref<92x64xf32, #tpu.memory_space<vmem>>, vector<2x64xf32>
    %210 = arith.maximumf %208, %209 : vector<2x64xf32>
    %c24 = arith.constant 24 : index
    %c0_213 = arith.constant 0 : index
    %211 = tpu.strided_load %arg16[%c24, %c0_213] {strides = array<i32: 64, 1>} : memref<92x64xf32, #tpu.memory_space<vmem>>, vector<2x64xf32>
    %212 = arith.maximumf %210, %211 : vector<2x64xf32>
    %c25 = arith.constant 25 : index
    %c0_214 = arith.constant 0 : index
    %213 = tpu.strided_load %arg16[%c25, %c0_214] {strides = array<i32: 64, 1>} : memref<92x64xf32, #tpu.memory_space<vmem>>, vector<2x64xf32>
    %214 = arith.maximumf %212, %213 : vector<2x64xf32>
    %c0_215 = arith.constant 0 : index
    %c128_216 = arith.constant 128 : index
    %215 = vector.load %arg17[%c0_215, %c128_216] : memref<2x256xf32, #tpu.memory_space<vmem>>, vector<2x64xf32>
    tpu.vector_store %arg17[%c0_215, %c128_216], %214 {strides = array<i32>} : memref<2x256xf32, #tpu.memory_space<vmem>>, vector<2x64xf32>,
    %c18_217 = arith.constant 18 : index
    %c0_218 = arith.constant 0 : index
    %216 = tpu.strided_load %arg16[%c18_217, %c0_218] {strides = array<i32: 64, 1>} : memref<92x64xf32, #tpu.memory_space<vmem>>, vector<2x64xf32>
    %c19 = arith.constant 19 : index
    %c0_219 = arith.constant 0 : index
    %217 = tpu.strided_load %arg16[%c19, %c0_219] {strides = array<i32: 64, 1>} : memref<92x64xf32, #tpu.memory_space<vmem>>, vector<2x64xf32>
    %218 = arith.maximumf %216, %217 : vector<2x64xf32>
    %c26 = arith.constant 26 : index
    %c0_220 = arith.constant 0 : index
    %219 = tpu.strided_load %arg16[%c26, %c0_220] {strides = array<i32: 64, 1>} : memref<92x64xf32, #tpu.memory_space<vmem>>, vector<2x64xf32>
    %220 = arith.maximumf %218, %219 : vector<2x64xf32>
    %c27 = arith.constant 27 : index
    %c0_221 = arith.constant 0 : index
    %221 = tpu.strided_load %arg16[%c27, %c0_221] {strides = array<i32: 64, 1>} : memref<92x64xf32, #tpu.memory_space<vmem>>, vector<2x64xf32>
    %222 = arith.maximumf %220, %221 : vector<2x64xf32>
    %c0_222 = arith.constant 0 : index
    %c192_223 = arith.constant 192 : index
    %223 = vector.load %arg17[%c0_222, %c192_223] : memref<2x256xf32, #tpu.memory_space<vmem>>, vector<2x64xf32>
    tpu.vector_store %arg17[%c0_222, %c192_223], %222 {strides = array<i32>} : memref<2x256xf32, #tpu.memory_space<vmem>>, vector<2x64xf32>,
    %c0_224 = arith.constant 0 : index
    %c0_225 = arith.constant 0 : index
    %224 = vector.load %arg17[%c0_224, %c0_225] : memref<2x256xf32, #tpu.memory_space<vmem>>, vector<2x256xf32>
    %225 = arith.truncf %224 : vector<2x256xf32> to vector<2x256xbf16>
    %c0_226 = arith.constant 0 : index
    %c0_227 = arith.constant 0 : index
    %226 = vector.load %arg7[%c0_226, %c0_227] : memref<256x512xbf16, #tpu.memory_space<vmem>>, vector<256x512xbf16>
    %cst_228 = arith.constant dense<0.000000e+00> : vector<2x512xf32>
    %227 = tpu.matmul %225, %226, %cst_228 {dimension_numbers = #tpu.dot_dimension_numbers<[1], [0], [0], [1], [0, 0, 1, 1], [], []>} : vector<2x256xbf16>, vector<256x512xbf16>, vector<2x512xf32> -> vector<2x512xf32>
    %c0_229 = arith.constant 0 : index
    %c0_230 = arith.constant 0 : index
    %228 = vector.load %arg8[%c0_229, %c0_230] : memref<1x512xf32, #tpu.memory_space<vmem>>, vector<1x512xf32>
    %229 = vector.broadcast %228 : vector<1x512xf32> to vector<2x512xf32>
    %230 = arith.addf %227, %229 : vector<2x512xf32>
    %cst_231 = arith.constant 0.000000e+00 : f32
    %231 = vector.broadcast %cst_231 : f32 to vector<2x512xf32>
    %232 = arith.maximumf %230, %231 : vector<2x512xf32>
    %c0_232 = arith.constant 0 : index
    %c0_233 = arith.constant 0 : index
    %233 = vector.load %arg9[%c0_232, %c0_233] : memref<1x512xf32, #tpu.memory_space<vmem>>, vector<1x512xf32>
    %234 = vector.broadcast %233 : vector<1x512xf32> to vector<2x512xf32>
    %235 = arith.mulf %232, %234 : vector<2x512xf32>
    %cst_234 = arith.constant dense<0.000000e+00> : vector<2xf32>
    %236 = vector.multi_reduction <add>, %235, %cst_234 [1] : vector<2x512xf32> to vector<2xf32>
    %237 = vector.shape_cast %236 : vector<2xf32> to vector<2x1xf32>
    %c0_235 = arith.constant 0 : index
    %c0_236 = arith.constant 0 : index
    %238 = vector.load %arg10[%c0_235, %c0_236] : memref<1x1xf32, #tpu.memory_space<vmem>>, vector<1x1xf32>
    %239 = vector.broadcast %238 : vector<1x1xf32> to vector<2x1xf32>
    %240 = arith.addf %237, %239 : vector<2x1xf32>
    %241 = math.absf %240 : vector<2x1xf32>
    %cst_237 = arith.constant 0.000000e+00 : f32
    %242 = vector.broadcast %cst_237 : f32 to vector<2x1xf32>
    %243 = arith.subf %242, %241 : vector<2x1xf32>
    %244 = math.exp %243 : vector<2x1xf32>
    %cst_238 = arith.constant 0.000000e+00 : f32
    %245 = vector.broadcast %cst_238 : f32 to vector<2x1xf32>
    %246 = arith.cmpf oge, %240, %245 : vector<2x1xf32>
    %cst_239 = arith.constant 1.000000e+00 : f32
    %247 = vector.broadcast %cst_239 : f32 to vector<2x1xf32>
    %248 = arith.addf %247, %244 : vector<2x1xf32>
    %cst_240 = arith.constant 1.000000e+00 : f32
    %249 = vector.broadcast %cst_240 : f32 to vector<2x1xf32>
    %250 = arith.divf %249, %248 : vector<2x1xf32>
    %cst_241 = arith.constant 1.000000e+00 : f32
    %251 = vector.broadcast %cst_241 : f32 to vector<2x1xf32>
    %252 = arith.addf %251, %244 : vector<2x1xf32>
    %253 = arith.divf %244, %252 : vector<2x1xf32>
    %254 = arith.select %246, %250, %253 : vector<2x1xi1>, vector<2x1xf32>
    %c0_242 = arith.constant 0 : index
    %c0_243 = arith.constant 0 : index
    %255 = vector.load %arg11[%c0_242, %c0_243] : memref<2x1xf32, #tpu.memory_space<vmem>>, vector<2x1xf32>
    tpu.vector_store %arg11[%c0_242, %c0_243], %254 {strides = array<i32>} : memref<2x1xf32, #tpu.memory_space<vmem>>, vector<2x1xf32>,
    return
  }
}

</mosaic_0001>

<bundles_post_ra>
// kernel: cnn_classifier_forward.1
= control target key start
LH: loop header
LB: loop body
LE: loop exit
PB: predicated region body
PF: predicated region fallthrough
CT: control target
= control target key end

     0   :  { %vm288_vm0 = vcmask 261120   ;;  %v8721_v35 = vmov 0.0   ;;  %vm6770_vm1 = vmmov 0   ;;  %s6772_s19 = smov 64   ;;  %s8709_s1 = inlined_call_operand.vmem [shape: bf16[32,32], index: 1, kind: input, shape index: {}]   ;;  %s8710_s0 = inlined_call_operand.vmem [shape: bf16[512,32], index: 0, kind: input, shape index: {}]   ;;  %s8711_s3 = inlined_call_operand.vmem [shape: bf16[9,32,64], index: 3, kind: input, shape index: {}]   ;;  %s8712_s2 = inlined_call_operand.vmem [shape: f32[1,32], index: 2, kind: input, shape index: {}]   ;;  %s8713_s5 = inlined_call_operand.vmem [shape: bf16[9,64,64], index: 5, kind: input, shape index: {}]   ;;  %s8714_s4 = inlined_call_operand.vmem [shape: f32[1,64], index: 4, kind: input, shape index: {}]   ;;  %s8715_s7 = inlined_call_operand.vmem [shape: bf16[256,512], index: 7, kind: input, shape index: {}]   ;;  %s8716_s6 = inlined_call_operand.vmem [shape: f32[1,64], index: 6, kind: input, shape index: {}]   ;;  %s8717_s10 = inlined_call_operand.<no memory space> [shape: f32[1,1], index: 10, kind: input, shape index: {}]   ;;  %s8718_s8 = inlined_call_operand.vmem [shape: f32[1,512], index: 8, kind: input, shape index: {}]   ;;  %s8719_s9 = inlined_call_operand.vmem [shape: f32[1,512], index: 9, kind: input, shape index: {}]   ;;  %s8720_s11 = inlined_call_operand.vmem [shape: f32[2,1], index: 11, kind: output, shape index: {}]  }
   0x1   :  { %v6531_v0 = vld [vmem:[%s8709_s1 + $0x8] sm:$0xff]   ;;  %v6532_v1 = vld [vmem:[%s8709_s1] sm:$0xff]   ;;  %v6535_v4 = vld [vmem:[%s8710_s0 + $0x10] sm:$0xff]   ;;  %6523 = vmatprep.subr.bf16.mxu1 %v8721_v35  ;;  %6063 = vmatprep.mubr.msk.bf16.mxu1 %vm6770_vm1, %v8721_v35 }
   0x2   :  { %5987 = vmatprep.subr.bf16.mxu0 %v6531_v0  ;;  %v6533_v2 = vld [vmem:[%s8710_s0] sm:$0xff]   ;;  %v6534_v3 = vld [vmem:[%s8710_s0 + $0x8] sm:$0xff]   ;;  %v6536_v5 = vld [vmem:[%s8710_s0 + $0x18] sm:$0xff]  }
   0x3   :  { %5988 = vmatpush3.bf16.msra.mxu0 %v6531_v0  ;;  %5991 = vmatprep.mubr.msk.bf16.mxu0 %vm288_vm0, %v6533_v2  ;;  %v6537_v6 = vld [vmem:[%s8710_s0 + $0x20] sm:$0xff]   ;;  %v6538_v7 = vld [vmem:[%s8710_s0 + $0x28] sm:$0xff]   ;;  %v6539_v8 = vld [vmem:[%s8710_s0 + $0x30] sm:$0xff]  }
   0x4   :  { %5989 = vmatprep.subr.bf16.mxu0 %v6532_v1  ;;  %v6540_v9 = vld [vmem:[%s8710_s0 + $0x38] sm:$0xff]   ;;  %v6541_v10 = vld [vmem:[%s8710_s0 + $0x40] sm:$0xff]   ;;  %v6542_v11 = vld [vmem:[%s8710_s0 + $0x48] sm:$0xff]  }
   0x5   :  { %v6543_v12 = vld [vmem:[%s8710_s0 + $0x50] sm:$0xff]   ;;  %v6544_v13 = vld [vmem:[%s8710_s0 + $0x58] sm:$0xff]   ;;  %v6545_v14 = vld [vmem:[%s8710_s0 + $0x60] sm:$0xff]  }
   0x6   :  { %v6546_v15 = vld [vmem:[%s8710_s0 + $0x68] sm:$0xff]   ;;  %v6547_v16 = vld [vmem:[%s8710_s0 + $0x70] sm:$0xff]   ;;  %v6548_v17 = vld [vmem:[%s8710_s0 + $0x78] sm:$0xff]  }
   0x7   :  { %5990 = vmatpush3.bf16.msra.mxu0 %v6532_v1  ;;  %v6549_v18 = vld [vmem:[%s8710_s0 + $0x80] sm:$0xff]   ;;  %v6550_v19 = vld [vmem:[%s8710_s0 + $0x88] sm:$0xff]   ;;  %v6551_v20 = vld [vmem:[%s8710_s0 + $0x90] sm:$0xff]  }
   0x8   :  { %v6552_v21 = vld [vmem:[%s8710_s0 + $0x98] sm:$0xff]   ;;  %v6553_v22 = vld [vmem:[%s8710_s0 + $0xa0] sm:$0xff]   ;;  %v6554_v23 = vld [vmem:[%s8710_s0 + $0xa8] sm:$0xff]   ;;  %6055 = vmatprep.subr.bf16.mxu0 %v8721_v35 }
   0x9   :  { %v6555_v24 = vld [vmem:[%s8710_s0 + $0xb0] sm:$0xff]   ;;  %v6556_v25 = vld [vmem:[%s8710_s0 + $0xb8] sm:$0xff]   ;;  %v6557_v26 = vld [vmem:[%s8710_s0 + $0xc0] sm:$0xff]  }
   0xa   :  { %5992 = vmatmul.mubr.msk.bf16.vlgmr.msra.gmra.mxu0 %vm288_vm0, %v6534_v3  ;;  %v6558_v27 = vld [vmem:[%s8710_s0 + $0xc8] sm:$0xff]   ;;  %v6559_v28 = vld [vmem:[%s8710_s0 + $0xd0] sm:$0xff]   ;;  %v6560_v29 = vld [vmem:[%s8710_s0 + $0xd8] sm:$0xff]  }
   0xb   :  { %5995 = vmatprep.mubr.msk.bf16.mxu0 %vm288_vm0, %v6535_v4  ;;  %v6561_v30 = vld [vmem:[%s8710_s0 + $0xe0] sm:$0xff]   ;;  %v6562_v31 = vld [vmem:[%s8710_s0 + $0xe8] sm:$0xff]   ;;  %v6563_v32 = vld [vmem:[%s8710_s0 + $0xf0] sm:$0xff]  }
   0xc   :  { %v6564_v33 = vld [vmem:[%s8710_s0 + $0xf8] sm:$0xff]   ;;  %v6566_v36 = vld [vmem:[%s8711_s3 + $0x10] sm:$0xff]   ;;  %v6986_v37 = vld [vmem:[%s8712_s2] ss:$0 sm:$0xff] }
   0xd   :  { %v6565_v34 = vld [vmem:[%s8711_s3 + $0x18] sm:$0xff]  }
   0xe   :  { %6056 = vmatpush3.bf16.msra.mxu0 %v6565_v34  ;;  %6525 = vmatpush3.bf16.msra.mxu1 %v6565_v34 }
   0xf   :  { %6057 = vmatprep.subr.bf16.mxu0 %v8721_v35  ;;  %6524 = vmatprep.subr.bf16.mxu1 %v8721_v35 }
  0x12   :  { %5996 = vmatmul.mubr.msk.bf16.gmra.mxu0 %vm288_vm0, %v6536_v5  ;;  %6526 = vmatpush3.bf16.msra.mxu1 %v6566_v36 }
  0x13   :  { %5999 = vmatprep.mubr.msk.bf16.mxu0 %vm288_vm0, %v6537_v6  ;;  %6058 = vmatpush3.bf16.msra.mxu0 %v6566_v36 }
  0x14   :  { %6151 = vmatprep.subr.bf16.mxu0 %v8721_v35  ;;  %6087 = vmatprep.subr.bf16.mxu1 %v8721_v35 }
  0x1a   :  { %6000 = vmatmul.mubr.msk.bf16.gmra.mxu0 %vm288_vm0, %v6538_v7 }
  0x1b   :  { %6003 = vmatprep.mubr.msk.bf16.mxu0 %vm288_vm0, %v6539_v8 }
  0x22   :  { %6004 = vmatmul.mubr.msk.bf16.gmra.mxu0 %vm288_vm0, %v6540_v9 }
  0x23   :  { %6007 = vmatprep.mubr.msk.bf16.mxu0 %vm288_vm0, %v6541_v10 }
  0x2a   :  { %6008 = vmatmul.mubr.msk.bf16.gmra.mxu0 %vm288_vm0, %v6542_v11 }
  0x2b   :  { %6011 = vmatprep.mubr.msk.bf16.mxu0 %vm288_vm0, %v6543_v12 }
  0x32   :  { %6012 = vmatmul.mubr.msk.bf16.gmra.mxu0 %vm288_vm0, %v6544_v13 }
  0x33   :  { %6015 = vmatprep.mubr.msk.bf16.mxu0 %vm288_vm0, %v6545_v14 }
  0x3a   :  { %6016 = vmatmul.mubr.msk.bf16.gmra.mxu0 %vm288_vm0, %v6546_v15 }
  0x3b   :  { %6019 = vmatprep.mubr.msk.bf16.mxu0 %vm288_vm0, %v6547_v16 }
  0x42   :  { %6020 = vmatmul.mubr.msk.bf16.gmra.mxu0 %vm288_vm0, %v6548_v17 }
  0x43   :  { %6023 = vmatprep.mubr.msk.bf16.mxu0 %vm288_vm0, %v6549_v18 }
  0x4a   :  { %6024 = vmatmul.mubr.msk.bf16.gmra.mxu0 %vm288_vm0, %v6550_v19 }
  0x4b   :  { %6027 = vmatprep.mubr.msk.bf16.mxu0 %vm288_vm0, %v6551_v20 }
  0x52   :  { %6028 = vmatmul.mubr.msk.bf16.gmra.mxu0 %vm288_vm0, %v6552_v21 }
  0x53   :  { %6031 = vmatprep.mubr.msk.bf16.mxu0 %vm288_vm0, %v6553_v22 }
  0x5a   :  { %6032 = vmatmul.mubr.msk.bf16.gmra.mxu0 %vm288_vm0, %v6554_v23 }
  0x5b   :  { %6035 = vmatprep.mubr.msk.bf16.mxu0 %vm288_vm0, %v6555_v24 }
  0x62   :  { %6036 = vmatmul.mubr.msk.bf16.gmra.mxu0 %vm288_vm0, %v6556_v25 }
  0x63   :  { %6039 = vmatprep.mubr.msk.bf16.mxu0 %vm288_vm0, %v6557_v26 }
  0x6a   :  { %6040 = vmatmul.mubr.msk.bf16.gmra.mxu0 %vm288_vm0, %v6558_v27 }
  0x6b   :  { %6043 = vmatprep.mubr.msk.bf16.mxu0 %vm288_vm0, %v6559_v28 }
  0x72   :  { %6044 = vmatmul.mubr.msk.bf16.gmra.mxu0 %vm288_vm0, %v6560_v29 }
  0x73   :  { %6047 = vmatprep.mubr.msk.bf16.mxu0 %vm288_vm0, %v6561_v30 }
  0x7a   :  { %6048 = vmatmul.mubr.msk.bf16.gmra.mxu0 %vm288_vm0, %v6562_v31 }
  0x7b   :  { %6051 = vmatprep.mubr.msk.bf16.mxu0 %vm288_vm0, %v6563_v32 }
  0x82   :  { %6052 = vmatmul.mubr.msk.bf16.gmra.mxu0 %vm288_vm0, %v6564_v33 }
  0x83   :  { %6059 = vmatprep.mubr.msk.bf16.mxu0 %vm6770_vm1, %v8721_v35 }
  0xca   :  { %v5993_v38 = vpop.f32.mrf.mxu0 }
  0xcb   :  { %v428_v39 = vadd.f32 %v5993_v38, %v6986_v37 }
  0xcc   :  { %v419_v40 = vpop.f32.mrf.mxu0 }
  0xcd   :  { %vm676_vm2 = vcmp.ge.f32.partialorder %v428_v39, 0.0  ;;  %v740_v41 = vmul.f32 0.01, %v428_v39  ;;  %v420_v42 = vadd.f32 %v6986_v37, %v419_v40 }
  0xce   :  { %v5994_v43 = vpop.f32.mrf.mxu0 }
  0xcf   :  { %v804_v44 = vsel %vm676_vm2, %v428_v39, %v740_v41  ;;  %vm674_vm3 = vcmp.ge.f32.partialorder %v420_v42, 0.0  ;;  %v738_v45 = vmul.f32 0.01, %v420_v42  ;;  %v431_v46 = vadd.f32 %v5994_v43, %v6986_v37 }
  0xd0   :  { %868 = vst.msk [vmem:[#allocation2 + $0x10] sm:$0xff] %vm288_vm0, %v804_v44  ;;  %v422_v47 = vpop.f32.mrf.mxu0 }
  0xd1   :  { %v802_v48 = vsel %vm674_vm3, %v420_v42, %v738_v45  ;;  %vm677_vm4 = vcmp.ge.f32.partialorder %v431_v46, 0.0  ;;  %v741_v49 = vmul.f32 0.01, %v431_v46  ;;  %v423_v50 = vadd.f32 %v6986_v37, %v422_v47 }
  0xd2   :  { %866 = vst.msk [vmem:[#allocation2] sm:$0xff] %vm288_vm0, %v802_v48  ;;  %v5997_v51 = vpop.f32.mrf.mxu0  ;;  %vm1201_vm3 = vcmask 257024  }
  0xd3   :  { %v805_v52 = vsel %vm677_vm4, %v431_v46, %v741_v49  ;;  %vm675_vm5 = vcmp.ge.f32.partialorder %v423_v50, 0.0  ;;  %v739_v53 = vmul.f32 0.01, %v423_v50  ;;  %v444_v54 = vadd.f32 %v5997_v51, %v6986_v37 }
  0xd4   :  { %869 = vst.msk [vmem:[#allocation2 + $0x18] sm:$0xff] %vm288_vm0, %v805_v52  ;;  %v435_v55 = vpop.f32.mrf.mxu0 }
  0xd5   :  { %v803_v56 = vsel %vm675_vm5, %v423_v50, %v739_v53  ;;  %vm680_vm6 = vcmp.ge.f32.partialorder %v444_v54, 0.0  ;;  %v744_v57 = vmul.f32 0.01, %v444_v54  ;;  %v436_v58 = vadd.f32 %v6986_v37, %v435_v55 }
  0xd6   :  { %867 = vst.msk [vmem:[#allocation2 + $0x8] sm:$0xff] %vm288_vm0, %v803_v56  ;;  %v5998_v59 = vpop.f32.mrf.mxu0 }
  0xd7   :  { %v808_v60 = vsel %vm680_vm6, %v444_v54, %v744_v57  ;;  %vm678_vm7 = vcmp.ge.f32.partialorder %v436_v58, 0.0  ;;  %v742_v61 = vmul.f32 0.01, %v436_v58  ;;  %v447_v62 = vadd.f32 %v5998_v59, %v6986_v37  ;;  %v932_v0 = vld [vmem:[#allocation2 + $0x10] sm:$0xff] }
  0xd8   :  { %872 = vst.msk [vmem:[#allocation2 + $0x30] sm:$0xff] %vm288_vm0, %v808_v60  ;;  %v438_v63 = vpop.f32.mrf.mxu0 }
  0xd9   :  { %v930_v1 = vld [vmem:[#allocation2] sm:$0xff]  ;;  %v806_v2 = vsel %vm678_vm7, %v436_v58, %v742_v61  ;;  %vm681_vm8 = vcmp.ge.f32.partialorder %v447_v62, 0.0  ;;  %v745_v3 = vmul.f32 0.01, %v447_v62  ;;  %v439_v4 = vadd.f32 %v6986_v37, %v438_v63 }
  0xda   :  { %v934_v5 = vmax.f32 %v930_v1, %v932_v0  ;;  %870 = vst.msk [vmem:[#allocation2 + $0x20] sm:$0xff] %vm288_vm0, %v806_v2  ;;  %v6001_v6 = vpop.f32.mrf.mxu0 }
  0xdb   :  { %v809_v7 = vsel %vm681_vm8, %v447_v62, %v745_v3  ;;  %vm679_vm9 = vcmp.ge.f32.partialorder %v439_v4, 0.0  ;;  %v743_v8 = vmul.f32 0.01, %v439_v4  ;;  %v460_v9 = vadd.f32 %v6001_v6, %v6986_v37  ;;  %v933_v11 = vld [vmem:[#allocation2 + $0x18] sm:$0xff] }
  0xdc   :  { %936 = vst.msk [vmem:[#allocation3] sm:$0xff] %vm288_vm0, %v934_v5  ;;  %873 = vst.msk [vmem:[#allocation2 + $0x38] sm:$0xff] %vm288_vm0, %v809_v7  ;;  %v451_v10 = vpop.f32.mrf.mxu0 }
  0xdd   :  { %v931_v12 = vld [vmem:[#allocation2 + $0x8] sm:$0xff]  ;;  %v807_v13 = vsel %vm679_vm9, %v439_v4, %v743_v8  ;;  %vm684_vm10 = vcmp.ge.f32.partialorder %v460_v9, 0.0  ;;  %v748_v14 = vmul.f32 0.01, %v460_v9  ;;  %v452_v15 = vadd.f32 %v6986_v37, %v451_v10 }
  0xde   :  { %v935_v16 = vmax.f32 %v931_v12, %v933_v11  ;;  %871 = vst.msk [vmem:[#allocation2 + $0x28] sm:$0xff] %vm288_vm0, %v807_v13  ;;  %v6002_v17 = vpop.f32.mrf.mxu0 }
  0xdf   :  { %v812_v18 = vsel %vm684_vm10, %v460_v9, %v748_v14  ;;  %vm682_vm11 = vcmp.ge.f32.partialorder %v452_v15, 0.0  ;;  %v746_v19 = vmul.f32 0.01, %v452_v15  ;;  %v463_v20 = vadd.f32 %v6002_v17, %v6986_v37  ;;  %v940_v22 = vld [vmem:[#allocation2 + $0x30] sm:$0xff] }
  0xe0   :  { %937 = vst.msk [vmem:[#allocation3 + $0x8] sm:$0xff] %vm288_vm0, %v935_v16  ;;  %876 = vst.msk [vmem:[#allocation2 + $0x50] sm:$0xff] %vm288_vm0, %v812_v18  ;;  %v454_v21 = vpop.f32.mrf.mxu0 }
  0xe1   :  { %v938_v23 = vld [vmem:[#allocation2 + $0x20] sm:$0xff]  ;;  %v810_v24 = vsel %vm682_vm11, %v452_v15, %v746_v19  ;;  %vm685_vm12 = vcmp.ge.f32.partialorder %v463_v20, 0.0  ;;  %v749_v25 = vmul.f32 0.01, %v463_v20  ;;  %v455_v26 = vadd.f32 %v6986_v37, %v454_v21 }
  0xe2   :  { %v942_v27 = vmax.f32 %v938_v23, %v940_v22  ;;  %874 = vst.msk [vmem:[#allocation2 + $0x40] sm:$0xff] %vm288_vm0, %v810_v24  ;;  %v6005_v28 = vpop.f32.mrf.mxu0 }
  0xe3   :  { %v813_v29 = vsel %vm685_vm12, %v463_v20, %v749_v25  ;;  %vm683_vm13 = vcmp.ge.f32.partialorder %v455_v26, 0.0  ;;  %v747_v30 = vmul.f32 0.01, %v455_v26  ;;  %v476_v31 = vadd.f32 %v6005_v28, %v6986_v37  ;;  %v941_v33 = vld [vmem:[#allocation2 + $0x38] sm:$0xff] }
  0xe4   :  { %944 = vst.msk [vmem:[#allocation3 + $0x10] sm:$0xff] %vm288_vm0, %v942_v27  ;;  %877 = vst.msk [vmem:[#allocation2 + $0x58] sm:$0xff] %vm288_vm0, %v813_v29  ;;  %v467_v32 = vpop.f32.mrf.mxu0 }
  0xe5   :  { %v939_v34 = vld [vmem:[#allocation2 + $0x28] sm:$0xff]  ;;  %v811_v36 = vsel %vm683_vm13, %v455_v26, %v747_v30  ;;  %vm688_vm14 = vcmp.ge.f32.partialorder %v476_v31, 0.0  ;;  %v752_v38 = vmul.f32 0.01, %v476_v31  ;;  %v468_v39 = vadd.f32 %v6986_v37, %v467_v32 }
  0xe6   :  { %v943_v40 = vmax.f32 %v939_v34, %v941_v33  ;;  %875 = vst.msk [vmem:[#allocation2 + $0x48] sm:$0xff] %vm288_vm0, %v811_v36  ;;  %v6006_v41 = vpop.f32.mrf.mxu0 }
  0xe7   :  { %v816_v42 = vsel %vm688_vm14, %v476_v31, %v752_v38  ;;  %vm686_vm15 = vcmp.ge.f32.partialorder %v468_v39, 0.0  ;;  %v750_v43 = vmul.f32 0.01, %v468_v39  ;;  %v479_v44 = vadd.f32 %v6006_v41, %v6986_v37  ;;  %v1058_v45 = vld [vmem:[#allocation3] ss:$2 sm:$0xff]  ;;  %v948_v48 = vld [vmem:[#allocation2 + $0x50] sm:$0xff] }
  0xe8   :  { %945 = vst.msk [vmem:[#allocation3 + $0x18] sm:$0xff] %vm288_vm0, %v943_v40  ;;  %880 = vst.msk [vmem:[#allocation2 + $0x70] sm:$0xff] %vm288_vm0, %v816_v42  ;;  %v470_v46 = vpop.f32.mrf.mxu0  ;;  %v1090_v47 = vld [vmem:[#allocation3 + $0x1] ss:$2 sm:$0xff] }
  0xe9   :  { %v946_v49 = vld [vmem:[#allocation2 + $0x40] sm:$0xff]  ;;  %v814_v50 = vsel %vm686_vm15, %v468_v39, %v750_v43  ;;  %vm689_vm2 = vcmp.ge.f32.partialorder %v479_v44, 0.0  ;;  %v753_v51 = vmul.f32 0.01, %v479_v44  ;;  %v471_v52 = vadd.f32 %v6986_v37, %v470_v46 }
  0xea   :  { %v950_v53 = vmax.f32 %v946_v49, %v948_v48  ;;  %878 = vst.msk [vmem:[#allocation2 + $0x60] sm:$0xff] %vm288_vm0, %v814_v50  ;;  %v6009_v54 = vpop.f32.mrf.mxu0  ;;  %v1121_v55 = vmax.f32 %v1058_v45, %v1090_v47 }
  0xeb   :  { %v817_v56 = vsel %vm689_vm2, %v479_v44, %v753_v51  ;;  %vm687_vm4 = vcmp.ge.f32.partialorder %v471_v52, 0.0  ;;  %v751_v57 = vmul.f32 0.01, %v471_v52  ;;  %v492_v58 = vadd.f32 %v6009_v54, %v6986_v37  ;;  %v949_v61 = vld [vmem:[#allocation2 + $0x58] sm:$0xff] }
  0xec   :  { %952 = vst.msk [vmem:[#allocation3 + $0x20] sm:$0xff] %vm288_vm0, %v950_v53  ;;  %881 = vst.msk [vmem:[#allocation2 + $0x78] sm:$0xff] %vm288_vm0, %v817_v56  ;;  %v483_v59 = vpop.f32.mrf.mxu0  ;;  %v5752_v60 = vpack.c.bf16 %v1121_v55, %v1121_v55 }
  0xed   :  { %v947_v62 = vld [vmem:[#allocation2 + $0x48] sm:$0xff]  ;;  %v815_v63 = vsel %vm687_vm4, %v471_v52, %v751_v57  ;;  %vm692_vm5 = vcmp.ge.f32.partialorder %v492_v58, 0.0  ;;  %v756_v0 = vmul.f32 0.01, %v492_v58  ;;  %v484_v1 = vadd.f32 %v6986_v37, %v483_v59 }
  0xee   :  { %v951_v2 = vmax.f32 %v947_v62, %v949_v61  ;;  %879 = vst.msk [vmem:[#allocation2 + $0x68] sm:$0xff] %vm288_vm0, %v815_v63  ;;  %v6010_v3 = vpop.f32.mrf.mxu0 }
  0xef   :  { %1202 = vst.msk [vmem:[#allocation4] sm:$0xf] %vm1201_vm3, %v5752_v60  ;;  %v820_v4 = vsel %vm692_vm5, %v492_v58, %v756_v0  ;;  %vm690_vm6 = vcmp.ge.f32.partialorder %v484_v1, 0.0  ;;  %v754_v5 = vmul.f32 0.01, %v484_v1  ;;  %v495_v6 = vadd.f32 %v6010_v3, %v6986_v37  ;;  %v956_v10 = vld [vmem:[#allocation2 + $0x70] sm:$0xff] }
  0xf0   :  { %v1060_v7 = vld [vmem:[#allocation3 + $0x10] ss:$2 sm:$0xff]  ;;  %953 = vst.msk [vmem:[#allocation3 + $0x28] sm:$0xff] %vm288_vm0, %v951_v2  ;;  %884 = vst.msk [vmem:[#allocation2 + $0x90] sm:$0xff] %vm288_vm0, %v820_v4  ;;  %v486_v8 = vpop.f32.mrf.mxu0  ;;  %v1092_v9 = vld [vmem:[#allocation3 + $0x11] ss:$2 sm:$0xff] }
  0xf1   :  { %v954_v11 = vld [vmem:[#allocation2 + $0x60] sm:$0xff]  ;;  %v818_v12 = vsel %vm690_vm6, %v484_v1, %v754_v5  ;;  %vm693_vm7 = vcmp.ge.f32.partialorder %v495_v6, 0.0  ;;  %v757_v13 = vmul.f32 0.01, %v495_v6  ;;  %v487_v14 = vadd.f32 %v6986_v37, %v486_v8 }
  0xf2   :  { %v958_v15 = vmax.f32 %v954_v11, %v956_v10  ;;  %882 = vst.msk [vmem:[#allocation2 + $0x80] sm:$0xff] %vm288_vm0, %v818_v12  ;;  %v6013_v16 = vpop.f32.mrf.mxu0  ;;  %v1122_v17 = vmax.f32 %v1060_v7, %v1092_v9 }
  0xf3   :  { %v821_v18 = vsel %vm693_vm7, %v495_v6, %v757_v13  ;;  %vm691_vm8 = vcmp.ge.f32.partialorder %v487_v14, 0.0  ;;  %v755_v19 = vmul.f32 0.01, %v487_v14  ;;  %v508_v20 = vadd.f32 %v6013_v16, %v6986_v37  ;;  %v957_v23 = vld [vmem:[#allocation2 + $0x78] sm:$0xff] }
  0xf4   :  { %960 = vst.msk [vmem:[#allocation3 + $0x30] sm:$0xff] %vm288_vm0, %v958_v15  ;;  %885 = vst.msk [vmem:[#allocation2 + $0x98] sm:$0xff] %vm288_vm0, %v821_v18  ;;  %v499_v21 = vpop.f32.mrf.mxu0  ;;  %v5753_v22 = vpack.c.bf16 %v1122_v17, %v1122_v17 }
  0xf5   :  { %v955_v24 = vld [vmem:[#allocation2 + $0x68] sm:$0xff]  ;;  %v819_v25 = vsel %vm691_vm8, %v487_v14, %v755_v19  ;;  %vm696_vm9 = vcmp.ge.f32.partialorder %v508_v20, 0.0  ;;  %v760_v26 = vmul.f32 0.01, %v508_v20  ;;  %v500_v27 = vadd.f32 %v6986_v37, %v499_v21 }
  0xf6   :  { %v959_v28 = vmax.f32 %v955_v24, %v957_v23  ;;  %883 = vst.msk [vmem:[#allocation2 + $0x88] sm:$0xff] %vm288_vm0, %v819_v25  ;;  %v6014_v29 = vpop.f32.mrf.mxu0  ;;  %v1218_v15 = vld [vmem:[#allocation4] sm:$0xf] }
  0xf7   :  { %1203 = vst.msk [vmem:[#allocation4 + $0x4] sm:$0xf] %vm1201_vm3, %v5753_v22  ;;  %v824_v30 = vsel %vm696_vm9, %v508_v20, %v760_v26  ;;  %vm694_vm10 = vcmp.ge.f32.partialorder %v500_v27, 0.0  ;;  %v758_v31 = vmul.f32 0.01, %v500_v27  ;;  %v511_v32 = vadd.f32 %v6014_v29, %v6986_v37  ;;  %v964_v38 = vld [vmem:[#allocation2 + $0x90] sm:$0xff] }
  0xf8   :  { %v1062_v33 = vld [vmem:[#allocation3 + $0x20] ss:$2 sm:$0xff]  ;;  %961 = vst.msk [vmem:[#allocation3 + $0x38] sm:$0xff] %vm288_vm0, %v959_v28  ;;  %888 = vst.msk [vmem:[#allocation2 + $0xb0] sm:$0xff] %vm288_vm0, %v824_v30  ;;  %v502_v34 = vpop.f32.mrf.mxu0  ;;  %v1094_v36 = vld [vmem:[#allocation3 + $0x21] ss:$2 sm:$0xff] }
  0xf9   :  { %v962_v39 = vld [vmem:[#allocation2 + $0x80] sm:$0xff]  ;;  %v822_v40 = vsel %vm694_vm10, %v500_v27, %v758_v31  ;;  %vm697_vm11 = vcmp.ge.f32.partialorder %v511_v32, 0.0  ;;  %v761_v41 = vmul.f32 0.01, %v511_v32  ;;  %v503_v42 = vadd.f32 %v6986_v37, %v502_v34 }
  0xfa   :  { %v966_v43 = vmax.f32 %v962_v39, %v964_v38  ;;  %886 = vst.msk [vmem:[#allocation2 + $0xa0] sm:$0xff] %vm288_vm0, %v822_v40  ;;  %v6017_v44 = vpop.f32.mrf.mxu0  ;;  %v1123_v45 = vmax.f32 %v1062_v33, %v1094_v36  ;;  %vm1277_vm10 = vsmask.f32 7424 }
  0xfb   :  { %v825_v46 = vsel %vm697_vm11, %v511_v32, %v761_v41  ;;  %vm695_vm12 = vcmp.ge.f32.partialorder %v503_v42, 0.0  ;;  %v759_v47 = vmul.f32 0.01, %v503_v42  ;;  %v524_v48 = vadd.f32 %v6017_v44, %v6986_v37  ;;  %v965_v51 = vld [vmem:[#allocation2 + $0x98] sm:$0xff] }
  0xfc   :  { %968 = vst.msk [vmem:[#allocation3 + $0x40] sm:$0xff] %vm288_vm0, %v966_v43  ;;  %889 = vst.msk [vmem:[#allocation2 + $0xb8] sm:$0xff] %vm288_vm0, %v825_v46  ;;  %v515_v49 = vpop.f32.mrf.mxu0  ;;  %v5754_v50 = vpack.c.bf16 %v1123_v45, %v1123_v45 }
  0xfd   :  { %v963_v52 = vld [vmem:[#allocation2 + $0x88] sm:$0xff]  ;;  %v823_v53 = vsel %vm695_vm12, %v503_v42, %v759_v47  ;;  %vm700_vm13 = vcmp.ge.f32.partialorder %v524_v48, 0.0  ;;  %v764_v54 = vmul.f32 0.01, %v524_v48  ;;  %v516_v55 = vadd.f32 %v6986_v37, %v515_v49 }
  0xfe   :  { %v967_v56 = vmax.f32 %v963_v52, %v965_v51  ;;  %887 = vst.msk [vmem:[#allocation2 + $0xa8] sm:$0xff] %vm288_vm0, %v823_v53  ;;  %v6018_v57 = vpop.f32.mrf.mxu0  ;;  %v1219_v11 = vld [vmem:[#allocation4 + $0x4] sm:$0xf] }
  0xff   :  { %1204 = vst.msk [vmem:[#allocation4 + $0x8] sm:$0xf] %vm1201_vm3, %v5754_v50  ;;  %v828_v58 = vsel %vm700_vm13, %v524_v48, %v764_v54  ;;  %vm698_vm14 = vcmp.ge.f32.partialorder %v516_v55, 0.0  ;;  %v762_v59 = vmul.f32 0.01, %v516_v55  ;;  %v527_v60 = vadd.f32 %v6018_v57, %v6986_v37  ;;  %v972_v0 = vld [vmem:[#allocation2 + $0xb0] sm:$0xff] }
 0x100   :  { %v1064_v61 = vld [vmem:[#allocation3 + $0x30] ss:$2 sm:$0xff]  ;;  %969 = vst.msk [vmem:[#allocation3 + $0x48] sm:$0xff] %vm288_vm0, %v967_v56  ;;  %892 = vst.msk [vmem:[#allocation2 + $0xd0] sm:$0xff] %vm288_vm0, %v828_v58  ;;  %v518_v62 = vpop.f32.mrf.mxu0  ;;  %v1096_v63 = vld [vmem:[#allocation3 + $0x31] ss:$2 sm:$0xff]  ;;  %v7061_v22 = vcombine.low %v1218_v15, %v1219_v11 }
 0x101   :  { %v970_v1 = vld [vmem:[#allocation2 + $0xa0] sm:$0xff]  ;;  %v826_v2 = vsel %vm698_vm14, %v516_v55, %v762_v59  ;;  %vm701_vm15 = vcmp.ge.f32.partialorder %v527_v60, 0.0  ;;  %v765_v3 = vmul.f32 0.01, %v527_v60  ;;  %v519_v4 = vadd.f32 %v6986_v37, %v518_v62 }
 0x102   :  { %v974_v5 = vmax.f32 %v970_v1, %v972_v0  ;;  %890 = vst.msk [vmem:[#allocation2 + $0xc0] sm:$0xff] %vm288_vm0, %v826_v2  ;;  %v6021_v6 = vpop.f32.mrf.mxu0  ;;  %v1124_v7 = vmax.f32 %v1064_v61, %v1096_v63  ;;  %v1281_v38 = vshll.u32 %v7061_v22, 16  ;;  %v1733_v55 = vld [vmem:[#allocation4 + $0x4] sm:$0xf]  ;;  %v1279_v61 = vshrl.u32 %v7061_v22, 16 }
 0x103   :  { %v829_v8 = vsel %vm701_vm15, %v527_v60, %v765_v3  ;;  %vm699_vm2 = vcmp.ge.f32.partialorder %v519_v4, 0.0  ;;  %v763_v9 = vmul.f32 0.01, %v519_v4  ;;  %v540_v10 = vadd.f32 %v6021_v6, %v6986_v37  ;;  %v973_v12 = vld [vmem:[#allocation2 + $0xb8] sm:$0xff]  ;;  %v2117_v15 = vld [vmem:[#allocation4 + $0x4] sm:$0xe] }
 0x104   :  { %976 = vst.msk [vmem:[#allocation3 + $0x50] sm:$0xff] %vm288_vm0, %v974_v5  ;;  %893 = vst.msk [vmem:[#allocation2 + $0xd8] sm:$0xff] %vm288_vm0, %v829_v8  ;;  %v531_v13 = vpop.f32.mrf.mxu0  ;;  %v5755_v14 = vpack.c.bf16 %v1124_v7, %v1124_v7  ;;  %v1283_v54 = vrot.slane %v1281_v38, 1  ;;  %vm1583_vm14 = vcmask 1046528  }
 0x105   :  { %v971_v16 = vld [vmem:[#allocation2 + $0xa8] sm:$0xff]  ;;  %v827_v17 = vsel %vm699_vm2, %v519_v4, %v763_v9  ;;  %vm704_vm4 = vcmp.ge.f32.partialorder %v540_v10, 0.0  ;;  %v768_v18 = vmul.f32 0.01, %v540_v10  ;;  %v532_v19 = vadd.f32 %v6986_v37, %v531_v13 }
 0x106   :  { %v975_v20 = vmax.f32 %v971_v16, %v973_v12  ;;  %891 = vst.msk [vmem:[#allocation2 + $0xc8] sm:$0xff] %vm288_vm0, %v827_v17  ;;  %v6022_v21 = vpop.f32.mrf.mxu0  ;;  %v7072_v45 = vld [vmem:[#allocation4 + $0x8] sm:$0xf]  ;;  %v1284_v8 = vor.u32 %v1283_v54, %v1279_v61 }
 0x107   :  { %1205 = vst.msk [vmem:[#allocation4 + $0xc] sm:$0xf] %vm1201_vm3, %v5755_v14  ;;  %v832_v23 = vsel %vm704_vm4, %v540_v10, %v768_v18  ;;  %vm702_vm5 = vcmp.ge.f32.partialorder %v532_v19, 0.0  ;;  %v766_v24 = vmul.f32 0.01, %v532_v19  ;;  %v543_v25 = vadd.f32 %v6022_v21, %v6986_v37  ;;  %v980_v29 = vld [vmem:[#allocation2 + $0xd0] sm:$0xff] }
 0x108   :  { %v1066_v26 = vld [vmem:[#allocation3 + $0x40] ss:$2 sm:$0xff]  ;;  %977 = vst.msk [vmem:[#allocation3 + $0x58] sm:$0xff] %vm288_vm0, %v975_v20  ;;  %896 = vst.msk [vmem:[#allocation2 + $0xf0] sm:$0xff] %vm288_vm0, %v832_v23  ;;  %v534_v27 = vpop.f32.mrf.mxu0  ;;  %v1098_v28 = vld [vmem:[#allocation3 + $0x41] ss:$2 sm:$0xff]  ;;  %v7085_v63 = vcombine.low %v1733_v55, %v7072_v45  ;;  %v5434_v21 = vcombine.low %v2117_v15, %v7072_v45 }
 0x109   :  { %v978_v30 = vld [vmem:[#allocation2 + $0xc0] sm:$0xff]  ;;  %v830_v31 = vsel %vm702_vm5, %v532_v19, %v766_v24  ;;  %vm705_vm6 = vcmp.ge.f32.partialorder %v543_v25, 0.0  ;;  %v769_v32 = vmul.f32 0.01, %v543_v25  ;;  %v535_v33 = vadd.f32 %v6986_v37, %v534_v27  ;;  %v6569_v10 = vld [vmem:[%s8711_s3 + $0x38] sm:$0xff]   ;;  %v6570_v19 = vld [vmem:[%s8711_s3 + $0x30] sm:$0xff]  }
 0x10a   :  { %v982_v34 = vmax.f32 %v978_v30, %v980_v29  ;;  %894 = vst.msk [vmem:[#allocation2 + $0xe0] sm:$0xff] %vm288_vm0, %v830_v31  ;;  %v6025_v36 = vpop.f32.mrf.mxu0  ;;  %v1125_v39 = vmax.f32 %v1066_v26, %v1098_v28  ;;  %v1934_v23 = vshll.u32 %v7085_v63, 16  ;;  %v1932_v54 = vshrl.u32 %v7085_v63, 16 }
 0x10b   :  { %v833_v40 = vsel %vm705_vm6, %v543_v25, %v769_v32  ;;  %vm703_vm7 = vcmp.ge.f32.partialorder %v535_v33, 0.0  ;;  %v767_v41 = vmul.f32 0.01, %v535_v33  ;;  %v556_v42 = vadd.f32 %v6025_v36, %v6986_v37  ;;  %v981_v43 = vld [vmem:[#allocation2 + $0xd8] sm:$0xff] }
 0x10c   :  { %984 = vst.msk [vmem:[#allocation3 + $0x60] sm:$0xff] %vm288_vm0, %v982_v34  ;;  %897 = vst.msk [vmem:[#allocation2 + $0xf8] sm:$0xff] %vm288_vm0, %v833_v40  ;;  %v547_v44 = vpop.f32.mrf.mxu0  ;;  %v5756_v46 = vpack.c.bf16 %v1125_v39, %v1125_v39  ;;  %v2126_v39 = vrot.slane %v5434_v21, 1 }
 0x10d   :  { %v979_v47 = vld [vmem:[#allocation2 + $0xc8] sm:$0xff]  ;;  %v831_v48 = vsel %vm703_vm7, %v535_v33, %v767_v41  ;;  %vm708_vm8 = vcmp.ge.f32.partialorder %v556_v42, 0.0  ;;  %v772_v49 = vmul.f32 0.01, %v556_v42  ;;  %v548_v50 = vadd.f32 %v6986_v37, %v547_v44 }
 0x10e   :  { %v983_v51 = vmax.f32 %v979_v47, %v981_v43  ;;  %895 = vst.msk [vmem:[#allocation2 + $0xe8] sm:$0xff] %vm288_vm0, %v831_v48  ;;  %v6026_v52 = vpop.f32.mrf.mxu0  ;;  %v7076_v53 = vld [vmem:[#allocation4 + $0x8] sm:$0xff]   ;;  %v1936_v41 = vrot.slane %v1934_v23, 1 }
 0x10f   :  { %1206 = vst.msk [vmem:[#allocation4 + $0x10] sm:$0xf] %vm1201_vm3, %v5756_v46  ;;  %v836_v56 = vsel %vm708_vm8, %v556_v42, %v772_v49  ;;  %vm706_vm9 = vcmp.ge.f32.partialorder %v548_v50, 0.0  ;;  %v770_v57 = vmul.f32 0.01, %v548_v50  ;;  %v559_v58 = vadd.f32 %v6026_v52, %v6986_v37  ;;  %v988_v1 = vld [vmem:[#allocation2 + $0xf0] sm:$0xff] }
 0x110   :  { %v1068_v59 = vld [vmem:[#allocation3 + $0x50] ss:$2 sm:$0xff]  ;;  %985 = vst.msk [vmem:[#allocation3 + $0x68] sm:$0xff] %vm288_vm0, %v983_v51  ;;  %900 = vst.msk [vmem:[#allocation2 + $0x110] sm:$0xff] %vm288_vm0, %v836_v56  ;;  %v550_v60 = vpop.f32.mrf.mxu0  ;;  %v1286_v62 = vshll.u32 %v7076_v53, 16  ;;  %v1937_v61 = vor.u32 %v1936_v41, %v1932_v54 }
 0x111   :  { %v1100_v0 = vld [vmem:[#allocation3 + $0x51] ss:$2 sm:$0xff]  ;;  %v986_v2 = vld [vmem:[#allocation2 + $0xe0] sm:$0xff]  ;;  %v834_v3 = vsel %vm706_vm9, %v548_v50, %v770_v57  ;;  %vm709_vm11 = vcmp.ge.f32.partialorder %v559_v58, 0.0  ;;  %v773_v4 = vmul.f32 0.01, %v559_v58  ;;  %v551_v5 = vadd.f32 %v6986_v37, %v550_v60 }
 0x112   :  { %v990_v6 = vmax.f32 %v986_v2, %v988_v1  ;;  %898 = vst.msk [vmem:[#allocation2 + $0x100] sm:$0xff] %vm288_vm0, %v834_v3  ;;  %v6029_v7 = vpop.f32.mrf.mxu0  ;;  %v7089_v9 = vrot.slane %v1286_v62, 1  ;;  %v1126_v11 = vmax.f32 %v1068_v59, %v1100_v0  ;;  %v6586_v51 = vld [vmem:[%s8711_s3 + $0x58] sm:$0xff]  }
 0x113   :  { %v837_v12 = vsel %vm709_vm11, %v559_v58, %v773_v4  ;;  %vm707_vm12 = vcmp.ge.f32.partialorder %v551_v5, 0.0  ;;  %v771_v13 = vmul.f32 0.01, %v551_v5  ;;  %v572_v14 = vadd.f32 %v6029_v7, %v6986_v37  ;;  %v989_v16 = vld [vmem:[#allocation2 + $0xf8] sm:$0xff]  ;;  %v6587_v7 = vld [vmem:[%s8711_s3 + $0x50] sm:$0xff]  }
 0x114   :  { %992 = vst.msk [vmem:[#allocation3 + $0x70] sm:$0xff] %vm288_vm0, %v990_v6  ;;  %901 = vst.msk [vmem:[#allocation2 + $0x118] sm:$0xff] %vm288_vm0, %v837_v12  ;;  %v1289_v17 = vsel %vm1277_vm10, %v1284_v8, %v7089_v9  ;;  %v563_v18 = vpop.f32.mrf.mxu0  ;;  %v5757_v20 = vpack.c.bf16 %v1126_v11, %v1126_v11 }
 0x115   :  { %v987_v24 = vld [vmem:[#allocation2 + $0xe8] sm:$0xff]  ;;  %v835_v25 = vsel %vm707_vm12, %v551_v5, %v771_v13  ;;  %vm712_vm13 = vcmp.ge.f32.partialorder %v572_v14, 0.0  ;;  %v776_v26 = vmul.f32 0.01, %v572_v14  ;;  %6060 = vmatmul.mubr.msk.bf16.vlgmr.msra.gmra.mxu0 %vm288_vm0, %v1289_v17  ;;  %v564_v27 = vadd.f32 %v6986_v37, %v563_v18 }
 0x116   :  { %v991_v28 = vmax.f32 %v987_v24, %v989_v16  ;;  %899 = vst.msk [vmem:[#allocation2 + $0x108] sm:$0xff] %vm288_vm0, %v835_v25  ;;  %6152 = vmatpush3.bf16.msra.mxu0 %v6569_v10  ;;  %v6030_v29 = vpop.f32.mrf.mxu0  ;;  %6155 = vmatprep.mubr.msk.bf16.mxu0 %vm6770_vm1, %v8721_v35  ;;  %v7110_v30 = vld [vmem:[#allocation4 + $0xc] sm:$0xff]  }
 0x117   :  { %1207 = vst.msk [vmem:[#allocation4 + $0x14] sm:$0xf] %vm1201_vm3, %v5757_v20  ;;  %v840_v31 = vsel %vm712_vm13, %v572_v14, %v776_v26  ;;  %vm710_vm15 = vcmp.ge.f32.partialorder %v564_v27, 0.0  ;;  %v774_v32 = vmul.f32 0.01, %v564_v27  ;;  %v575_v33 = vadd.f32 %v6030_v29, %v6986_v37  ;;  %6153 = vmatprep.subr.bf16.mxu0 %v8721_v35  ;;  %v996_v43 = vld [vmem:[#allocation2 + $0x110] sm:$0xff] }
 0x118   :  { %v1070_v34 = vld [vmem:[#allocation3 + $0x60] ss:$2 sm:$0xff]  ;;  %993 = vst.msk [vmem:[#allocation3 + $0x78] sm:$0xff] %vm288_vm0, %v991_v28  ;;  %904 = vst.msk [vmem:[#allocation2 + $0x130] sm:$0xff] %vm288_vm0, %v840_v31  ;;  %v566_v36 = vpop.f32.mrf.mxu0  ;;  %v1102_v38 = vld [vmem:[#allocation3 + $0x61] ss:$2 sm:$0xff] }
 0x119   :  { %v2127_v40 = vrot.slane %v7110_v30, 1  ;;  %v1938_v42 = vshll.u32 %v7110_v30, 16  ;;  %v994_v44 = vld [vmem:[#allocation2 + $0x100] sm:$0xff]  ;;  %v838_v45 = vsel %vm710_vm15, %v564_v27, %v774_v32  ;;  %vm713_vm2 = vcmp.ge.f32.partialorder %v575_v33, 0.0  ;;  %v6578_v32 = vld [vmem:[%s8711_s3 + $0x8] sm:$0xff]  }
 0x11a   :  { %v777_v46 = vmul.f32 0.01, %v575_v33  ;;  %v567_v47 = vadd.f32 %v6986_v37, %v566_v36  ;;  %v998_v48 = vmax.f32 %v994_v44, %v996_v43  ;;  %902 = vst.msk [vmem:[#allocation2 + $0x120] sm:$0xff] %vm288_vm0, %v838_v45  ;;  %6154 = vmatpush3.bf16.msra.mxu0 %v6570_v19  ;;  %v6033_v49 = vpop.f32.mrf.mxu0  ;;  %v1127_v50 = vmax.f32 %v1070_v34, %v1102_v38 }
 0x11b   :  { %v7126_v52 = vsel %vm1583_vm14, %v2126_v39, %v2127_v40  ;;  %v588_v57 = vadd.f32 %v6033_v49, %v6986_v37  ;;  %6215 = vmatprep.subr.bf16.mxu0 %v8721_v35  ;;  %v997_v58 = vld [vmem:[#allocation2 + $0x118] sm:$0xff]  ;;  %v7133_v62 = vrot.slane %v1938_v42, 1  ;;  %v1290_v14 = vshrl.u32 %v7076_v53, 16 }
 0x11c   :  { %v841_v55 = vsel %vm713_vm2, %v575_v33, %v777_v46  ;;  %vm711_vm4 = vcmp.ge.f32.partialorder %v567_v47, 0.0  ;;  %v775_v56 = vmul.f32 0.01, %v567_v47  ;;  %1000 = vst.msk [vmem:[#allocation3 + $0x80] sm:$0xff] %vm288_vm0, %v998_v48  ;;  %v579_v59 = vpop.f32.mrf.mxu0  ;;  %v5758_v60 = vpack.c.bf16 %v1127_v50, %v1127_v50  ;;  %v6582_v50 = vld [vmem:[%s8711_s3] sm:$0xff]  }
 0x11d   :  { %905 = vst.msk [vmem:[#allocation2 + $0x138] sm:$0xff] %vm288_vm0, %v841_v55  ;;  %v995_v0 = vld [vmem:[#allocation2 + $0x108] sm:$0xff]  ;;  %vm716_vm5 = vcmp.ge.f32.partialorder %v588_v57, 0.0  ;;  %v780_v2 = vmul.f32 0.01, %v588_v57  ;;  %6156 = vmatmul.mubr.msk.bf16.vlgmr.msra.gmra.mxu0 %vm288_vm0, %v7085_v63  ;;  %v580_v3 = vadd.f32 %v6986_v37, %v579_v59  ;;  %v7149_v63 = vsel %vm1277_vm10, %v1937_v61, %v7133_v62 }
 0x11e   :  { %v839_v1 = vsel %vm711_vm4, %v567_v47, %v775_v56  ;;  %v999_v4 = vmax.f32 %v995_v0, %v997_v58  ;;  %v6034_v5 = vpop.f32.mrf.mxu0  ;;  %6159 = vmatprep.mubr.msk.bf16.mxu0 %vm6770_vm1, %v8721_v35  ;;  %v7141_v6 = vld [vmem:[#allocation4 + $0x10] sm:$0xff]   ;;  %1208 = vst.msk [vmem:[#allocation4 + $0x18] sm:$0xf] %vm1201_vm3, %v5758_v60  ;;  %6216 = vmatpush3.bf16.msra.mxu0 %v6586_v51 }
 0x11f   :  { %903 = vst.msk [vmem:[#allocation2 + $0x128] sm:$0xff] %vm288_vm0, %v839_v1  ;;  %v844_v8 = vsel %vm716_vm5, %v588_v57, %v780_v2  ;;  %vm714_vm6 = vcmp.ge.f32.partialorder %v580_v3, 0.0  ;;  %v778_v10 = vmul.f32 0.01, %v580_v3  ;;  %v591_v11 = vadd.f32 %v6034_v5, %v6986_v37  ;;  %v1072_v12 = vld [vmem:[#allocation3 + $0x70] ss:$2 sm:$0xff]  ;;  %6217 = vmatprep.subr.bf16.mxu0 %v8721_v35 }
 0x120   :  { %1001 = vst.msk [vmem:[#allocation3 + $0x88] sm:$0xff] %vm288_vm0, %v999_v4  ;;  %908 = vst.msk [vmem:[#allocation2 + $0x150] sm:$0xff] %vm288_vm0, %v844_v8  ;;  %v582_v13 = vpop.f32.mrf.mxu0  ;;  %v1294_v15 = vshll.u32 %v7141_v6, 16  ;;  %v1104_v16 = vld [vmem:[#allocation3 + $0x71] ss:$2 sm:$0xff]  ;;  %v1292_v25 = vor.u32 %v1290_v14, %v7089_v9  ;;  %v1942_v4 = vshrl.u32 %v7110_v30, 16 }
 0x121   :  { %v1004_v17 = vld [vmem:[#allocation2 + $0x130] sm:$0xff]  ;;  %v1002_v18 = vld [vmem:[#allocation2 + $0x120] sm:$0xff]  ;;  %v842_v19 = vsel %vm714_vm6, %v580_v3, %v778_v10  ;;  %vm717_vm7 = vcmp.ge.f32.partialorder %v591_v11, 0.0  ;;  %v781_v20 = vmul.f32 0.01, %v591_v11  ;;  %v583_v21 = vadd.f32 %v6986_v37, %v582_v13 }
 0x122   :  { %v1006_v23 = vmax.f32 %v1002_v18, %v1004_v17  ;;  %906 = vst.msk [vmem:[#allocation2 + $0x140] sm:$0xff] %vm288_vm0, %v842_v19  ;;  %v6037_v24 = vpop.f32.mrf.mxu0  ;;  %v7160_v26 = vrot.slane %v1294_v15, 1  ;;  %v1128_v27 = vmax.f32 %v1072_v12, %v1104_v16  ;;  %6218 = vmatpush3.bf16.msra.mxu0 %v6587_v7 }
 0x123   :  { %v845_v28 = vsel %vm717_vm7, %v591_v11, %v781_v20  ;;  %vm715_vm8 = vcmp.ge.f32.partialorder %v583_v21, 0.0  ;;  %v779_v29 = vmul.f32 0.01, %v583_v21  ;;  %v604_v31 = vadd.f32 %v6037_v24, %v6986_v37  ;;  %6279 = vmatprep.subr.bf16.mxu0 %v8721_v35 }
 0x124   :  { %1008 = vst.msk [vmem:[#allocation3 + $0x90] sm:$0xff] %vm288_vm0, %v1006_v23  ;;  %v1005_v33 = vld [vmem:[#allocation2 + $0x138] sm:$0xff]  ;;  %909 = vst.msk [vmem:[#allocation2 + $0x158] sm:$0xff] %vm288_vm0, %v845_v28  ;;  %v1297_v9 = vsel %vm1277_vm10, %v1292_v25, %v7160_v26  ;;  %v595_v34 = vpop.f32.mrf.mxu0  ;;  %v5759_v36 = vpack.c.bf16 %v1128_v27, %v1128_v27  ;;  %v1298_v27 = vshrl.u32 %v7141_v6, 16 }
 0x125   :  { %v843_v39 = vsel %vm715_vm8, %v583_v21, %v779_v29  ;;  %vm720_vm9 = vcmp.ge.f32.partialorder %v604_v31, 0.0  ;;  %v784_v41 = vmul.f32 0.01, %v604_v31  ;;  %6064 = vmatmul.mubr.msk.bf16.vlgmr.msra.gmra.mxu1 %vm288_vm0, %v1297_v9  ;;  %6160 = vmatmul.mubr.msk.bf16.gmra.mxu0 %vm288_vm0, %v7110_v30  ;;  %v596_v42 = vadd.f32 %v6986_v37, %v595_v34  ;;  %v7178_v45 = vld [vmem:[#allocation4 + $0x14] sm:$0xff]  }
 0x126   :  { %v1003_v38 = vld [vmem:[#allocation2 + $0x128] sm:$0xff]  ;;  %907 = vst.msk [vmem:[#allocation2 + $0x148] sm:$0xff] %vm288_vm0, %v843_v39  ;;  %v6038_v44 = vpop.f32.mrf.mxu0  ;;  %6163 = vmatprep.mubr.msk.bf16.mxu0 %vm6770_vm1, %v8721_v35  ;;  %6067 = vmatprep.mubr.msk.bf16.mxu1 %vm6770_vm1, %v8721_v35  ;;  %v2129_v55 = vrot.slane %v7178_v45, 1  ;;  %v1945_v56 = vshll.u32 %v7178_v45, 16  ;;  %v1300_v39 = vor.u32 %v1298_v27, %v7160_v26 }
 0x127   :  { %v1007_v43 = vmax.f32 %v1003_v38, %v1005_v33  ;;  %1209 = vst.msk [vmem:[#allocation4 + $0x1c] sm:$0xf] %vm1201_vm3, %v5759_v36  ;;  %v848_v46 = vsel %vm720_vm9, %v604_v31, %v784_v41  ;;  %vm718_vm11 = vcmp.ge.f32.partialorder %v596_v42, 0.0  ;;  %v782_v47 = vmul.f32 0.01, %v596_v42  ;;  %6088 = vmatpush3.bf16.msra.mxu1 %v6578_v32  ;;  %v1012_v57 = vld [vmem:[#allocation2 + $0x150] sm:$0xff] }
 0x128   :  { %v607_v48 = vadd.f32 %v6038_v44, %v6986_v37  ;;  %v1074_v49 = vld [vmem:[#allocation3 + $0x80] ss:$2 sm:$0xff]  ;;  %912 = vst.msk [vmem:[#allocation2 + $0x170] sm:$0xff] %vm288_vm0, %v848_v46  ;;  %v598_v51 = vpop.f32.mrf.mxu0  ;;  %v1106_v54 = vld [vmem:[#allocation3 + $0x81] ss:$2 sm:$0xff]  ;;  %6089 = vmatprep.subr.bf16.mxu1 %v8721_v35  ;;  %v7199_v3 = vsel %vm1583_vm14, %v2127_v40, %v2129_v55  ;;  %v1944_v40 = vor.u32 %v1942_v4, %v7133_v62  ;;  %v7207_v13 = vrot.slane %v1945_v56, 1 }
 0x129   :  { %1009 = vst.msk [vmem:[#allocation3 + $0x98] sm:$0xff] %vm288_vm0, %v1007_v43  ;;  %v1010_v58 = vld [vmem:[#allocation2 + $0x140] sm:$0xff]  ;;  %v846_v59 = vsel %vm718_vm11, %v596_v42, %v782_v47  ;;  %v599_v61 = vadd.f32 %v6986_v37, %v598_v51  ;;  %v1129_v2 = vmax.f32 %v1074_v49, %v1106_v54 }
 0x12a   :  { %vm721_vm12 = vcmp.ge.f32.partialorder %v607_v48, 0.0  ;;  %v785_v60 = vmul.f32 0.01, %v607_v48  ;;  %v1014_v0 = vmax.f32 %v1010_v58, %v1012_v57  ;;  %910 = vst.msk [vmem:[#allocation2 + $0x160] sm:$0xff] %vm288_vm0, %v846_v59  ;;  %v6041_v1 = vpop.f32.mrf.mxu0  ;;  %v7220_v62 = vsel %vm1277_vm10, %v1944_v40, %v7207_v13 }
 0x12b   :  { %vm719_vm13 = vcmp.ge.f32.partialorder %v599_v61, 0.0  ;;  %v783_v7 = vmul.f32 0.01, %v599_v61  ;;  %v620_v8 = vadd.f32 %v6041_v1, %v6986_v37  ;;  %6090 = vmatpush3.bf16.msra.mxu1 %v6582_v50  ;;  %v1013_v10 = vld [vmem:[#allocation2 + $0x158] sm:$0xff]  ;;  %v5760_v12 = vpack.c.bf16 %v1129_v2, %v1129_v2 }
 0x12c   :  { %v849_v5 = vsel %vm721_vm12, %v607_v48, %v785_v60  ;;  %1016 = vst.msk [vmem:[#allocation3 + $0xa0] sm:$0xff] %vm288_vm0, %v1014_v0  ;;  %v611_v11 = vpop.f32.mrf.mxu0  ;;  %6119 = vmatprep.subr.bf16.mxu1 %v8721_v35  ;;  %v1949_v60 = vshrl.u32 %v7178_v45, 16 }
 0x12d   :  { %913 = vst.msk [vmem:[#allocation2 + $0x178] sm:$0xff] %vm288_vm0, %v849_v5  ;;  %v1011_v30 = vld [vmem:[#allocation2 + $0x148] sm:$0xff]  ;;  %v847_v14 = vsel %vm719_vm13, %v599_v61, %v783_v7  ;;  %vm724_vm15 = vcmp.ge.f32.partialorder %v620_v8, 0.0  ;;  %v788_v15 = vmul.f32 0.01, %v620_v8  ;;  %6164 = vmatmul.mubr.msk.bf16.gmra.mxu0 %vm288_vm0, %v7178_v45  ;;  %v612_v16 = vadd.f32 %v6986_v37, %v611_v11 }
 0x12e   :  { %v1015_v17 = vmax.f32 %v1011_v30, %v1013_v10  ;;  %911 = vst.msk [vmem:[#allocation2 + $0x168] sm:$0xff] %vm288_vm0, %v847_v14  ;;  %v6042_v18 = vpop.f32.mrf.mxu0  ;;  %v7213_v19 = vld [vmem:[#allocation4 + $0x18] sm:$0xff]   ;;  %6167 = vmatprep.mubr.msk.bf16.mxu0 %vm6770_vm1, %v8721_v35  ;;  %v7225_v37 = vld [vmem:[%s8712_s2] ss:$0 sm:$0xff] }
 0x12f   :  { %1210 = vst.msk [vmem:[#allocation4 + $0x20] sm:$0xf] %vm1201_vm3, %v5760_v12  ;;  %v852_v20 = vsel %vm724_vm15, %v620_v8, %v788_v15  ;;  %vm722_vm2 = vcmp.ge.f32.partialorder %v612_v16, 0.0  ;;  %v786_v21 = vmul.f32 0.01, %v612_v16  ;;  %v623_v23 = vadd.f32 %v7225_v37, %v6042_v18  ;;  %v1020_v31 = vld [vmem:[#allocation2 + $0x170] sm:$0xff] }
 0x130   :  { %v1076_v24 = vld [vmem:[#allocation3 + $0x90] ss:$2 sm:$0xff]  ;;  %1017 = vst.msk [vmem:[#allocation3 + $0xa8] sm:$0xff] %vm288_vm0, %v1015_v17  ;;  %916 = vst.msk [vmem:[#allocation2 + $0x190] sm:$0xff] %vm288_vm0, %v852_v20  ;;  %v614_v25 = vpop.f32.mrf.mxu0  ;;  %v1302_v28 = vshll.u32 %v7213_v19, 16  ;;  %v1951_v8 = vor.u32 %v1949_v60, %v7207_v13 }
 0x131   :  { %v1108_v29 = vld [vmem:[#allocation3 + $0x91] ss:$2 sm:$0xff]  ;;  %v1018_v32 = vld [vmem:[#allocation2 + $0x160] sm:$0xff]  ;;  %v850_v33 = vsel %vm722_vm2, %v612_v16, %v786_v21  ;;  %vm725_vm4 = vcmp.ge.f32.partialorder %v623_v23, 0.0  ;;  %v789_v9 = vmul.f32 0.01, %v623_v23  ;;  %v615_v34 = vadd.f32 %v7225_v37, %v614_v25 }
 0x132   :  { %v1022_v36 = vmax.f32 %v1018_v32, %v1020_v31  ;;  %914 = vst.msk [vmem:[#allocation2 + $0x180] sm:$0xff] %vm288_vm0, %v850_v33  ;;  %v6045_v38 = vpop.f32.mrf.mxu0  ;;  %v7235_v41 = vrot.slane %v1302_v28, 1  ;;  %v1130_v42 = vmax.f32 %v1076_v24, %v1108_v29 }
 0x133   :  { %v853_v43 = vsel %vm725_vm4, %v623_v23, %v789_v9  ;;  %vm723_vm5 = vcmp.ge.f32.partialorder %v615_v34, 0.0  ;;  %v787_v44 = vmul.f32 0.01, %v615_v34  ;;  %v636_v46 = vadd.f32 %v7225_v37, %v6045_v38 }
 0x134   :  { %1024 = vst.msk [vmem:[#allocation3 + $0xb0] sm:$0xff] %vm288_vm0, %v1022_v36  ;;  %v1021_v47 = vld [vmem:[#allocation2 + $0x178] sm:$0xff]  ;;  %917 = vst.msk [vmem:[#allocation2 + $0x198] sm:$0xff] %vm288_vm0, %v853_v43  ;;  %v1305_v48 = vsel %vm1277_vm10, %v1300_v39, %v7235_v41  ;;  %v627_v49 = vpop.f32.mrf.mxu0  ;;  %v5761_v50 = vpack.c.bf16 %v1130_v42, %v1130_v42  ;;  %v1306_v43 = vshrl.u32 %v7213_v19, 16 }
 0x135   :  { %v1019_v51 = vld [vmem:[#allocation2 + $0x168] sm:$0xff]  ;;  %v851_v26 = vsel %vm723_vm5, %v615_v34, %v787_v44  ;;  %vm728_vm6 = vcmp.ge.f32.partialorder %v636_v46, 0.0  ;;  %v792_v54 = vmul.f32 0.01, %v636_v46  ;;  %6068 = vmatmul.mubr.msk.bf16.gmra.mxu1 %vm288_vm0, %v1305_v48  ;;  %v628_v56 = vadd.f32 %v7225_v37, %v627_v49 }
 0x136   :  { %v1023_v57 = vmax.f32 %v1019_v51, %v1021_v47  ;;  %915 = vst.msk [vmem:[#allocation2 + $0x188] sm:$0xff] %vm288_vm0, %v851_v26  ;;  %v6046_v58 = vpop.f32.mrf.mxu0  ;;  %v7245_v59 = vld [vmem:[#allocation4 + $0x1c] sm:$0xff]   ;;  %6071 = vmatprep.mubr.msk.bf16.mxu1 %vm6770_vm1, %v8721_v35 }
 0x137   :  { %1211 = vst.msk [vmem:[#allocation4 + $0x24] sm:$0xf] %vm1201_vm3, %v5761_v50  ;;  %v856_v61 = vsel %vm728_vm6, %v636_v46, %v792_v54  ;;  %vm726_vm7 = vcmp.ge.f32.partialorder %v628_v56, 0.0  ;;  %v790_v0 = vmul.f32 0.01, %v628_v56  ;;  %v639_v1 = vadd.f32 %v7225_v37, %v6046_v58  ;;  %6168 = vmatmul.mubr.msk.bf16.gmra.mxu0 %vm288_vm0, %v7245_v59  ;;  %v1028_v11 = vld [vmem:[#allocation2 + $0x190] sm:$0xff] }
 0x138   :  { %v1078_v2 = vld [vmem:[#allocation3 + $0xa0] ss:$2 sm:$0xff]  ;;  %1025 = vst.msk [vmem:[#allocation3 + $0xb8] sm:$0xff] %vm288_vm0, %v1023_v57  ;;  %920 = vst.msk [vmem:[#allocation2 + $0x1b0] sm:$0xff] %vm288_vm0, %v856_v61  ;;  %v630_v4 = vpop.f32.mrf.mxu0  ;;  %v1110_v5 = vld [vmem:[#allocation3 + $0xa1] ss:$2 sm:$0xff]  ;;  %6171 = vmatprep.mubr.msk.bf16.mxu0 %vm6770_vm1, %v8721_v35 }
 0x139   :  { %v2131_v7 = vrot.slane %v7245_v59, 1  ;;  %v1952_v10 = vshll.u32 %v7245_v59, 16  ;;  %v1026_v12 = vld [vmem:[#allocation2 + $0x180] sm:$0xff]  ;;  %v854_v40 = vsel %vm726_vm7, %v628_v56, %v790_v0  ;;  %vm729_vm8 = vcmp.ge.f32.partialorder %v639_v1, 0.0 }
 0x13a   :  { %v793_v30 = vmul.f32 0.01, %v639_v1  ;;  %v631_v14 = vadd.f32 %v7225_v37, %v630_v4  ;;  %v1030_v15 = vmax.f32 %v1026_v12, %v1028_v11  ;;  %918 = vst.msk [vmem:[#allocation2 + $0x1a0] sm:$0xff] %vm288_vm0, %v854_v40  ;;  %v6049_v16 = vpop.f32.mrf.mxu0  ;;  %v1131_v17 = vmax.f32 %v1078_v2, %v1110_v5 }
 0x13b   :  { %v7268_v13 = vsel %vm1583_vm14, %v2129_v55, %v2131_v7  ;;  %v7270_v18 = vrot.slane %v1952_v10, 1  ;;  %v652_v23 = vadd.f32 %v7225_v37, %v6049_v16  ;;  %v1029_v24 = vld [vmem:[#allocation2 + $0x198] sm:$0xff]  ;;  %v1308_v56 = vor.u32 %v1306_v43, %v7235_v41 }
 0x13c   :  { %v857_v20 = vsel %vm729_vm8, %v639_v1, %v793_v30  ;;  %vm727_vm9 = vcmp.ge.f32.partialorder %v631_v14, 0.0  ;;  %v791_v21 = vmul.f32 0.01, %v631_v14  ;;  %1032 = vst.msk [vmem:[#allocation3 + $0xc0] sm:$0xff] %vm288_vm0, %v1030_v15  ;;  %v643_v25 = vpop.f32.mrf.mxu0  ;;  %v5762_v27 = vpack.c.bf16 %v1131_v17, %v1131_v17 }
 0x13d   :  { %921 = vst.msk [vmem:[#allocation2 + $0x1b8] sm:$0xff] %vm288_vm0, %v857_v20  ;;  %v7277_v45 = vsel %vm1277_vm10, %v1951_v8, %v7270_v18  ;;  %v1027_v55 = vld [vmem:[#allocation2 + $0x188] sm:$0xff]  ;;  %vm732_vm11 = vcmp.ge.f32.partialorder %v652_v23, 0.0  ;;  %v796_v29 = vmul.f32 0.01, %v652_v23  ;;  %v644_v31 = vadd.f32 %v7225_v37, %v643_v25 }
 0x13e   :  { %v855_v28 = vsel %vm727_vm9, %v631_v14, %v791_v21  ;;  %v1031_v32 = vmax.f32 %v1027_v55, %v1029_v24  ;;  %v6050_v33 = vpop.f32.mrf.mxu0  ;;  %v7281_v9 = vld [vmem:[#allocation4 + $0x20] sm:$0xff]   ;;  %1212 = vst.msk [vmem:[#allocation4 + $0x28] sm:$0xf] %vm1201_vm3, %v5762_v27  ;;  %v1956_v24 = vshrl.u32 %v7245_v59, 16 }
 0x13f   :  { %919 = vst.msk [vmem:[#allocation2 + $0x1a8] sm:$0xff] %vm288_vm0, %v855_v28  ;;  %v860_v34 = vsel %vm732_vm11, %v652_v23, %v796_v29  ;;  %vm730_vm12 = vcmp.ge.f32.partialorder %v644_v31, 0.0  ;;  %v794_v36 = vmul.f32 0.01, %v644_v31  ;;  %v655_v38 = vadd.f32 %v7225_v37, %v6050_v33  ;;  %v1080_v39 = vld [vmem:[#allocation3 + $0xb0] ss:$2 sm:$0xff] }
 0x140   :  { %1033 = vst.msk [vmem:[#allocation3 + $0xc8] sm:$0xff] %vm288_vm0, %v1031_v32  ;;  %924 = vst.msk [vmem:[#allocation2 + $0x1d0] sm:$0xff] %vm288_vm0, %v860_v34  ;;  %v646_v42 = vpop.f32.mrf.mxu0  ;;  %v1310_v44 = vshll.u32 %v7281_v9, 16  ;;  %v1112_v46 = vld [vmem:[#allocation3 + $0xb1] ss:$2 sm:$0xff]  ;;  %v1958_v33 = vor.u32 %v1956_v24, %v7270_v18  ;;  %v1314_v18 = vshrl.u32 %v7281_v9, 16 }
 0x141   :  { %v1036_v47 = vld [vmem:[#allocation2 + $0x1b0] sm:$0xff]  ;;  %v1034_v48 = vld [vmem:[#allocation2 + $0x1a0] sm:$0xff]  ;;  %v858_v49 = vsel %vm730_vm12, %v644_v31, %v794_v36  ;;  %vm733_vm13 = vcmp.ge.f32.partialorder %v655_v38, 0.0  ;;  %v797_v50 = vmul.f32 0.01, %v655_v38  ;;  %v647_v51 = vadd.f32 %v7225_v37, %v646_v42 }
 0x142   :  { %v1038_v26 = vmax.f32 %v1034_v48, %v1036_v47  ;;  %922 = vst.msk [vmem:[#allocation2 + $0x1c0] sm:$0xff] %vm288_vm0, %v858_v49  ;;  %v6053_v54 = vpop.f32.mrf.mxu0  ;;  %v7292_v57 = vrot.slane %v1310_v44, 1  ;;  %v1132_v58 = vmax.f32 %v1080_v39, %v1112_v46  ;;  %vm3083_vm12 = vcmask 523264  }
 0x143   :  { %v861_v60 = vsel %vm733_vm13, %v655_v38, %v797_v50  ;;  %vm731_vm15 = vcmp.ge.f32.partialorder %v647_v51, 0.0  ;;  %v795_v61 = vmul.f32 0.01, %v647_v51  ;;  %v668_v0 = vadd.f32 %v7225_v37, %v6053_v54 }
 0x144   :  { %1040 = vst.msk [vmem:[#allocation3 + $0xd0] sm:$0xff] %vm288_vm0, %v1038_v26  ;;  %v1037_v1 = vld [vmem:[#allocation2 + $0x1b8] sm:$0xff]  ;;  %925 = vst.msk [vmem:[#allocation2 + $0x1d8] sm:$0xff] %vm288_vm0, %v861_v60  ;;  %v1313_v2 = vsel %vm1277_vm10, %v1308_v56, %v7292_v57  ;;  %v659_v4 = vpop.f32.mrf.mxu0  ;;  %v5763_v5 = vpack.c.bf16 %v1132_v58, %v1132_v58  ;;  %v1316_v56 = vor.u32 %v1314_v18, %v7292_v57 }
 0x145   :  { %v859_v41 = vsel %vm731_vm15, %v647_v51, %v795_v61  ;;  %vm736_vm2 = vcmp.ge.f32.partialorder %v668_v0, 0.0  ;;  %v800_v10 = vmul.f32 0.01, %v668_v0  ;;  %6072 = vmatmul.mubr.msk.bf16.gmra.mxu1 %vm288_vm0, %v1313_v2  ;;  %v660_v11 = vadd.f32 %v7225_v37, %v659_v4  ;;  %v7302_v30 = vld [vmem:[#allocation4 + $0x24] sm:$0xff]  }
 0x146   :  { %v1035_v8 = vld [vmem:[#allocation2 + $0x1a8] sm:$0xff]  ;;  %923 = vst.msk [vmem:[#allocation2 + $0x1c8] sm:$0xff] %vm288_vm0, %v859_v41  ;;  %v6054_v40 = vpop.f32.mrf.mxu0  ;;  %6075 = vmatprep.mubr.msk.bf16.mxu1 %vm6770_vm1, %v8721_v35  ;;  %6172 = vmatmul.mubr.msk.bf16.gmra.mxu0 %vm288_vm0, %v7302_v30  ;;  %v1959_v25 = vshll.u32 %v7302_v30, 16  ;;  %v1963_v41 = vshrl.u32 %v7302_v30, 16 }
 0x147   :  { %v1039_v12 = vmax.f32 %v1035_v8, %v1037_v1  ;;  %1213 = vst.msk [vmem:[#allocation4 + $0x2c] sm:$0xf] %vm1201_vm3, %v5763_v5  ;;  %v1044_v14 = vld [vmem:[#allocation2 + $0x1d0] sm:$0xff]  ;;  %v864_v15 = vsel %vm736_vm2, %v668_v0, %v800_v10  ;;  %vm734_vm4 = vcmp.ge.f32.partialorder %v660_v11, 0.0  ;;  %v798_v16 = vmul.f32 0.01, %v660_v11  ;;  %6175 = vmatprep.mubr.msk.bf16.mxu0 %vm6770_vm1, %v8721_v35 }
 0x148   :  { %v671_v17 = vadd.f32 %v7225_v37, %v6054_v40  ;;  %v1082_v20 = vld [vmem:[#allocation3 + $0xc0] ss:$2 sm:$0xff]  ;;  %928 = vst.msk [vmem:[#allocation2 + $0x1f0] sm:$0xff] %vm288_vm0, %v864_v15  ;;  %v662_v21 = vpop.f32.mrf.mxu0  ;;  %v1114_v23 = vld [vmem:[#allocation3 + $0xc1] ss:$2 sm:$0xff]  ;;  %v1961_v34 = vrot.slane %v1959_v25, 1 }
 0x149   :  { %1041 = vst.msk [vmem:[#allocation3 + $0xd8] sm:$0xff] %vm288_vm0, %v1039_v12  ;;  %v1042_v27 = vld [vmem:[#allocation2 + $0x1c0] sm:$0xff]  ;;  %v862_v55 = vsel %vm734_vm4, %v660_v11, %v798_v16  ;;  %v663_v29 = vadd.f32 %v7225_v37, %v662_v21  ;;  %v1133_v32 = vmax.f32 %v1082_v20, %v1114_v23 }
 0x14a   :  { %vm737_vm5 = vcmp.ge.f32.partialorder %v671_v17, 0.0  ;;  %v801_v28 = vmul.f32 0.01, %v671_v17  ;;  %v1046_v31 = vmax.f32 %v1042_v27, %v1044_v14  ;;  %926 = vst.msk [vmem:[#allocation2 + $0x1e0] sm:$0xff] %vm288_vm0, %v862_v55  ;;  %v7322_v37 = vsel %vm1277_vm10, %v1958_v33, %v1961_v34 }
 0x14b   :  { %v1045_v36 = vld [vmem:[#allocation2 + $0x1d8] sm:$0xff]  ;;  %vm735_vm6 = vcmp.ge.f32.partialorder %v663_v29, 0.0  ;;  %v799_v39 = vmul.f32 0.01, %v663_v29  ;;  %v5764_v42 = vpack.c.bf16 %v1133_v32, %v1133_v32  ;;  %v1965_v12 = vor.u32 %v1963_v41, %v1961_v34  ;;  %v6767_v41 = vld [vmem:[#allocation4 + $0x4] sm:$0xf] }
 0x14c   :  { %v865_v38 = vsel %vm737_vm5, %v671_v17, %v801_v28  ;;  %1048 = vst.msk [vmem:[#allocation3 + $0xe0] sm:$0xff] %vm288_vm0, %v1046_v31 }
 0x14d   :  { %929 = vst.msk [vmem:[#allocation2 + $0x1f8] sm:$0xff] %vm288_vm0, %v865_v38  ;;  %v1043_v43 = vld [vmem:[#allocation2 + $0x1c8] sm:$0xff]  ;;  %v863_v44 = vsel %vm735_vm6, %v663_v29, %v799_v39 }
 0x14e   :  { %v7324_v46 = vld [vmem:[#allocation4 + $0x28] sm:$0xff]   ;;  %v1047_v47 = vmax.f32 %v1043_v43, %v1045_v36  ;;  %927 = vst.msk [vmem:[#allocation2 + $0x1e8] sm:$0xff] %vm288_vm0, %v863_v44 }
 0x14f   :  { %1214 = vst.msk [vmem:[#allocation4 + $0x30] sm:$0xf] %vm1201_vm3, %v5764_v42  ;;  %v1052_v48 = vld [vmem:[#allocation2 + $0x1f0] sm:$0xff]  ;;  %v1318_v49 = vshll.u32 %v7324_v46, 16  ;;  %v1322_v21 = vshrl.u32 %v7324_v46, 16 }
 0x150   :  { %v1084_v50 = vld [vmem:[#allocation3 + $0xd0] ss:$2 sm:$0xff]  ;;  %v1116_v51 = vld [vmem:[#allocation3 + $0xd1] ss:$2 sm:$0xff]  ;;  %1049 = vst.msk [vmem:[#allocation3 + $0xe8] sm:$0xff] %vm288_vm0, %v1047_v47 }
 0x151   :  { %v1134_v26 = vmax.f32 %v1084_v50, %v1116_v51  ;;  %v1050_v54 = vld [vmem:[#allocation2 + $0x1e0] sm:$0xff]  ;;  %v1320_v58 = vrot.slane %v1318_v49, 1  ;;  %v6590_v49 = vld [vmem:[%s8711_s3 + $0x78] sm:$0xff]   ;;  %v6591_v50 = vld [vmem:[%s8711_s3 + $0x70] sm:$0xff]  }
 0x152   :  { %v1054_v60 = vmax.f32 %v1050_v54, %v1052_v48  ;;  %v6588_v51 = vld [vmem:[%s8711_s3 + $0x28] sm:$0xff]  }
 0x153   :  { %v5765_v61 = vpack.c.bf16 %v1134_v26, %v1134_v26  ;;  %v1321_v1 = vsel %vm1277_vm10, %v1316_v56, %v1320_v58  ;;  %v1324_v27 = vor.u32 %v1322_v21, %v1320_v58  ;;  %v2275_v26 = vld [vmem:[#allocation4 + $0x8] sm:$0xf]  ;;  %v7449_v56 = vld [vmem:[#allocation4 + $0x10] sm:$0xff]  }
 0x154   :  { %v1053_v0 = vld [vmem:[#allocation2 + $0x1f8] sm:$0xff]  ;;  %1056 = vst.msk [vmem:[#allocation3 + $0xf0] sm:$0xff] %vm288_vm0, %v1054_v60  ;;  %6076 = vmatmul.mubr.msk.bf16.gmra.mxu1 %vm288_vm0, %v1321_v1  ;;  %v2480_v60 = vshll.u32 %v7449_v56, 16  ;;  %v2484_v21 = vshrl.u32 %v7449_v56, 16 }
 0x155   :  { %1215 = vst.msk [vmem:[#allocation4 + $0x34] sm:$0xf] %vm1201_vm3, %v5765_v61  ;;  %v1051_v2 = vld [vmem:[#allocation2 + $0x1e8] sm:$0xff]  ;;  %6079 = vmatprep.mubr.msk.bf16.mxu1 %vm6770_vm1, %v8721_v35 }
 0x156   :  { %v7336_v4 = vld [vmem:[#allocation4 + $0x2c] sm:$0xff]   ;;  %v1055_v5 = vmax.f32 %v1051_v2, %v1053_v0 }
 0x157   :  { %6176 = vmatmul.mubr.msk.bf16.gmra.mxu0 %vm288_vm0, %v7336_v4  ;;  %v1086_v57 = vld [vmem:[#allocation3 + $0xe0] ss:$2 sm:$0xff]  ;;  %v1118_v8 = vld [vmem:[#allocation3 + $0xe1] ss:$2 sm:$0xff]  ;;  %v1966_v10 = vshll.u32 %v7336_v4, 16  ;;  %v1970_v39 = vshrl.u32 %v7336_v4, 16 }
 0x158   :  { %1057 = vst.msk [vmem:[#allocation3 + $0xf8] sm:$0xff] %vm288_vm0, %v1055_v5  ;;  %6179 = vmatprep.mubr.msk.bf16.mxu0 %vm6770_vm1, %v8721_v35  ;;  %v1135_v11 = vmax.f32 %v1086_v57, %v1118_v8  ;;  %v7347_v15 = vld [vmem:[#allocation4 + $0x30] sm:$0xf]  ;;  %v7462_v5 = vld [vmem:[#allocation4 + $0x18] sm:$0xff]   ;;  %v1574_v8 = vld [vmem:[#allocation4] sm:$0xe] }
 0x159   :  { %v1968_v40 = vrot.slane %v1966_v10, 1  ;;  %v5386_v10 = vcombine.low %v1574_v8, %v6767_v41 }
 0x15a   :  { %v5766_v14 = vpack.c.bf16 %v1135_v11, %v1135_v11 }
 0x15b   :  { %v7350_v17 = vsel %vm1277_vm10, %v1965_v12, %v1968_v40  ;;  %v1972_v44 = vor.u32 %v1970_v39, %v1968_v40  ;;  %v2487_v12 = vshll.u32 %v7462_v5, 16  ;;  %v6768_v40 = vld [vmem:[#allocation4 + $0x8] sm:$0xff]  }
 0x15c   :  { %v1236_v16 = vld [vmem:[#allocation4 + $0x34] sm:$0xf]  ;;  %1216 = vst.msk [vmem:[#allocation4 + $0x38] sm:$0xf] %vm1201_vm3, %v5766_v14  ;;  %v1585_v14 = vrot.slane %v6768_v40, 1 }
 0x15d   :  { %v7353_v20 = vcombine.low %v7347_v15, %v1236_v16  ;;  %v1745_v32 = vld [vmem:[#allocation4 + $0x34] sm:$0xf]  ;;  %v6594_v16 = vld [vmem:[%s8711_s3 + $0x48] sm:$0xff]  }
 0x15e   :  { %v1231_v61 = vld [vmem:[#allocation4 + $0x34] sm:$0x7] }
 0x15f   :  { %v1326_v23 = vshll.u32 %v7353_v20, 16  ;;  %v1088_v24 = vld [vmem:[#allocation3 + $0xf0] ss:$2 sm:$0xff]  ;;  %v1120_v25 = vld [vmem:[#allocation3 + $0xf1] ss:$2 sm:$0xff]  ;;  %v1330_v43 = vshrl.u32 %v7353_v20, 16  ;;  %v5372_v1 = vcombine.low %v7347_v15, %v1231_v61 }
 0x160   :  { %v1136_v28 = vmax.f32 %v1088_v24, %v1120_v25  ;;  %v1584_v15 = vrot.slane %v5386_v10, 1  ;;  %v7476_v24 = vld [vmem:[#allocation4 + $0x20] sm:$0xff]   ;;  %v1593_v61 = vrot.slane %v7324_v46, 1 }
 0x161   :  { %v1328_v55 = vrot.slane %v1326_v23, 1  ;;  %v2489_v23 = vrot.slane %v2487_v12, 1 }
 0x162   :  { %v5767_v31 = vpack.c.bf16 %v1136_v28, %v1136_v28  ;;  %v1586_v25 = vsel %vm1583_vm14, %v1584_v15, %v1585_v14 }
 0x163   :  { %v1329_v29 = vsel %vm1277_vm10, %v1324_v27, %v1328_v55  ;;  %v1746_v33 = vld [vmem:[#allocation4 + $0x38] sm:$0x7]  ;;  %v1332_v18 = vor.u32 %v1330_v43, %v1328_v55  ;;  %v6599_v55 = vld [vmem:[%s8711_s3 + $0x40] sm:$0xff]   ;;  %v1589_v43 = vrot.slane %v7213_v19, 1 }
 0x164   :  { %6080 = vmatmul.mubr.msk.bf16.gmra.mxu1 %vm288_vm0, %v1329_v29  ;;  %v1923_v34 = vld [vmem:[#allocation4 + $0x38] sm:$0xf]  ;;  %v5406_v36 = vcombine.low %v1745_v32, %v1746_v33  ;;  %1217 = vst.msk [vmem:[#allocation4 + $0x3c] sm:$0xf] %vm1201_vm3, %v5767_v31  ;;  %v2494_v29 = vshll.u32 %v7476_v24, 16  ;;  %v1587_v31 = vrot.slane %v7141_v6, 1 }
 0x165   :  { %v7360_v38 = vcombine.low %v1745_v32, %v1923_v34  ;;  %6083 = vmatprep.mubr.msk.bf16.mxu1 %vm6770_vm1, %v8721_v35  ;;  %v2491_v32 = vshrl.u32 %v7462_v5, 16  ;;  %v7493_v34 = vld [vmem:[#allocation4 + $0x28] sm:$0xff]  }
 0x166   :  { %6180 = vmatmul.mubr.msk.bf16.gmra.mxu0 %vm288_vm0, %v5406_v36  ;;  %v2496_v33 = vrot.slane %v2494_v29, 1  ;;  %v1588_v36 = vsel %vm1583_vm14, %v1585_v14, %v1587_v31 }
 0x167   :  { %v1974_v42 = vshll.u32 %v7360_v38, 16  ;;  %6219 = vmatprep.mubr.msk.bf16.mxu0 %vm6770_vm1, %v8721_v35  ;;  %v2137_v59 = vrot.slane %v7360_v38, 1  ;;  %v2493_v39 = vor.u32 %v2491_v32, %v2489_v23 }
 0x169   :  { %v7371_v47 = vrot.slane %v1974_v42, 1  ;;  %v2501_v42 = vshll.u32 %v7493_v34, 16 }
 0x16b   :  { %v7375_v48 = vsel %vm1277_vm10, %v1972_v44, %v7371_v47  ;;  %v2498_v44 = vshrl.u32 %v7476_v24, 16 }
 0x16c   :  { %6084 = vmatmul.mubr.msk.bf16.gmra.mxu1 %vm288_vm0, %v1332_v18  ;;  %v2503_v18 = vrot.slane %v2501_v42, 1 }
 0x16d   :  { %6091 = vmatprep.mubr.msk.bf16.mxu1 %vm6770_vm1, %v8721_v35 }
 0x16e   :  { %6220 = vmatmul.mubr.msk.bf16.vlgmr.msra.gmra.mxu0 %vm288_vm0, %v7126_v52  ;;  %v6589_v52 = vld [vmem:[%s8711_s3 + $0x20] sm:$0xff]  }
 0x16f   :  { %6223 = vmatprep.mubr.msk.bf16.mxu0 %vm6770_vm1, %v8721_v35  ;;  %6280 = vmatpush3.bf16.msra.mxu0 %v6590_v49  ;;  %v7507_v49 = vld [vmem:[#allocation4 + $0x30] sm:$0xff]  }
 0x170   :  { %6281 = vmatprep.subr.bf16.mxu0 %v8721_v35 }
 0x173   :  { %6282 = vmatpush3.bf16.msra.mxu0 %v6591_v50  ;;  %v1590_v50 = vsel %vm1583_vm14, %v1587_v31, %v1589_v43 }
 0x174   :  { %6092 = vmatmul.mubr.msk.bf16.vlgmr.msra.gmra.mxu1 %vm288_vm0, %v7061_v22  ;;  %v2133_v22 = vrot.slane %v7302_v30, 1 }
 0x175   :  { %6120 = vmatpush3.bf16.msra.mxu1 %v6588_v51  ;;  %6095 = vmatprep.mubr.msk.bf16.mxu1 %vm6770_vm1, %v8721_v35  ;;  %v2500_v51 = vor.u32 %v2498_v44, %v2496_v33 }
 0x176   :  { %6121 = vmatprep.subr.bf16.mxu1 %v8721_v35  ;;  %6224 = vmatmul.mubr.msk.bf16.gmra.mxu0 %vm288_vm0, %v7199_v3  ;;  %v2135_v3 = vrot.slane %v7336_v4, 1  ;;  %v2482_v4 = vrot.slane %v2480_v60, 1 }
 0x177   :  { %6227 = vmatprep.mubr.msk.bf16.mxu0 %vm6770_vm1, %v8721_v35 }
 0x178   :  { %v2138_v30 = vsel %vm1583_vm14, %v2135_v3, %v2137_v59  ;;  %v2486_v27 = vor.u32 %v2484_v21, %v2482_v4 }
 0x179   :  { %6122 = vmatpush3.bf16.msra.mxu1 %v6589_v52  ;;  %v2504_v52 = vsel %vm1277_vm10, %v2500_v51, %v2503_v18 }
 0x17a   :  { %6183 = vmatprep.subr.bf16.mxu1 %v8721_v35  ;;  %v2490_v28 = vsel %vm1277_vm10, %v2486_v27, %v2489_v23 }
 0x17c   :  { %6096 = vmatmul.mubr.msk.bf16.gmra.mxu1 %vm288_vm0, %v7076_v53  ;;  %v2134_v53 = vsel %vm1583_vm14, %v2131_v7, %v2133_v22  ;;  %v7440_v7 = vld [vmem:[#allocation4 + $0xc] sm:$0xf] }
 0x17d   :  { %6099 = vmatprep.mubr.msk.bf16.mxu1 %vm6770_vm1, %v8721_v35  ;;  %v7447_v54 = vcombine.low %v2275_v26, %v7440_v7 }
 0x17e   :  { %6228 = vmatmul.mubr.msk.bf16.gmra.mxu0 %vm288_vm0, %v7268_v13  ;;  %v2136_v13 = vsel %vm1583_vm14, %v2133_v22, %v2135_v3  ;;  %v1591_v22 = vrot.slane %v7281_v9, 1  ;;  %v2465_v3 = vld [vmem:[#allocation4 + $0x3c] sm:$0xf] }
 0x17f   :  { %6231 = vmatprep.mubr.msk.bf16.mxu0 %vm6770_vm1, %v8721_v35  ;;  %v2476_v58 = vshll.u32 %v7447_v54, 16  ;;  %v2474_v2 = vshrl.u32 %v7447_v54, 16 }
 0x180   :  { %v1592_v26 = vsel %vm1583_vm14, %v1589_v43, %v1591_v22 }
 0x181   :  { %v2478_v0 = vrot.slane %v2476_v58, 1 }
 0x183   :  { %v2479_v57 = vor.u32 %v2478_v0, %v2474_v2  ;;  %v2512_v0 = vshrl.u32 %v7507_v49, 16  ;;  %v1594_v2 = vsel %vm1583_vm14, %v1591_v22, %v1593_v61 }
 0x184   :  { %6100 = vmatmul.mubr.msk.bf16.gmra.mxu1 %vm288_vm0, %v7141_v6  ;;  %v2497_v6 = vsel %vm1277_vm10, %v2493_v39, %v2496_v33 }
 0x185   :  { %6103 = vmatprep.mubr.msk.bf16.mxu1 %vm6770_vm1, %v8721_v35  ;;  %v2483_v11 = vsel %vm1277_vm10, %v2479_v57, %v2482_v4 }
 0x186   :  { %6232 = vmatmul.mubr.msk.bf16.gmra.mxu0 %vm288_vm0, %v2134_v53  ;;  %v7517_v53 = vld [vmem:[#allocation4 + $0x38] sm:$0xf] }
 0x187   :  { %6235 = vmatprep.mubr.msk.bf16.mxu0 %vm6770_vm1, %v8721_v35 }
 0x18c   :  { %6104 = vmatmul.mubr.msk.bf16.gmra.mxu1 %vm288_vm0, %v7213_v19  ;;  %v2508_v19 = vshll.u32 %v7507_v49, 16 }
 0x18d   :  { %6107 = vmatprep.mubr.msk.bf16.mxu1 %vm6770_vm1, %v8721_v35 }
 0x18e   :  { %6236 = vmatmul.mubr.msk.bf16.gmra.mxu0 %vm288_vm0, %v2136_v13  ;;  %v2505_v13 = vshrl.u32 %v7493_v34, 16 }
 0x18f   :  { %6239 = vmatprep.mubr.msk.bf16.mxu0 %vm6770_vm1, %v8721_v35 }
 0x190   :  { %v2507_v58 = vor.u32 %v2505_v13, %v2503_v18 }
 0x194   :  { %6108 = vmatmul.mubr.msk.bf16.gmra.mxu1 %vm288_vm0, %v7281_v9 }
 0x195   :  { %6111 = vmatprep.mubr.msk.bf16.mxu1 %vm6770_vm1, %v8721_v35 }
 0x196   :  { %6240 = vmatmul.mubr.msk.bf16.gmra.mxu0 %vm288_vm0, %v2138_v30  ;;  %v7523_v30 = vcombine.low %v7517_v53, %v2465_v3 }
 0x197   :  { %6243 = vmatprep.mubr.msk.bf16.mxu0 %vm6770_vm1, %v8721_v35 }
 0x198   :  { %v2516_v60 = vshll.u32 %v7523_v30, 16  ;;  %v2520_v8 = vshrl.u32 %v7523_v30, 16 }
 0x19c   :  { %6112 = vmatmul.mubr.msk.bf16.gmra.mxu1 %vm288_vm0, %v7324_v46  ;;  %v1595_v46 = vrot.slane %v7353_v20, 1 }
 0x19d   :  { %6115 = vmatprep.mubr.msk.bf16.mxu1 %vm6770_vm1, %v8721_v35 }
 0x19e   :  { %6244 = vmatmul.mubr.msk.bf16.gmra.mxu0 %vm288_vm0, %v2137_v59  ;;  %v2510_v59 = vrot.slane %v2508_v19, 1  ;;  %v1596_v41 = vsel %vm1583_vm14, %v1593_v61, %v1595_v46 }
 0x19f   :  { %6283 = vmatprep.mubr.msk.bf16.mxu0 %vm6770_vm1, %v8721_v35 }
 0x1a0   :  { %v2511_v9 = vsel %vm1277_vm10, %v2507_v58, %v2510_v59  ;;  %v2514_v4 = vor.u32 %v2512_v0, %v2510_v59  ;;  %v1978_v58 = vshrl.u32 %v7360_v38, 16 }
 0x1a4   :  { %6116 = vmatmul.mubr.msk.bf16.gmra.mxu1 %vm288_vm0, %v5372_v1  ;;  %v2518_v1 = vrot.slane %v2516_v60, 1 }
 0x1a5   :  { %6123 = vmatprep.mubr.msk.bf16.mxu1 %vm6770_vm1, %v8721_v35 }
 0x1a6   :  { %6284 = vmatmul.mubr.msk.bf16.vlgmr.msra.gmra.mxu0 %vm288_vm0, %v2483_v11  ;;  %v2519_v57 = vsel %vm1277_vm10, %v2514_v4, %v2518_v1  ;;  %v2522_v10 = vor.u32 %v2520_v8, %v2518_v1  ;;  %v6603_v1 = vld [vmem:[%s8711_s3 + $0x88] sm:$0xff]  }
 0x1a7   :  { %6287 = vmatprep.mubr.msk.bf16.mxu0 %vm6770_vm1, %v8721_v35 }
 0x1ac   :  { %6124 = vmatmul.mubr.msk.bf16.vlgmr.msra.gmra.mxu1 %vm288_vm0, %v1586_v25  ;;  %v6602_v25 = vld [vmem:[%s8711_s3 + $0x60] sm:$0xff]  }
 0x1ad   :  { %6184 = vmatpush3.bf16.msra.mxu1 %v6594_v16  ;;  %6127 = vmatprep.mubr.msk.bf16.mxu1 %vm6770_vm1, %v8721_v35  ;;  %v6601_v16 = vld [vmem:[%s8711_s3 + $0x68] sm:$0xff]  }
 0x1ae   :  { %6185 = vmatprep.subr.bf16.mxu1 %v8721_v35  ;;  %6288 = vmatmul.mubr.msk.bf16.gmra.mxu0 %vm288_vm0, %v2490_v28 }
 0x1af   :  { %6291 = vmatprep.mubr.msk.bf16.mxu0 %vm6770_vm1, %v8721_v35 }
 0x1b1   :  { %6186 = vmatpush3.bf16.msra.mxu1 %v6599_v55 }
 0x1b2   :  { %6247 = vmatprep.subr.bf16.mxu1 %v8721_v35 }
 0x1b4   :  { %6128 = vmatmul.mubr.msk.bf16.gmra.mxu1 %vm288_vm0, %v1588_v36 }
 0x1b5   :  { %6131 = vmatprep.mubr.msk.bf16.mxu1 %vm6770_vm1, %v8721_v35 }
 0x1b6   :  { %6292 = vmatmul.mubr.msk.bf16.gmra.mxu0 %vm288_vm0, %v2497_v6 }
 0x1b7   :  { %6295 = vmatprep.mubr.msk.bf16.mxu0 %vm6770_vm1, %v8721_v35 }
 0x1bc   :  { %6132 = vmatmul.mubr.msk.bf16.gmra.mxu1 %vm288_vm0, %v1590_v50 }
 0x1bd   :  { %6135 = vmatprep.mubr.msk.bf16.mxu1 %vm6770_vm1, %v8721_v35 }
 0x1be   :  { %6296 = vmatmul.mubr.msk.bf16.gmra.mxu0 %vm288_vm0, %v2504_v52 }
 0x1bf   :  { %6299 = vmatprep.mubr.msk.bf16.mxu0 %vm6770_vm1, %v8721_v35 }
 0x1c4   :  { %6136 = vmatmul.mubr.msk.bf16.gmra.mxu1 %vm288_vm0, %v1592_v26 }
 0x1c5   :  { %6139 = vmatprep.mubr.msk.bf16.mxu1 %vm6770_vm1, %v8721_v35 }
 0x1c6   :  { %6300 = vmatmul.mubr.msk.bf16.gmra.mxu0 %vm288_vm0, %v2511_v9  ;;  %v1980_v9 = vor.u32 %v1978_v58, %v7371_v47  ;;  %v6604_v47 = vld [vmem:[%s8711_s3 + $0x80] sm:$0xff]  }
 0x1c7   :  { %6303 = vmatprep.mubr.msk.bf16.mxu0 %vm6770_vm1, %v8721_v35 }
 0x1cc   :  { %6140 = vmatmul.mubr.msk.bf16.gmra.mxu1 %vm288_vm0, %v1594_v2 }
 0x1cd   :  { %6143 = vmatprep.mubr.msk.bf16.mxu1 %vm6770_vm1, %v8721_v35 }
 0x1ce   :  { %6304 = vmatmul.mubr.msk.bf16.gmra.mxu0 %vm288_vm0, %v2519_v57 }
 0x1cf   :  { %6307 = vmatprep.mubr.msk.bf16.mxu0 %vm6770_vm1, %v8721_v35 }
 0x1d4   :  { %6144 = vmatmul.mubr.msk.bf16.gmra.mxu1 %vm288_vm0, %v1596_v41 }
 0x1d5   :  { %6147 = vmatprep.mubr.msk.bf16.mxu1 %vm6770_vm1, %v8721_v35  ;;  %v7550_v11 = vpop.f32.mrf.mxu0 }
 0x1d6   :  { %6308 = vmatmul.mubr.msk.bf16.gmra.mxu0 %vm288_vm0, %v2522_v10 }
 0x1d7   :  { %v6061_v12 = vpop.f32.mrf.mxu0 }
 0x1d9   :  { %v7553_v40 = vpop.f32.mrf.mxu0 }
 0x1db   :  { %v6062_v20 = vpop.f32.mrf.mxu0 }
 0x1dc   :  { %6148 = vmatmul.mubr.msk.bf16.gmra.mxu1 %vm288_vm0, %v1595_v46 }
 0x1dd   :  { %6187 = vmatprep.mubr.msk.bf16.mxu1 %vm6770_vm1, %v8721_v35  ;;  %v7558_v14 = vpop.f32.mrf.mxu0 }
 0x1df   :  { %v6157_v15 = vpop.f32.mrf.mxu0 }
 0x1e1   :  { %v7563_v21 = vpop.f32.mrf.mxu0 }
 0x1e3   :  { %v6158_v23 = vpop.f32.mrf.mxu0 }
 0x1e4   :  { %6188 = vmatmul.mubr.msk.bf16.vlgmr.msra.gmra.mxu1 %vm288_vm0, %v7149_v63 }
 0x1e5   :  { %6248 = vmatpush3.bf16.msra.mxu1 %v6601_v16  ;;  %6191 = vmatprep.mubr.msk.bf16.mxu1 %vm6770_vm1, %v8721_v35  ;;  %v7572_v27 = vpop.f32.mrf.mxu1  ;;  %v7574_v55 = vpop.f32.mrf.mxu0 }
 0x1e6   :  { %6249 = vmatprep.subr.bf16.mxu1 %v8721_v35 }
 0x1e7   :  { %v6065_v28 = vpop.f32.mrf.mxu1  ;;  %v6161_v29 = vpop.f32.mrf.mxu0 }
 0x1e9   :  { %6250 = vmatpush3.bf16.msra.mxu1 %v6602_v25  ;;  %v7577_v31 = vpop.f32.mrf.mxu1  ;;  %v7579_v63 = vpop.f32.mrf.mxu0 }
 0x1ea   :  { %6311 = vmatprep.subr.bf16.mxu1 %v8721_v35 }
 0x1eb   :  { %v6066_v32 = vpop.f32.mrf.mxu1  ;;  %v6162_v33 = vpop.f32.mrf.mxu0 }
 0x1ec   :  { %6192 = vmatmul.mubr.msk.bf16.gmra.mxu1 %vm288_vm0, %v7220_v62 }
 0x1ed   :  { %6195 = vmatprep.mubr.msk.bf16.mxu1 %vm6770_vm1, %v8721_v35  ;;  %v7586_v36 = vpop.f32.mrf.mxu0 }
 0x1ef   :  { %v6165_v39 = vpop.f32.mrf.mxu0 }
 0x1f1   :  { %v7588_v6 = vpop.f32.mrf.mxu0 }
 0x1f3   :  { %v6166_v42 = vpop.f32.mrf.mxu0 }
 0x1f4   :  { %6196 = vmatmul.mubr.msk.bf16.gmra.mxu1 %vm288_vm0, %v7277_v45 }
 0x1f5   :  { %6199 = vmatprep.mubr.msk.bf16.mxu1 %vm6770_vm1, %v8721_v35  ;;  %v7594_v43 = vpop.f32.mrf.mxu1 }
 0x1f7   :  { %v6069_v44 = vpop.f32.mrf.mxu1  ;;  %v7596_v18 = vpop.f32.mrf.mxu0 }
 0x1f9   :  { %v7598_v62 = vpop.f32.mrf.mxu1  ;;  %v6169_v50 = vpop.f32.mrf.mxu0 }
 0x1fb   :  { %v6070_v51 = vpop.f32.mrf.mxu1  ;;  %v7602_v52 = vpop.f32.mrf.mxu0 }
 0x1fc   :  { %6200 = vmatmul.mubr.msk.bf16.gmra.mxu1 %vm288_vm0, %v7322_v37 }
 0x1fd   :  { %6203 = vmatprep.mubr.msk.bf16.mxu1 %vm6770_vm1, %v8721_v35  ;;  %v6170_v45 = vpop.f32.mrf.mxu0 }
 0x204   :  { %6204 = vmatmul.mubr.msk.bf16.gmra.mxu1 %vm288_vm0, %v7350_v17 }
 0x205   :  { %6207 = vmatprep.mubr.msk.bf16.mxu1 %vm6770_vm1, %v8721_v35  ;;  %v7610_v19 = vpop.f32.mrf.mxu1 }
 0x206   :  { %v7612_v3 = vpop.f32.mrf.mxu0 }
 0x207   :  { %v6073_v22 = vpop.f32.mrf.mxu1 }
 0x208   :  { %v6173_v37 = vpop.f32.mrf.mxu0 }
 0x209   :  { %v7614_v13 = vpop.f32.mrf.mxu1 }
 0x20a   :  { %v7618_v26 = vpop.f32.mrf.mxu0 }
 0x20b   :  { %v6074_v59 = vpop.f32.mrf.mxu1 }
 0x20c   :  { %6208 = vmatmul.mubr.msk.bf16.gmra.mxu1 %vm288_vm0, %v7375_v48  ;;  %v6174_v17 = vpop.f32.mrf.mxu0 }
 0x20d   :  { %6211 = vmatprep.mubr.msk.bf16.mxu1 %vm6770_vm1, %v8721_v35 }
 0x214   :  { %6212 = vmatmul.mubr.msk.bf16.gmra.mxu1 %vm288_vm0, %v1980_v9  ;;  %v7625_v60 = vpop.f32.mrf.mxu1 }
 0x215   :  { %6251 = vmatprep.mubr.msk.bf16.mxu1 %vm6770_vm1, %v8721_v35 }
 0x216   :  { %v6077_v61 = vpop.f32.mrf.mxu1 }
 0x217   :  { %v7629_v0 = vpop.f32.mrf.mxu0 }
 0x218   :  { %v7631_v48 = vpop.f32.mrf.mxu1 }
 0x219   :  { %v6177_v2 = vpop.f32.mrf.mxu0 }
 0x21a   :  { %v6078_v38 = vpop.f32.mrf.mxu1 }
 0x21b   :  { %v7636_v4 = vpop.f32.mrf.mxu0 }
 0x21c   :  { %6252 = vmatmul.mubr.msk.bf16.vlgmr.msra.gmra.mxu1 %vm288_vm0, %v7447_v54 }
 0x21d   :  { %6312 = vmatpush3.bf16.msra.mxu1 %v6603_v1  ;;  %6255 = vmatprep.mubr.msk.bf16.mxu1 %vm6770_vm1, %v8721_v35  ;;  %v6178_v57 = vpop.f32.mrf.mxu0 }
 0x21e   :  { %6313 = vmatprep.subr.bf16.mxu1 %v8721_v35 }
 0x221   :  { %6314 = vmatpush3.bf16.msra.mxu1 %v6604_v47 }
 0x224   :  { %v7646_v46 = vpop.f32.mrf.mxu1  ;;  %6256 = vmatmul.mubr.msk.bf16.gmra.mxu1 %vm288_vm0, %v7449_v56 }
 0x225   :  { %6259 = vmatprep.mubr.msk.bf16.mxu1 %vm6770_vm1, %v8721_v35 }
 0x226   :  { %v6081_v54 = vpop.f32.mrf.mxu1  ;;  %v7652_v8 = vpop.f32.mrf.mxu0 }
 0x228   :  { %v7654_v41 = vpop.f32.mrf.mxu1  ;;  %v6181_v10 = vpop.f32.mrf.mxu0 }
 0x22a   :  { %v6082_v12 = vpop.f32.mrf.mxu1  ;;  %v7656_v20 = vpop.f32.mrf.mxu0 }
 0x22b   :  { %v2288_v12 = vld [vmem:[#allocation4 + $0x3c] sm:$0x7] }
 0x22c   :  { %v7658_v15 = vpop.f32.mrf.mxu1  ;;  %6260 = vmatmul.mubr.msk.bf16.gmra.mxu1 %vm288_vm0, %v7462_v5  ;;  %v6182_v16 = vpop.f32.mrf.mxu0 }
 0x22d   :  { %6263 = vmatprep.mubr.msk.bf16.mxu1 %vm6770_vm1, %v8721_v35 }
 0x22e   :  { %v6085_v23 = vpop.f32.mrf.mxu1  ;;  %v7664_v25 = vpop.f32.mrf.mxu0 }
 0x230   :  { %v7666_v28 = vpop.f32.mrf.mxu1  ;;  %v6221_v29 = vpop.f32.mrf.mxu0 }
 0x232   :  { %v6086_v32 = vpop.f32.mrf.mxu1  ;;  %v7668_v33 = vpop.f32.mrf.mxu0 }
 0x233   :  { %v5454_v32 = vcombine.low %v7517_v53, %v2288_v12 }
 0x234   :  { %v7670_v39 = vpop.f32.mrf.mxu1  ;;  %6264 = vmatmul.mubr.msk.bf16.gmra.mxu1 %vm288_vm0, %v7476_v24  ;;  %v6222_v42 = vpop.f32.mrf.mxu0 }
 0x235   :  { %6267 = vmatprep.mubr.msk.bf16.mxu1 %vm6770_vm1, %v8721_v35 }
 0x236   :  { %v6093_v44 = vpop.f32.mrf.mxu1  ;;  %v7676_v50 = vpop.f32.mrf.mxu0 }
 0x238   :  { %v7678_v51 = vpop.f32.mrf.mxu1  ;;  %v6225_v45 = vpop.f32.mrf.mxu0 }
 0x239   :  { %v2659_v45 = vld [vmem:[#allocation4 + $0x8] sm:$0xe] }
 0x23a   :  { %v6094_v22 = vpop.f32.mrf.mxu1  ;;  %v7680_v37 = vpop.f32.mrf.mxu0 }
 0x23c   :  { %v7682_v59 = vpop.f32.mrf.mxu1  ;;  %6268 = vmatmul.mubr.msk.bf16.gmra.mxu1 %vm288_vm0, %v7493_v34  ;;  %v6226_v17 = vpop.f32.mrf.mxu0 }
 0x23d   :  { %6271 = vmatprep.mubr.msk.bf16.mxu1 %vm6770_vm1, %v8721_v35  ;;  %v5482_v17 = vcombine.low %v2659_v45, %v7440_v7 }
 0x23e   :  { %v6097_v58 = vpop.f32.mrf.mxu1  ;;  %v7688_v9 = vpop.f32.mrf.mxu0 }
 0x240   :  { %v7690_v61 = vpop.f32.mrf.mxu1  ;;  %v6229_v1 = vpop.f32.mrf.mxu0 }
 0x242   :  { %v6098_v2 = vpop.f32.mrf.mxu1  ;;  %v7692_v38 = vpop.f32.mrf.mxu0 }
 0x243   :  { %v2669_v2 = vrot.slane %v7449_v56, 1 }
 0x244   :  { %v7694_v47 = vpop.f32.mrf.mxu1  ;;  %6272 = vmatmul.mubr.msk.bf16.gmra.mxu1 %vm288_vm0, %v7507_v49  ;;  %v6230_v57 = vpop.f32.mrf.mxu0 }
 0x245   :  { %6275 = vmatprep.mubr.msk.bf16.mxu1 %vm6770_vm1, %v8721_v35 }
 0x246   :  { %v6101_v54 = vpop.f32.mrf.mxu1  ;;  %v7700_v10 = vpop.f32.mrf.mxu0 }
 0x247   :  { %v2668_v54 = vrot.slane %v5482_v17, 1  ;;  %v2671_v17 = vrot.slane %v7462_v5, 1 }
 0x248   :  { %v7702_v16 = vpop.f32.mrf.mxu1  ;;  %v6233_v23 = vpop.f32.mrf.mxu0 }
 0x24a   :  { %v6102_v29 = vpop.f32.mrf.mxu1  ;;  %v7705_v42 = vpop.f32.mrf.mxu0 }
 0x24b   :  { %v2670_v29 = vsel %vm1583_vm14, %v2668_v54, %v2669_v2 }
 0x24c   :  { %v7707_v44 = vpop.f32.mrf.mxu1  ;;  %6276 = vmatmul.mubr.msk.bf16.gmra.mxu1 %vm288_vm0, %v5454_v32  ;;  %v6234_v22 = vpop.f32.mrf.mxu0 }
 0x24d   :  { %6315 = vmatprep.mubr.msk.bf16.mxu1 %vm6770_vm1, %v8721_v35 }
 0x24e   :  { %v6105_v58 = vpop.f32.mrf.mxu1  ;;  %v7713_v1 = vpop.f32.mrf.mxu0 }
 0x250   :  { %v7716_v57 = vpop.f32.mrf.mxu1  ;;  %v6237_v53 = vpop.f32.mrf.mxu0 }
 0x252   :  { %v6106_v12 = vpop.f32.mrf.mxu1  ;;  %v7718_v23 = vpop.f32.mrf.mxu0 }
 0x253   :  { %8723 = vst [vmem:[#allocation9_spill] sm:$0xff] %v7718_v23 }
 0x254   :  { %v1551_v32 = vpop.f32.mrf.mxu1  ;;  %6316 = vmatmul.mubr.msk.bf16.vlgmr.msra.gmra.mxu1 %vm288_vm0, %v2670_v29  ;;  %v6238_v7 = vpop.f32.mrf.mxu0 }
 0x255   :  { %v7723_v22 = vadd.f32 %v1551_v32, %v7625_v60  ;;  %6319 = vmatprep.mubr.msk.bf16.mxu1 %vm6770_vm1, %v8721_v35  ;;  %v2672_v60 = vsel %vm1583_vm14, %v2669_v2, %v2671_v17 }
 0x256   :  { %v6109_v56 = vpop.f32.mrf.mxu1  ;;  %v7727_v45 = vpop.f32.mrf.mxu0 }
 0x258   :  { %v1554_v58 = vpop.f32.mrf.mxu1  ;;  %v6241_v54 = vpop.f32.mrf.mxu0 }
 0x259   :  { %v7731_v53 = vadd.f32 %v1554_v58, %v7631_v48  ;;  %v2673_v48 = vrot.slane %v7476_v24, 1 }
 0x25a   :  { %v6110_v12 = vpop.f32.mrf.mxu1  ;;  %v7733_v23 = vpop.f32.mrf.mxu0 }
 0x25b   :  { %8724 = vst [vmem:[#allocation10_spill] sm:$0xff] %v7733_v23 }
 0x25c   :  { %v1559_v29 = vpop.f32.mrf.mxu1  ;;  %6320 = vmatmul.mubr.msk.bf16.gmra.mxu1 %vm288_vm0, %v2672_v60  ;;  %v6242_v7 = vpop.f32.mrf.mxu0 }
 0x25d   :  { %v7738_v32 = vadd.f32 %v1559_v29, %v7646_v46  ;;  %6323 = vmatprep.mubr.msk.bf16.mxu1 %vm6770_vm1, %v8721_v35  ;;  %v2674_v46 = vsel %vm1583_vm14, %v2671_v17, %v2673_v48 }
 0x25e   :  { %v6113_v5 = vpop.f32.mrf.mxu1  ;;  %v7742_v56 = vpop.f32.mrf.mxu0 }
 0x260   :  { %v1562_v58 = vpop.f32.mrf.mxu1  ;;  %v6245_v2 = vpop.f32.mrf.mxu0 }
 0x261   :  { %v7746_v54 = vadd.f32 %v1562_v58, %v7654_v41  ;;  %v2675_v41 = vrot.slane %v7493_v34, 1  ;;  %v8726_v34 = vmov 0.0  }
 0x262   :  { %v6114_v12 = vpop.f32.mrf.mxu1  ;;  %v7748_v23 = vpop.f32.mrf.mxu0 }
 0x263   :  { %8725 = vst [vmem:[#allocation11_spill] sm:$0xff] %v7748_v23 }
 0x264   :  { %v1567_v60 = vpop.f32.mrf.mxu1  ;;  %6324 = vmatmul.mubr.msk.bf16.gmra.mxu1 %vm288_vm0, %v2674_v46  ;;  %v6246_v7 = vpop.f32.mrf.mxu0  ;;  %v1520_v46 = vadd.f32 %v7670_v39, %v7550_v11  ;;  %v2677_v11 = vrot.slane %v7507_v49, 1 }
 0x265   :  { %v7753_v29 = vadd.f32 %v1567_v60, %v7658_v15  ;;  %6327 = vmatprep.mubr.msk.bf16.mxu1 %vm6770_vm1, %v8721_v35  ;;  %v2676_v60 = vsel %vm1583_vm14, %v2673_v48, %v2675_v41 }
 0x266   :  { %v6117_v24 = vpop.f32.mrf.mxu1  ;;  %v7757_v5 = vpop.f32.mrf.mxu0 }
 0x268   :  { %v1570_v58 = vpop.f32.mrf.mxu1  ;;  %v6285_v17 = vpop.f32.mrf.mxu0 }
 0x269   :  { %v7761_v2 = vadd.f32 %v1570_v58, %v7666_v28  ;;  %v1523_v58 = vadd.f32 %v7678_v51, %v7553_v40 }
 0x26a   :  { %v6118_v12 = vpop.f32.mrf.mxu1  ;;  %v7765_v15 = vpop.f32.mrf.mxu0 }
 0x26c   :  { %v1664_v7 = vpop.f32.mrf.mxu1  ;;  %6328 = vmatmul.mubr.msk.bf16.gmra.mxu1 %vm288_vm0, %v2676_v60  ;;  %v6286_v35 = vpop.f32.mrf.mxu0  ;;  %v2678_v60 = vsel %vm1583_vm14, %v2675_v41, %v2677_v11 }
 0x26d   :  { %v7769_v24 = vadd.f32 %v1664_v7, %v1520_v46  ;;  %6331 = vmatprep.mubr.msk.bf16.mxu1 %vm6770_vm1, %v8726_v34  ;;  %v1528_v46 = vadd.f32 %v7682_v59, %v7572_v27  ;;  %v2679_v27 = vrot.slane %v7523_v30, 1 }
 0x26e   :  { %v6125_v28 = vpop.f32.mrf.mxu1  ;;  %v7775_v17 = vpop.f32.mrf.mxu0 }
 0x270   :  { %v1667_v39 = vpop.f32.mrf.mxu1  ;;  %v6289_v48 = vpop.f32.mrf.mxu0 }
 0x271   :  { %v7778_v12 = vadd.f32 %v1667_v39, %v1523_v58  ;;  %v1536_v48 = vadd.f32 %v7694_v47, %v7594_v43 }
 0x272   :  { %v6126_v23 = vpop.f32.mrf.mxu1  ;;  %v7782_v35 = vpop.f32.mrf.mxu0 }
 0x273   :  { %v1531_v23 = vadd.f32 %v7690_v61, %v7577_v31 }
 0x274   :  { %v1672_v7 = vpop.f32.mrf.mxu1  ;;  %6332 = vmatmul.mubr.msk.bf16.gmra.mxu1 %vm288_vm0, %v2678_v60  ;;  %v6290_v51 = vpop.f32.mrf.mxu0  ;;  %v2680_v60 = vsel %vm1583_vm14, %v2677_v11, %v2679_v27 }
 0x275   :  { %v7786_v40 = vadd.f32 %v1672_v7, %v1528_v46  ;;  %6335 = vmatprep.mubr.msk.bf16.mxu1 %vm6770_vm1, %v8726_v34  ;;  %v1539_v51 = vadd.f32 %v7702_v16, %v7598_v62  ;;  %v1547_v62 = vadd.f32 %v7716_v57, %v7614_v13 }
 0x276   :  { %v6129_v49 = vpop.f32.mrf.mxu1  ;;  %v7792_v28 = vpop.f32.mrf.mxu0 }
 0x278   :  { %v1675_v59 = vpop.f32.mrf.mxu1  ;;  %v6293_v41 = vpop.f32.mrf.mxu0 }
 0x279   :  { %v7795_v58 = vadd.f32 %v1675_v59, %v1531_v23  ;;  %v1544_v59 = vadd.f32 %v7707_v44, %v7610_v19 }
 0x27a   :  { %v6130_v39 = vpop.f32.mrf.mxu1  ;;  %v7799_v46 = vpop.f32.mrf.mxu0 }
 0x27c   :  { %v1680_v7 = vpop.f32.mrf.mxu1  ;;  %6336 = vmatmul.mubr.msk.bf16.gmra.mxu1 %vm288_vm0, %v2680_v60  ;;  %v6294_v61 = vpop.f32.mrf.mxu0 }
 0x27d   :  { %v7803_v31 = vadd.f32 %v1680_v7, %v1536_v48  ;;  %6339 = vmatprep.mubr.msk.bf16.mxu1 %vm6770_vm1, %v8726_v34  ;;  %vm2936_vm1 = vcmask 519168  }
 0x27e   :  { %v6133_v30 = vpop.f32.mrf.mxu1  ;;  %v7809_v49 = vpop.f32.mrf.mxu0 }
 0x280   :  { %v1683_v43 = vpop.f32.mrf.mxu1  ;;  %v6297_v23 = vpop.f32.mrf.mxu0 }
 0x281   :  { %v7811_v47 = vadd.f32 %v1683_v43, %v1539_v51 }
 0x282   :  { %v6134_v11 = vpop.f32.mrf.mxu1  ;;  %v7815_v41 = vpop.f32.mrf.mxu0 }
 0x284   :  { %v1688_v39 = vpop.f32.mrf.mxu1  ;;  %6340 = vmatmul.mubr.msk.bf16.gmra.mxu1 %vm288_vm0, %v2679_v27  ;;  %v6298_v48 = vpop.f32.mrf.mxu0 }
 0x285   :  { %v7818_v34 = vadd.f32 %v1688_v39, %v1544_v59  ;;  %v6606_v48 = vld [vmem:[%s8713_s5 + $0x38] sm:$0xff]  }
 0x286   :  { %v6137_v60 = vpop.f32.mrf.mxu1  ;;  %v7822_v16 = vpop.f32.mrf.mxu0  ;;  %6343 = vmatprep.subr.bf16.mxu0 %v6606_v48 }
 0x287   :  { %6344 = vmatpush3.bf16.msra.mxu0 %v6606_v48 }
 0x288   :  { %v1691_v7 = vpop.f32.mrf.mxu1  ;;  %v6301_v30 = vpop.f32.mrf.mxu0 }
 0x289   :  { %v7824_v61 = vadd.f32 %v1691_v7, %v1547_v62 }
 0x28a   :  { %v6138_v51 = vpop.f32.mrf.mxu1  ;;  %v7826_v19 = vpop.f32.mrf.mxu0 }
 0x28c   :  { %v1696_v44 = vpop.f32.mrf.mxu1  ;;  %v6302_v27 = vpop.f32.mrf.mxu0 }
 0x28d   :  { %v7829_v43 = vadd.f32 %v1696_v44, %v7723_v22 }
 0x28e   :  { %v6141_v23 = vpop.f32.mrf.mxu1  ;;  %v7831_v11 = vpop.f32.mrf.mxu0 }
 0x290   :  { %v1699_v59 = vpop.f32.mrf.mxu1  ;;  %v6305_v57 = vpop.f32.mrf.mxu0 }
 0x291   :  { %v7834_v13 = vadd.f32 %v1699_v59, %v7731_v53 }
 0x292   :  { %v6142_v39 = vpop.f32.mrf.mxu1  ;;  %v7839_v60 = vpop.f32.mrf.mxu0 }
 0x293   :  { %8727 = vst [vmem:[#allocation12_spill] sm:$0xff] %v7839_v60 }
 0x294   :  { %v1704_v62 = vpop.f32.mrf.mxu1  ;;  %v6306_v7 = vpop.f32.mrf.mxu0 }
 0x295   :  { %v7842_v22 = vadd.f32 %v1704_v62, %v7738_v32 }
 0x296   :  { %v6145_v30 = vpop.f32.mrf.mxu1  ;;  %v7844_v51 = vpop.f32.mrf.mxu0 }
 0x297   :  { %v1909_v30 = vadd.f32 %v7558_v14, %v7769_v24  ;;  %v1911_v14 = vadd.f32 %v7574_v55, %v7786_v40 }
 0x298   :  { %v1707_v53 = vpop.f32.mrf.mxu1  ;;  %v6309_v27 = vpop.f32.mrf.mxu0 }
 0x299   :  { %v7847_v44 = vadd.f32 %v1707_v53, %v7746_v54 }
 0x29a   :  { %v6146_v23 = vpop.f32.mrf.mxu1  ;;  %v7849_v59 = vpop.f32.mrf.mxu0 }
 0x29b   :  { %v6607_v23 = vld [vmem:[%s8713_s5 + $0x30] sm:$0xff]  }
 0x29c   :  { %v1712_v57 = vpop.f32.mrf.mxu1  ;;  %v6310_v60 = vpop.f32.mrf.mxu0  ;;  %6345 = vmatprep.subr.bf16.mxu0 %v6607_v23 }
 0x29d   :  { %v7852_v39 = vadd.f32 %v1712_v57, %v7753_v29  ;;  %v1910_v29 = vadd.f32 %v7563_v21, %v7778_v12  ;;  %6346 = vmatpush3.bf16.msra.mxu0 %v6607_v23  ;;  %v6608_v12 = vld [vmem:[%s8713_s5 + $0x58] sm:$0xff]  }
 0x29e   :  { %v6149_v32 = vpop.f32.mrf.mxu1  ;;  %6383 = vmatprep.subr.bf16.mxu1 %v6608_v12 }
 0x29f   :  { %6384 = vmatpush3.bf16.msra.mxu1 %v6608_v12  ;;  %v1917_v12 = vadd.f32 %v7612_v3, %v7829_v43 }
 0x2a0   :  { %v1715_v62 = vpop.f32.mrf.mxu1 }
 0x2a1   :  { %v7855_v48 = vadd.f32 %v1715_v62, %v7761_v2 }
 0x2a2   :  { %v6150_v7 = vpop.f32.mrf.mxu1 }
 0x2a3   :  { %v1912_v7 = vadd.f32 %v7579_v63, %v7795_v58  ;;  %v6609_v63 = vld [vmem:[%s8713_s5 + $0x28] sm:$0xff]   ;;  %v1914_v58 = vadd.f32 %v7588_v6, %v7811_v47  ;;  %v1916_v47 = vadd.f32 %v7602_v52, %v7824_v61 }
 0x2a4   :  { %v2048_v54 = vpop.f32.mrf.mxu1  ;;  %6347 = vmatprep.subr.bf16.mxu0 %v6609_v63  ;;  %v6611_v6 = vld [vmem:[%s8713_s5 + $0x48] sm:$0xff]  }
 0x2a5   :  { %v7859_v53 = vadd.f32 %v2048_v54, %v1909_v30  ;;  %6348 = vmatpush3.bf16.msra.mxu0 %v6609_v63 }
 0x2a6   :  { %v6189_v27 = vpop.f32.mrf.mxu1 }
 0x2a7   :  { %v1913_v27 = vadd.f32 %v7586_v36, %v7803_v31  ;;  %v6610_v36 = vld [vmem:[%s8713_s5 + $0x50] sm:$0xff]   ;;  %v1915_v31 = vadd.f32 %v7596_v18, %v7818_v34  ;;  %v6615_v18 = vld [vmem:[%s8713_s5 + $0x20] sm:$0xff]  }
 0x2a8   :  { %v2051_v60 = vpop.f32.mrf.mxu1  ;;  %6385 = vmatprep.subr.bf16.mxu1 %v6610_v36  ;;  %v6616_v34 = vld [vmem:[%s8713_s5 + $0x40] sm:$0xff]   ;;  %6349 = vmatprep.subr.bf16.mxu0 %v6615_v18 }
 0x2a9   :  { %v7866_v57 = vadd.f32 %v2051_v60, %v1910_v29  ;;  %6386 = vmatpush3.bf16.msra.mxu1 %v6610_v36  ;;  %6350 = vmatpush3.bf16.msra.mxu0 %v6615_v18  ;;  %v1920_v36 = vadd.f32 %v7636_v4, %v7847_v44 }
 0x2aa   :  { %v6190_v2 = vpop.f32.mrf.mxu1  ;;  %6387 = vmatprep.subr.bf16.mxu1 %v6611_v6 }
 0x2ac   :  { %v2056_v24 = vpop.f32.mrf.mxu1 }
 0x2ad   :  { %v7870_v32 = vadd.f32 %v2056_v24, %v1911_v14  ;;  %6388 = vmatpush3.bf16.msra.mxu1 %v6611_v6  ;;  %v1922_v6 = vadd.f32 %v7656_v20, %v7855_v48 }
 0x2ae   :  { %v6193_v62 = vpop.f32.mrf.mxu1  ;;  %6389 = vmatprep.subr.bf16.mxu1 %v6616_v34 }
 0x2b0   :  { %v2059_v30 = vpop.f32.mrf.mxu1 }
 0x2b1   :  { %v7874_v54 = vadd.f32 %v2059_v30, %v1912_v7  ;;  %6390 = vmatpush3.bf16.msra.mxu1 %v6616_v34 }
 0x2b2   :  { %v6194_v21 = vpop.f32.mrf.mxu1 }
 0x2b4   :  { %v2064_v23 = vpop.f32.mrf.mxu1 }
 0x2b5   :  { %v7881_v55 = vadd.f32 %v2064_v23, %v1913_v27  ;;  %v1918_v23 = vadd.f32 %v7618_v26, %v7834_v13  ;;  %v7929_v26 = vld [vmem:[%s8713_s5 + $0x18] sm:$0xff]   ;;  %v1921_v13 = vadd.f32 %v7652_v8, %v7852_v39 }
 0x2b6   :  { %v6197_v40 = vpop.f32.mrf.mxu1  ;;  %6363 = vmatprep.subr.bf16.mxu0 %v7929_v26 }
 0x2b8   :  { %v2067_v29 = vpop.f32.mrf.mxu1 }
 0x2b9   :  { %v7888_v60 = vadd.f32 %v2067_v29, %v1914_v58  ;;  %v1919_v29 = vadd.f32 %v7629_v0, %v7842_v22  ;;  %v7934_v0 = vld [vmem:[%s8713_s5 + $0x98] sm:$0xff]  }
 0x2ba   :  { %v6198_v2 = vpop.f32.mrf.mxu1  ;;  %6423 = vmatprep.subr.bf16.mxu1 %v7934_v0 }
 0x2bc   :  { %v2072_v14 = vpop.f32.mrf.mxu1 }
 0x2bd   :  { %v7895_v24 = vadd.f32 %v2072_v14, %v1915_v31 }
 0x2be   :  { %v6201_v62 = vpop.f32.mrf.mxu1 }
 0x2c0   :  { %v2075_v7 = vpop.f32.mrf.mxu1 }
 0x2c1   :  { %v7902_v30 = vadd.f32 %v2075_v7, %v1916_v47 }
 0x2c2   :  { %v6202_v21 = vpop.f32.mrf.mxu1 }
 0x2c4   :  { %v2080_v27 = vpop.f32.mrf.mxu1 }
 0x2c5   :  { %v7912_v52 = vadd.f32 %v2080_v27, %v1917_v12 }
 0x2c6   :  { %v6205_v61 = vpop.f32.mrf.mxu1 }
 0x2c8   :  { %v2083_v40 = vpop.f32.mrf.mxu1 }
 0x2c9   :  { %v7916_v63 = vadd.f32 %v2083_v40, %v1918_v23 }
 0x2ca   :  { %v6206_v58 = vpop.f32.mrf.mxu1 }
 0x2cc   :  { %v2088_v2 = vpop.f32.mrf.mxu1 }
 0x2cd   :  { %v7920_v3 = vadd.f32 %v2088_v2, %v1919_v29 }
 0x2ce   :  { %v6209_v43 = vpop.f32.mrf.mxu1 }
 0x2d0   :  { %v2091_v31 = vpop.f32.mrf.mxu1 }
 0x2d1   :  { %v7924_v14 = vadd.f32 %v2091_v31, %v1920_v36 }
 0x2d2   :  { %v6210_v62 = vpop.f32.mrf.mxu1 }
 0x2d4   :  { %v2096_v22 = vpop.f32.mrf.mxu1 }
 0x2d5   :  { %v7940_v4 = vadd.f32 %v2096_v22, %v1921_v13 }
 0x2d6   :  { %v6213_v44 = vpop.f32.mrf.mxu1 }
 0x2d8   :  { %v2099_v47 = vpop.f32.mrf.mxu1 }
 0x2d9   :  { %v7944_v7 = vadd.f32 %v2099_v47, %v1922_v6 }
 0x2da   :  { %v6214_v21 = vpop.f32.mrf.mxu1 }
 0x2dc   :  { %v2396_v18 = vpop.f32.mrf.mxu1 }
 0x2de   :  { %v6253_v34 = vpop.f32.mrf.mxu1 }
 0x2e0   :  { %v2399_v12 = vpop.f32.mrf.mxu1 }
 0x2e2   :  { %v6254_v27 = vpop.f32.mrf.mxu1 }
 0x2e3   :  { %v2261_v27 = vadd.f32 %v7664_v25, %v7859_v53  ;;  %v2263_v25 = vadd.f32 %v7676_v50, %v7870_v32 }
 0x2e4   :  { %v2404_v8 = vpop.f32.mrf.mxu1 }
 0x2e6   :  { %v6257_v39 = vpop.f32.mrf.mxu1 }
 0x2e8   :  { %v2407_v61 = vpop.f32.mrf.mxu1 }
 0x2ea   :  { %v6258_v23 = vpop.f32.mrf.mxu1 }
 0x2eb   :  { %v2451_v23 = vadd.f32 %v2396_v18, %v2261_v27 }
 0x2ec   :  { %v2412_v40 = vpop.f32.mrf.mxu1 }
 0x2ee   :  { %v6261_v58 = vpop.f32.mrf.mxu1 }
 0x2f0   :  { %v7946_v29 = vpop.f32.mrf.mxu1 }
 0x2f2   :  { %v6262_v2 = vpop.f32.mrf.mxu1 }
 0x2f3   :  { %v2262_v2 = vadd.f32 %v7668_v33, %v7866_v57 }
 0x2f4   :  { %v7948_v43 = vpop.f32.mrf.mxu1 }
 0x2f6   :  { %v6265_v20 = vpop.f32.mrf.mxu1 }
 0x2f8   :  { %v7950_v48 = vpop.f32.mrf.mxu1 }
 0x2fa   :  { %v6266_v36 = vpop.f32.mrf.mxu1 }
 0x2fb   :  { %v2452_v36 = vadd.f32 %v2399_v12, %v2262_v2 }
 0x2fc   :  { %v7952_v31 = vpop.f32.mrf.mxu1 }
 0x2fd   :  { %v2646_v33 = vadd.f32 %v7765_v15, %v2452_v36  ;;  %v2265_v15 = vadd.f32 %v7688_v9, %v7881_v55 }
 0x2fe   :  { %v6269_v62 = vpop.f32.mrf.mxu1 }
 0x2ff   :  { %v2645_v62 = vadd.f32 %v7757_v5, %v2451_v23  ;;  %v2264_v5 = vadd.f32 %v7680_v37, %v7874_v54  ;;  %v2455_v54 = vadd.f32 %v2412_v40, %v2265_v15 }
 0x300   :  { %v7954_v13 = vpop.f32.mrf.mxu1 }
 0x301   :  { %v2454_v2 = vadd.f32 %v2407_v61, %v2264_v5  ;;  %v2649_v5 = vadd.f32 %v7792_v28, %v2455_v54 }
 0x302   :  { %v6270_v22 = vpop.f32.mrf.mxu1 }
 0x304   :  { %v7956_v44 = vpop.f32.mrf.mxu1 }
 0x306   :  { %v6273_v6 = vpop.f32.mrf.mxu1 }
 0x307   :  { %v7972_v6 = vld [vmem:[%s8714_s4] ss:$0 sm:$0xff] }
 0x308   :  { %v7958_v47 = vpop.f32.mrf.mxu1 }
 0x30a   :  { %v6274_v21 = vpop.f32.mrf.mxu1 }
 0x30b   :  { %v2453_v21 = vadd.f32 %v2404_v8, %v2263_v25 }
 0x30c   :  { %v7960_v34 = vpop.f32.mrf.mxu1 }
 0x30d   :  { %v2647_v32 = vadd.f32 %v7775_v17, %v2453_v21  ;;  %v2266_v17 = vadd.f32 %v7692_v38, %v7888_v60 }
 0x30e   :  { %v6277_v39 = vpop.f32.mrf.mxu1 }
 0x310   :  { %v7964_v58 = vpop.f32.mrf.mxu1 }
 0x312   :  { %v6278_v20 = vpop.f32.mrf.mxu1 }
 0x314   :  { %v2748_v22 = vpop.f32.mrf.mxu1 }
 0x315   :  { %v2803_v53 = vadd.f32 %v2748_v22, %v2645_v62 }
 0x316   :  { %v6317_v18 = vpop.f32.mrf.mxu1 }
 0x317   :  { %v2824_v27 = vadd.f32 %v7972_v6, %v2803_v53  ;;  %v2648_v53 = vadd.f32 %v7782_v35, %v2454_v2 }
 0x318   :  { %v2751_v57 = vpop.f32.mrf.mxu1 }
 0x319   :  { %vm2838_vm0 = vcmp.ge.f32.partialorder %v2824_v27, 0.0  ;;  %v2852_v12 = vmul.f32 0.01, %v2824_v27  ;;  %v2804_v39 = vadd.f32 %v2751_v57, %v2646_v33  ;;  %v2456_v33 = vadd.f32 %v7946_v29, %v2266_v17 }
 0x31a   :  { %v6318_v23 = vpop.f32.mrf.mxu1 }
 0x31b   :  { %v2866_v20 = vsel %vm2838_vm0, %v2824_v27, %v2852_v12  ;;  %v2825_v50 = vadd.f32 %v7972_v6, %v2804_v39  ;;  %v2267_v39 = vadd.f32 %v7700_v10, %v7895_v24 }
 0x31c   :  { %v5768_v8 = vpack.c.bf16 %v2866_v20, %v2866_v20  ;;  %v2756_v62 = vpop.f32.mrf.mxu1 }
 0x31d   :  { %vm2839_vm3 = vcmp.ge.f32.partialorder %v2825_v50, 0.0  ;;  %v2853_v36 = vmul.f32 0.01, %v2825_v50  ;;  %v2805_v22 = vadd.f32 %v2756_v62, %v2647_v32  ;;  %v2457_v2 = vadd.f32 %v7948_v43, %v2267_v39 }
 0x31e   :  { %2937 = vst.msk [vmem:[#allocation5] sm:$0xf] %vm2936_vm1, %v5768_v8  ;;  %v6321_v37 = vpop.f32.mrf.mxu1  ;;  %v2268_v62 = vadd.f32 %v7705_v42, %v7902_v30 }
 0x31f   :  { %v2867_v25 = vsel %vm2839_vm3, %v2825_v50, %v2853_v36  ;;  %v2826_v61 = vadd.f32 %v7972_v6, %v2805_v22  ;;  %v2650_v50 = vadd.f32 %v7799_v46, %v2456_v33  ;;  %v2651_v54 = vadd.f32 %v7809_v49, %v2457_v2 }
 0x320   :  { %v5769_v18 = vpack.c.bf16 %v2867_v25, %v2867_v25  ;;  %v2759_v27 = vpop.f32.mrf.mxu1  ;;  %v2458_v43 = vadd.f32 %v7950_v48, %v2268_v62  ;;  %v2269_v25 = vadd.f32 %v7713_v1, %v7912_v52  ;;  %v8728_v1 = vld [vmem:[#allocation9_spill] sm:$0xff] }
 0x321   :  { %vm2840_vm7 = vcmp.ge.f32.partialorder %v2826_v61, 0.0  ;;  %v2854_v21 = vmul.f32 0.01, %v2826_v61  ;;  %v2806_v9 = vadd.f32 %v2759_v27, %v2648_v53  ;;  %v2270_v52 = vadd.f32 %v8728_v1, %v7916_v63 }
 0x322   :  { %2938 = vst.msk [vmem:[#allocation5 + $0x4] sm:$0xf] %vm2936_vm1, %v5769_v18  ;;  %v6322_v55 = vpop.f32.mrf.mxu1  ;;  %v2459_v27 = vadd.f32 %v7952_v31, %v2269_v25 }
 0x323   :  { %v2868_v57 = vsel %vm2840_vm7, %v2826_v61, %v2854_v21  ;;  %v2827_v40 = vadd.f32 %v7972_v6, %v2806_v9  ;;  %v2652_v55 = vadd.f32 %v7815_v41, %v2458_v43  ;;  %vm2950_vm7 = vcmask 518144  }
 0x324   :  { %v5770_v12 = vpack.c.bf16 %v2868_v57, %v2868_v57  ;;  %v2764_v35 = vpop.f32.mrf.mxu1  ;;  %v2653_v39 = vadd.f32 %v7822_v16, %v2459_v27 }
 0x325   :  { %vm2841_vm8 = vcmp.ge.f32.partialorder %v2827_v40, 0.0  ;;  %v2855_v38 = vmul.f32 0.01, %v2827_v40  ;;  %v2807_v60 = vadd.f32 %v2764_v35, %v2649_v5  ;;  %v2952_v8 = vld [vmem:[#allocation5] sm:$0xf] }
 0x326   :  { %2939 = vst.msk [vmem:[#allocation5 + $0x8] sm:$0xf] %vm2936_vm1, %v5770_v12  ;;  %v6325_v23 = vpop.f32.mrf.mxu1  ;;  %v3304_v61 = vld [vmem:[#allocation5] sm:$0xe]  ;;  %v2460_v12 = vadd.f32 %v7954_v13, %v2270_v52 }
 0x327   :  { %v2869_v20 = vsel %vm2841_vm8, %v2827_v40, %v2855_v38  ;;  %v2828_v29 = vadd.f32 %v7972_v6, %v2807_v60 }
 0x328   :  { %v5771_v32 = vpack.c.bf16 %v2869_v20, %v2869_v20  ;;  %v2767_v28 = vpop.f32.mrf.mxu1  ;;  %v2271_v20 = vadd.f32 %v7727_v45, %v7920_v3  ;;  %v2654_v3 = vadd.f32 %v7826_v19, %v2460_v12  ;;  %v6620_v12 = vld [vmem:[%s8713_s5 + $0x10] sm:$0xff]  }
 0x329   :  { %vm2842_vm9 = vcmp.ge.f32.partialorder %v2828_v29, 0.0  ;;  %v2856_v10 = vmul.f32 0.01, %v2828_v29  ;;  %v2808_v24 = vadd.f32 %v2767_v28, %v2650_v50  ;;  %v2953_v15 = vld [vmem:[#allocation5 + $0x4] sm:$0xf] }
 0x32a   :  { %2940 = vst.msk [vmem:[#allocation5 + $0xc] sm:$0xf] %vm2936_vm1, %v5771_v32  ;;  %v6326_v36 = vpop.f32.mrf.mxu1  ;;  %v8002_v22 = vcombine.low %v2952_v8, %v2953_v15  ;;  %v5550_v48 = vcombine.low %v3304_v61, %v2953_v15  ;;  %v2461_v8 = vadd.f32 %v7956_v44, %v2271_v20 }
 0x32b   :  { %v2870_v37 = vsel %vm2842_vm9, %v2828_v29, %v2856_v10  ;;  %v2829_v46 = vadd.f32 %v7972_v6, %v2808_v24  ;;  %v8729_v36 = vld [vmem:[#allocation10_spill] sm:$0xff] }
 0x32c   :  { %v5772_v42 = vpack.c.bf16 %v2870_v37, %v2870_v37  ;;  %v2772_v30 = vpop.f32.mrf.mxu1  ;;  %v3015_v21 = vshll.u32 %v8002_v22, 16  ;;  %v3317_v38 = vrot.slane %v5550_v48, 1  ;;  %v3013_v13 = vshrl.u32 %v8002_v22, 16 }
 0x32d   :  { %vm2843_vm11 = vcmp.ge.f32.partialorder %v2829_v46, 0.0  ;;  %v2857_v53 = vmul.f32 0.01, %v2829_v46  ;;  %v2809_v18 = vadd.f32 %v2772_v30, %v2651_v54  ;;  %v2272_v43 = vadd.f32 %v8729_v36, %v7924_v14 }
 0x32e   :  { %2941 = vst.msk [vmem:[#allocation5 + $0x10] sm:$0xf] %vm2936_vm1, %v5772_v42  ;;  %v6329_v17 = vpop.f32.mrf.mxu1  ;;  %v3017_v41 = vrot.slane %v3015_v21, 1  ;;  %v2655_v19 = vadd.f32 %v7831_v11, %v2461_v8 }
 0x32f   :  { %v2871_v9 = vsel %vm2843_vm11, %v2829_v46, %v2857_v53  ;;  %v2830_v49 = vadd.f32 %v7972_v6, %v2809_v18  ;;  %v2462_v30 = vadd.f32 %v7958_v47, %v2272_v43  ;;  %v2273_v17 = vadd.f32 %v7742_v56, %v7940_v4  ;;  %v6623_v47 = vld [vmem:[%s8713_s5 + $0x90] sm:$0xff]  }
 0x330   :  { %v5773_v33 = vpack.c.bf16 %v2871_v9, %v2871_v9  ;;  %v2775_v57 = vpop.f32.mrf.mxu1  ;;  %v3018_v10 = vor.u32 %v3017_v41, %v3013_v13 }
 0x331   :  { %vm2844_vm13 = vcmp.ge.f32.partialorder %v2830_v49, 0.0  ;;  %v2858_v40 = vmul.f32 0.01, %v2830_v49  ;;  %v2810_v31 = vadd.f32 %v2775_v57, %v2652_v55  ;;  %v8016_v5 = vld [vmem:[#allocation5 + $0x8] sm:$0xff]   ;;  %v2463_v1 = vadd.f32 %v7960_v34, %v2273_v17 }
 0x332   :  { %2942 = vst.msk [vmem:[#allocation5 + $0x14] sm:$0xf] %vm2936_vm1, %v5773_v33  ;;  %v6330_v35 = vpop.f32.mrf.mxu1  ;;  %v3318_v23 = vrot.slane %v8016_v5, 1  ;;  %v3020_v2 = vshll.u32 %v8016_v5, 16  ;;  %v3024_v21 = vshrl.u32 %v8016_v5, 16  ;;  %v8731_v34 = vld [vmem:[#allocation11_spill] sm:$0xff] }
 0x333   :  { %v2872_v60 = vsel %vm2844_vm13, %v2830_v49, %v2858_v40  ;;  %v2831_v63 = vadd.f32 %v7972_v6, %v2810_v31  ;;  %v8730_v40 = vld [vmem:[#allocation12_spill] sm:$0xff]  ;;  %v2274_v35 = vadd.f32 %v8731_v34, %v7944_v7  ;;  %v2657_v20 = vadd.f32 %v7844_v51, %v2463_v1  ;;  %v8081_v51 = vld [vmem:[#allocation5 + $0x8] sm:$0xf] }
 0x334   :  { %v5774_v29 = vpack.c.bf16 %v2872_v60, %v2872_v60  ;;  %v2780_v50 = vpop.f32.mrf.mxu1  ;;  %v3319_v16 = vsel %vm1583_vm14, %v3317_v38, %v3318_v23  ;;  %v3022_v24 = vrot.slane %v3020_v2, 1  ;;  %v2656_v31 = vadd.f32 %v8730_v40, %v2462_v30  ;;  %v6626_v60 = vld [vmem:[%s8713_s5 + $0x88] sm:$0xff]  }
 0x335   :  { %vm2845_vm15 = vcmp.ge.f32.partialorder %v2831_v63, 0.0  ;;  %v2859_v32 = vmul.f32 0.01, %v2831_v63  ;;  %v2811_v28 = vadd.f32 %v2780_v50, %v2653_v39  ;;  %6391 = vmatprep.mubr.msk.bf16.mxu1 %vm3083_vm12, %v3319_v16 }
 0x336   :  { %2943 = vst.msk [vmem:[#allocation5 + $0x18] sm:$0xf] %vm2936_vm1, %v5774_v29  ;;  %v6333_v62 = vpop.f32.mrf.mxu1  ;;  %v3023_v54 = vsel %vm1277_vm10, %v3018_v10, %v3022_v24  ;;  %v3026_v52 = vor.u32 %v3024_v21, %v3022_v24 }
 0x337   :  { %v2873_v15 = vsel %vm2845_vm15, %v2831_v63, %v2859_v32  ;;  %v2832_v45 = vadd.f32 %v7972_v6, %v2811_v28  ;;  %6351 = vmatprep.mubr.msk.bf16.mxu0 %vm3083_vm12, %v3023_v54  ;;  %v6624_v28 = vld [vmem:[%s8713_s5 + $0x8] sm:$0xff]   ;;  %v6629_v54 = vld [vmem:[%s8713_s5] sm:$0xff]  }
 0x338   :  { %v5775_v37 = vpack.c.bf16 %v2873_v15, %v2873_v15  ;;  %v2783_v46 = vpop.f32.mrf.mxu1 }
 0x339   :  { %vm2846_vm2 = vcmp.ge.f32.partialorder %v2832_v45, 0.0  ;;  %v2860_v44 = vmul.f32 0.01, %v2832_v45  ;;  %v2812_v25 = vadd.f32 %v2783_v46, %v2654_v3  ;;  %v8037_v42 = vld [vmem:[#allocation5 + $0x10] sm:$0xff]   ;;  %v3463_v46 = vld [vmem:[#allocation5 + $0x4] sm:$0xf] }
 0x33a   :  { %2944 = vst.msk [vmem:[#allocation5 + $0x1c] sm:$0xf] %vm2936_vm1, %v5775_v37  ;;  %v6334_v61 = vpop.f32.mrf.mxu1  ;;  %v3320_v18 = vrot.slane %v8037_v42, 1  ;;  %v3028_v27 = vshll.u32 %v8037_v42, 16  ;;  %v3032_v8 = vshrl.u32 %v8037_v42, 16 }
 0x33b   :  { %v2874_v53 = vsel %vm2846_vm2, %v2832_v45, %v2860_v44  ;;  %v2833_v14 = vadd.f32 %v7972_v6, %v2812_v25  ;;  %v8096_v61 = vcombine.low %v3463_v46, %v8081_v51 }
 0x33c   :  { %v5776_v48 = vpack.c.bf16 %v2874_v53, %v2874_v53  ;;  %v2788_v9 = vpop.f32.mrf.mxu1  ;;  %v3321_v55 = vsel %vm1583_vm14, %v3318_v23, %v3320_v18  ;;  %v3030_v56 = vrot.slane %v3028_v27, 1 }
 0x33d   :  { %vm2847_vm4 = vcmp.ge.f32.partialorder %v2833_v14, 0.0  ;;  %v2861_v11 = vmul.f32 0.01, %v2833_v14  ;;  %v2813_v49 = vadd.f32 %v2788_v9, %v2655_v19  ;;  %6392 = vmatmul.mubr.msk.bf16.vlgmr.msra.gmra.mxu1 %vm3083_vm12, %v3321_v55  ;;  %v8101_v19 = vld [vmem:[%s8713_s5 + $0xd8] sm:$0xff]   ;;  %v8116_v55 = vld [vmem:[#allocation5 + $0xc] sm:$0xff]   ;;  %v3664_v1 = vshll.u32 %v8096_v61, 16 }
 0x33e   :  { %2945 = vst.msk [vmem:[#allocation5 + $0x20] sm:$0xf] %vm2936_vm1, %v5776_v48  ;;  %v6337_v33 = vpop.f32.mrf.mxu1  ;;  %6424 = vmatpush3.bf16.msra.mxu1 %v7934_v0  ;;  %v3031_v41 = vsel %vm1277_vm10, %v3026_v52, %v3030_v56  ;;  %v2464_v0 = vadd.f32 %v7964_v58, %v2274_v35  ;;  %v3034_v45 = vor.u32 %v3032_v8, %v3030_v56  ;;  %v3668_v40 = vshll.u32 %v8116_v55, 16  ;;  %v8129_v35 = vld [vmem:[#allocation5 + $0x14] sm:$0xff]  }
 0x33f   :  { %v2875_v4 = vsel %vm2847_vm4, %v2833_v14, %v2861_v11  ;;  %v2834_v57 = vadd.f32 %v7972_v6, %v2813_v49  ;;  %6425 = vmatprep.subr.bf16.mxu1 %v6623_v47  ;;  %6352 = vmatmul.mubr.msk.bf16.vlgmr.msra.gmra.mxu0 %vm3083_vm12, %v3031_v41  ;;  %v3666_v34 = vrot.slane %v3664_v1, 1  ;;  %v3999_v1 = vld [vmem:[#allocation5 + $0xc] sm:$0xf]  ;;  %vm5235_vm4 = vcmask 1041408  }
 0x340   :  { %v5777_v39 = vpack.c.bf16 %v2875_v4, %v2875_v4  ;;  %v2791_v38 = vpop.f32.mrf.mxu1  ;;  %6364 = vmatpush3.bf16.msra.mxu0 %v7929_v26  ;;  %v6630_v26 = vld [vmem:[%s8713_s5 + $0x80] sm:$0xff]   ;;  %v2658_v37 = vadd.f32 %v7849_v59, %v2464_v0 }
 0x341   :  { %vm2848_vm5 = vcmp.ge.f32.partialorder %v2834_v57, 0.0  ;;  %v2862_v63 = vmul.f32 0.01, %v2834_v57  ;;  %v2814_v23 = vadd.f32 %v2791_v38, %v2656_v31  ;;  %v8068_v2 = vld [vmem:[#allocation5 + $0x18] sm:$0xff]   ;;  %6365 = vmatprep.subr.bf16.mxu0 %v6620_v12  ;;  %v3662_v38 = vshrl.u32 %v8096_v61, 16 }
 0x342   :  { %2946 = vst.msk [vmem:[#allocation5 + $0x24] sm:$0xf] %vm2936_vm1, %v5777_v39  ;;  %v6338_v7 = vpop.f32.mrf.mxu1  ;;  %v3322_v13 = vrot.slane %v8068_v2, 1  ;;  %v3036_v32 = vshll.u32 %v8068_v2, 16  ;;  %6426 = vmatpush3.bf16.msra.mxu1 %v6623_v47  ;;  %v8114_v47 = vld [vmem:[%s8713_s5 + $0x78] sm:$0xff]  }
 0x343   :  { %v2876_v29 = vsel %vm2848_vm5, %v2834_v57, %v2862_v63  ;;  %v2835_v50 = vadd.f32 %v7972_v6, %v2814_v23  ;;  %6427 = vmatprep.subr.bf16.mxu1 %v6626_v60  ;;  %v3670_v23 = vrot.slane %v3668_v40, 1  ;;  %v3667_v7 = vor.u32 %v3666_v34, %v3662_v38  ;;  %v8218_v40 = vld [vmem:[#allocation5 + $0x18] sm:$0xff]  }
 0x344   :  { %v5778_v58 = vpack.c.bf16 %v2876_v29, %v2876_v29  ;;  %v2796_v16 = vpop.f32.mrf.mxu1  ;;  %v3323_v24 = vsel %vm1583_vm14, %v3320_v18, %v3322_v13  ;;  %v3038_v3 = vrot.slane %v3036_v32, 1  ;;  %6366 = vmatpush3.bf16.msra.mxu0 %v6620_v12  ;;  %v3040_v18 = vshrl.u32 %v8068_v2, 16 }
 0x345   :  { %vm2849_vm6 = vcmp.ge.f32.partialorder %v2835_v50, 0.0  ;;  %v2863_v62 = vmul.f32 0.01, %v2835_v50  ;;  %v2815_v10 = vadd.f32 %v2796_v16, %v2657_v20  ;;  %6395 = vmatprep.mubr.msk.bf16.mxu1 %vm3083_vm12, %v3323_v24  ;;  %6367 = vmatprep.subr.bf16.mxu0 %v6624_v28  ;;  %v8134_v0 = vld [vmem:[#allocation5 + $0x1c] sm:$0xff]   ;;  %v3675_v20 = vshll.u32 %v8129_v35, 16 }
 0x346   :  { %2947 = vst.msk [vmem:[#allocation5 + $0x28] sm:$0xf] %vm2936_vm1, %v5778_v58  ;;  %v6341_v15 = vpop.f32.mrf.mxu1  ;;  %6428 = vmatpush3.bf16.msra.mxu1 %v6626_v60  ;;  %v3039_v30 = vsel %vm1277_vm10, %v3034_v45, %v3038_v3  ;;  %v3042_v49 = vor.u32 %v3040_v18, %v3038_v3  ;;  %v3671_v16 = vsel %vm1277_vm10, %v3667_v7, %v3670_v23  ;;  %v3682_v8 = vshll.u32 %v8134_v0, 16  ;;  %v3839_v7 = vld [vmem:[#allocation5 + $0x4] sm:$0xe] }
 0x347   :  { %v2877_v36 = vsel %vm2849_vm6, %v2835_v50, %v2863_v62  ;;  %v2836_v43 = vadd.f32 %v7972_v6, %v2815_v10  ;;  %6429 = vmatprep.subr.bf16.mxu1 %v6630_v26  ;;  %6355 = vmatprep.mubr.msk.bf16.mxu0 %vm3083_vm12, %v3039_v30  ;;  %v3677_v62 = vrot.slane %v3675_v20, 1  ;;  %v3672_v24 = vshrl.u32 %v8116_v55, 16 }
 0x348   :  { %v5779_v44 = vpack.c.bf16 %v2877_v36, %v2877_v36  ;;  %v2799_v25 = vpop.f32.mrf.mxu1  ;;  %6368 = vmatpush3.bf16.msra.mxu0 %v6624_v28  ;;  %v3679_v45 = vshrl.u32 %v8129_v35, 16  ;;  %v3684_v3 = vrot.slane %v3682_v8, 1  ;;  %v3686_v18 = vshrl.u32 %v8134_v0, 16 }
 0x349   :  { %vm2850_vm0 = vcmp.ge.f32.partialorder %v2836_v43, 0.0  ;;  %v2864_v59 = vmul.f32 0.01, %v2836_v43  ;;  %v2816_v53 = vadd.f32 %v2799_v25, %v2658_v37  ;;  %v8104_v14 = vld [vmem:[#allocation5 + $0x20] sm:$0xff]   ;;  %6369 = vmatprep.subr.bf16.mxu0 %v6629_v54  ;;  %v6634_v25 = vld [vmem:[%s8713_s5 + $0x70] sm:$0xff]   ;;  %vm5263_vm5 = vcmask 1024  }
 0x34a   :  { %2948 = vst.msk [vmem:[#allocation5 + $0x2c] sm:$0xf] %vm2936_vm1, %v5779_v44  ;;  %v6342_v27 = vpop.f32.mrf.mxu1  ;;  %v3324_v21 = vrot.slane %v8104_v14, 1  ;;  %v3044_v9 = vshll.u32 %v8104_v14, 16  ;;  %6430 = vmatpush3.bf16.msra.mxu1 %v6630_v26  ;;  %v3048_v60 = vshrl.u32 %v8104_v14, 16  ;;  %v3681_v37 = vor.u32 %v3679_v45, %v3677_v62  ;;  %v8237_v34 = vld [vmem:[#allocation5 + $0x20] sm:$0xff]  }
 0x34b   :  { %v2878_v17 = vsel %vm2850_vm0, %v2836_v43, %v2864_v59  ;;  %v2837_v48 = vadd.f32 %v7972_v6, %v2816_v53  ;;  %6463 = vmatprep.subr.bf16.mxu1 %v8101_v19  ;;  %v3674_v43 = vor.u32 %v3672_v24, %v3670_v23  ;;  %v6640_v53 = vld [vmem:[%s8713_s5 + $0xc8] sm:$0xff]   ;;  %v4390_v24 = vrot.slane %v8218_v40, 1 }
 0x34c   :  { %v5780_v11 = vpack.c.bf16 %v2878_v17, %v2878_v17  ;;  %v3325_v52 = vsel %vm1583_vm14, %v3322_v13, %v3324_v21  ;;  %v3046_v33 = vrot.slane %v3044_v9, 1  ;;  %6370 = vmatpush3.bf16.msra.mxu0 %v6629_v54  ;;  %v6638_v54 = vld [vmem:[%s8713_s5 + $0xd0] sm:$0xff]   ;;  %v3688_v17 = vor.u32 %v3686_v18, %v3684_v3 }
 0x34d   :  { %vm2851_vm3 = vcmp.ge.f32.partialorder %v2837_v48, 0.0  ;;  %v2865_v6 = vmul.f32 0.01, %v2837_v48  ;;  %6396 = vmatmul.mubr.msk.bf16.gmra.mxu1 %vm3083_vm12, %v3325_v52  ;;  %6403 = vmatprep.subr.bf16.mxu0 %v8114_v47  ;;  %v8127_v31 = vld [vmem:[#allocation5 + $0x28] sm:$0xf]  ;;  %v3678_v44 = vsel %vm1277_vm10, %v3674_v43, %v3677_v62  ;;  %v3855_v45 = vrot.slane %v8129_v35, 1 }
 0x34e   :  { %2949 = vst.msk [vmem:[#allocation5 + $0x30] sm:$0xf] %vm2936_vm1, %v5780_v11  ;;  %v3047_v4 = vsel %vm1277_vm10, %v3042_v49, %v3046_v33  ;;  %v3050_v50 = vor.u32 %v3048_v60, %v3046_v33  ;;  %v8146_v10 = vld [vmem:[#allocation5 + $0x24] sm:$0xff]   ;;  %v6650_v11 = vld [vmem:[%s8713_s5 + $0x118] sm:$0xff]   ;;  %v3857_v43 = vrot.slane %v8134_v0, 1 }
 0x34f   :  { %v2879_v56 = vsel %vm2851_vm3, %v2837_v48, %v2865_v6  ;;  %6356 = vmatmul.mubr.msk.bf16.gmra.mxu0 %vm3083_vm12, %v3047_v4  ;;  %v3689_v46 = vshll.u32 %v8146_v10, 16  ;;  %v3693_v27 = vshrl.u32 %v8146_v10, 16  ;;  %v6646_v6 = vld [vmem:[%s8713_s5 + $0xb8] sm:$0xff]   ;;  %v3998_v33 = vld [vmem:[#allocation5 + $0x8] sm:$0xf]  ;;  %v8213_v4 = vld [vmem:[#allocation5 + $0x10] sm:$0xff]  }
 0x350   :  { %v5781_v57 = vpack.c.bf16 %v2879_v56, %v2879_v56  ;;  %v8204_v56 = vcombine.low %v3998_v33, %v3999_v1  ;;  %v4374_v60 = vld [vmem:[#allocation5 + $0x8] sm:$0xe]  ;;  %v4388_v20 = vrot.slane %v8213_v4, 1 }
 0x351   :  { %v2972_v12 = vld [vmem:[#allocation5 + $0x2c] sm:$0x7]  ;;  %v3691_v59 = vrot.slane %v3689_v46, 1  ;;  %v6662_v46 = vld [vmem:[%s8713_s5 + $0xf0] sm:$0xff]  }
 0x352   :  { %2951 = vst.msk [vmem:[#allocation5 + $0x34] sm:$0x7] %vm2950_vm7, %v5781_v57  ;;  %v5520_v39 = vcombine.low %v8127_v31, %v2972_v12  ;;  %v8151_v15 = vld [vmem:[#allocation5 + $0x2c] sm:$0xf]  ;;  %v6652_v57 = vld [vmem:[%s8713_s5 + $0x110] sm:$0xff]  }
 0x353   :  { %v3695_v48 = vor.u32 %v3693_v27, %v3691_v59  ;;  %v3692_v9 = vsel %vm1277_vm10, %v3688_v17, %v3691_v59  ;;  %v2963_v52 = vld [vmem:[#allocation5 + $0x2c] sm:$0x3]  ;;  %v6665_v27 = vld [vmem:[%s8713_s5 + $0xe0] sm:$0xff]  }
 0x354   :  { %v3326_v41 = vrot.slane %v5520_v39, 1  ;;  %v3052_v63 = vshll.u32 %v5520_v39, 16  ;;  %v3056_v32 = vshrl.u32 %v5520_v39, 16  ;;  %v6653_v12 = vld [vmem:[%s8713_s5 + $0xa8] sm:$0xff]   ;;  %v6660_v39 = vld [vmem:[%s8713_s5 + $0x100] sm:$0xff]  }
 0x355   :  { %v3649_v26 = vld [vmem:[#allocation5 + $0x30] sm:$0x7]  ;;  %v8242_v38 = vld [vmem:[#allocation5 + $0x28] sm:$0xff]  }
 0x356   :  { %v3327_v29 = vsel %vm1583_vm14, %v3324_v21, %v3326_v41  ;;  %v3054_v13 = vrot.slane %v3052_v63, 1  ;;  %v8155_v36 = vcombine.low %v8151_v15, %v3649_v26  ;;  %v6644_v21 = vld [vmem:[%s8713_s5 + $0xc0] sm:$0xff]   ;;  %v5674_v63 = vcombine.low %v4374_v60, %v3999_v1 }
 0x357   :  { %6399 = vmatprep.mubr.msk.bf16.mxu1 %vm3083_vm12, %v3327_v29  ;;  %v5612_v29 = vcombine.low %v3839_v7, %v8081_v51  ;;  %v4207_v1 = vshrl.u32 %v8213_v4, 16 }
 0x358   :  { %6400 = vmatmul.mubr.msk.bf16.gmra.mxu1 %vm3083_vm12, %v3326_v41  ;;  %v3055_v28 = vsel %vm1277_vm10, %v3050_v50, %v3054_v13  ;;  %v3058_v58 = vor.u32 %v3056_v32, %v3054_v13  ;;  %v3697_v30 = vshll.u32 %v8155_v36, 16  ;;  %v3701_v49 = vshrl.u32 %v8155_v36, 16  ;;  %v6658_v41 = vld [vmem:[%s8713_s5 + $0xa0] sm:$0xff]   ;;  %v6661_v50 = vld [vmem:[%s8713_s5 + $0xf8] sm:$0xff]   ;;  %v4008_v13 = vld [vmem:[#allocation5 + $0x30] sm:$0xf] }
 0x359   :  { %6359 = vmatprep.mubr.msk.bf16.mxu0 %vm3083_vm12, %v3055_v28  ;;  %6431 = vmatprep.mubr.msk.bf16.mxu1 %vm3083_vm12, %v3671_v16  ;;  %v4009_v23 = vld [vmem:[#allocation5 + $0x34] sm:$0x3]  ;;  %v3474_v32 = vld [vmem:[#allocation5 + $0x30] sm:$0x3]  ;;  %v3853_v16 = vrot.slane %v8116_v55, 1  ;;  %v3852_v62 = vrot.slane %v5612_v29, 1 }
 0x35a   :  { %6360 = vmatmul.mubr.msk.bf16.gmra.mxu0 %vm3083_vm12, %v3058_v58  ;;  %v5636_v28 = vcombine.low %v4008_v13, %v4009_v23  ;;  %v4387_v58 = vrot.slane %v5674_v63, 1  ;;  %v5574_v26 = vcombine.low %v8151_v15, %v3474_v32  ;;  %v4391_v15 = vsel %vm1583_vm14, %v4388_v20, %v4390_v24 }
 0x35b   :  { %6371 = vmatprep.mubr.msk.bf16.mxu0 %vm3083_vm12, %v8002_v22  ;;  %v3685_v22 = vsel %vm1277_vm10, %v3681_v37, %v3684_v3  ;;  %v3854_v51 = vsel %vm1583_vm14, %v3852_v62, %v3853_v16  ;;  %v4184_v3 = vld [vmem:[#allocation5 + $0x34] sm:$0x7]  ;;  %v3861_v59 = vrot.slane %v8155_v36, 1 }
 0x35c   :  { %v4389_v8 = vsel %vm1583_vm14, %v4387_v58, %v4388_v20 }
 0x360   :  { %6432 = vmatmul.mubr.msk.bf16.vlgmr.msra.gmra.mxu1 %vm3083_vm12, %v3678_v44  ;;  %v3856_v44 = vsel %vm1583_vm14, %v3853_v16, %v3855_v45 }
 0x361   :  { %6435 = vmatprep.mubr.msk.bf16.mxu1 %vm3083_vm12, %v3685_v22  ;;  %6464 = vmatpush3.bf16.msra.mxu1 %v8101_v19  ;;  %v3699_v19 = vrot.slane %v3697_v30, 1  ;;  %v3859_v30 = vrot.slane %v8146_v10, 1 }
 0x362   :  { %6372 = vmatmul.mubr.msk.bf16.vlgmr.msra.gmra.mxu0 %vm3083_vm12, %v8016_v5  ;;  %6465 = vmatprep.subr.bf16.mxu1 %v6638_v54  ;;  %v6639_v5 = vld [vmem:[%s8713_s5 + $0x68] sm:$0xff]  }
 0x363   :  { %6404 = vmatpush3.bf16.msra.mxu0 %v8114_v47  ;;  %6375 = vmatprep.mubr.msk.bf16.mxu0 %vm3083_vm12, %v8037_v42  ;;  %v3700_v42 = vsel %vm1277_vm10, %v3695_v48, %v3699_v19  ;;  %v6643_v47 = vld [vmem:[%s8713_s5 + $0x60] sm:$0xff]   ;;  %v3862_v36 = vsel %vm1583_vm14, %v3859_v30, %v3861_v59  ;;  %v4197_v48 = vshrl.u32 %v8204_v56, 16 }
 0x364   :  { %6405 = vmatprep.subr.bf16.mxu0 %v6634_v25 }
 0x365   :  { %6466 = vmatpush3.bf16.msra.mxu1 %v6638_v54  ;;  %v8278_v54 = vcombine.low %v4008_v13, %v4184_v3 }
 0x366   :  { %6467 = vmatprep.subr.bf16.mxu1 %v6640_v53 }
 0x367   :  { %6406 = vmatpush3.bf16.msra.mxu0 %v6634_v25  ;;  %v4396_v22 = vrot.slane %v8278_v54, 1  ;;  %v6664_v25 = vld [vmem:[%s8713_s5 + $0xe8] sm:$0xff]   ;;  %v4236_v23 = vshrl.u32 %v8278_v54, 16 }
 0x368   :  { %6436 = vmatmul.mubr.msk.bf16.gmra.mxu1 %vm3083_vm12, %v3692_v9  ;;  %6407 = vmatprep.subr.bf16.mxu0 %v6639_v5  ;;  %v4210_v9 = vshll.u32 %v8218_v40, 16 }
 0x369   :  { %6439 = vmatprep.mubr.msk.bf16.mxu1 %vm3083_vm12, %v3700_v42  ;;  %6468 = vmatpush3.bf16.msra.mxu1 %v6640_v53 }
 0x36a   :  { %6376 = vmatmul.mubr.msk.bf16.gmra.mxu0 %vm3083_vm12, %v8068_v2  ;;  %6469 = vmatprep.subr.bf16.mxu1 %v6644_v21  ;;  %v3703_v2 = vor.u32 %v3701_v49, %v3699_v19  ;;  %v4199_v19 = vshll.u32 %v8204_v56, 16  ;;  %v4212_v49 = vrot.slane %v4210_v9, 1  ;;  %v6678_v9 = vld [vmem:[%s8715_s7 + $0xa0] ss:$16 sps:$4 sm:$0xff]  }
 0x36b   :  { %6379 = vmatprep.mubr.msk.bf16.mxu0 %vm3083_vm12, %v8104_v14  ;;  %6408 = vmatpush3.bf16.msra.mxu0 %v6639_v5  ;;  %v5531_v14 = vcombine.low %v8127_v31, %v2963_v52  ;;  %v6648_v31 = vld [vmem:[%s8713_s5 + $0xb0] sm:$0xff]   ;;  %v4203_v5 = vshll.u32 %v8213_v4, 16 }
 0x36c   :  { %6409 = vmatprep.subr.bf16.mxu0 %v6643_v47  ;;  %v4201_v17 = vrot.slane %v4199_v19, 1  ;;  %v6675_v19 = vld [vmem:[%s8715_s7 + $0xc8] ss:$16 sps:$4 sm:$0xff]  }
 0x36d   :  { %6470 = vmatpush3.bf16.msra.mxu1 %v6644_v21  ;;  %v4205_v21 = vrot.slane %v4203_v5, 1  ;;  %v6677_v5 = vld [vmem:[%s8715_s7 + $0xcc] ss:$16 sps:$4 sm:$0xff]  }
 0x36e   :  { %6503 = vmatprep.subr.bf16.mxu1 %v6650_v11  ;;  %v4202_v42 = vor.u32 %v4201_v17, %v4197_v48  ;;  %v6680_v17 = vld [vmem:[%s8715_s7 + $0xa4] ss:$16 sps:$4 sm:$0xff]  }
 0x36f   :  { %6410 = vmatpush3.bf16.msra.mxu0 %v6643_v47 }
 0x370   :  { %6440 = vmatmul.mubr.msk.bf16.gmra.mxu1 %vm3083_vm12, %v3703_v2  ;;  %6443 = vmatprep.subr.bf16.mxu0 %v6646_v6  ;;  %v4206_v47 = vsel %vm1277_vm10, %v4202_v42, %v4205_v21  ;;  %v4209_v2 = vor.u32 %v4207_v1, %v4205_v21  ;;  %v6683_v42 = vld [vmem:[%s8715_s7 + $0xac] ss:$16 sps:$4 sm:$0xff]   ;;  %v6686_v1 = vld [vmem:[%s8715_s7 + $0x84] ss:$16 sps:$4 sm:$0xff]  }
 0x371   :  { %6471 = vmatprep.mubr.msk.bf16.mxu1 %vm3083_vm12, %v8204_v56  ;;  %v4224_v56 = vshll.u32 %v8242_v38, 16 }
 0x372   :  { %6380 = vmatmul.mubr.msk.bf16.gmra.mxu0 %vm3083_vm12, %v5531_v14  ;;  %v4213_v14 = vsel %vm1277_vm10, %v4209_v2, %v4212_v49 }
 0x373   :  { %6411 = vmatprep.mubr.msk.bf16.mxu0 %vm3083_vm12, %v8096_v61  ;;  %v6655_v61 = vld [vmem:[%s8713_s5 + $0x108] sm:$0xff]  }
 0x378   :  { %6472 = vmatmul.mubr.msk.bf16.vlgmr.msra.gmra.mxu1 %vm3083_vm12, %v8213_v4  ;;  %v4221_v4 = vshrl.u32 %v8237_v34, 16 }
 0x379   :  { %6475 = vmatprep.mubr.msk.bf16.mxu1 %vm3083_vm12, %v8218_v40  ;;  %6504 = vmatpush3.bf16.msra.mxu1 %v6650_v11  ;;  %v4217_v11 = vshll.u32 %v8237_v34, 16 }
 0x37a   :  { %6412 = vmatmul.mubr.msk.bf16.vlgmr.msra.gmra.mxu0 %vm3083_vm12, %v8116_v55  ;;  %6505 = vmatprep.subr.bf16.mxu1 %v6652_v57  ;;  %v4392_v55 = vrot.slane %v8237_v34, 1 }
 0x37b   :  { %6444 = vmatpush3.bf16.msra.mxu0 %v6646_v6  ;;  %6415 = vmatprep.mubr.msk.bf16.mxu0 %vm3083_vm12, %v8129_v35  ;;  %v3858_v35 = vsel %vm1583_vm14, %v3855_v45, %v3857_v43  ;;  %v4214_v6 = vshrl.u32 %v8218_v40, 16  ;;  %v4219_v52 = vrot.slane %v4217_v11, 1  ;;  %v4228_v40 = vshrl.u32 %v8242_v38, 16 }
 0x37c   :  { %6445 = vmatprep.subr.bf16.mxu0 %v6648_v31  ;;  %v4393_v37 = vsel %vm1583_vm14, %v4390_v24, %v4392_v55 }
 0x37d   :  { %6506 = vmatpush3.bf16.msra.mxu1 %v6652_v57  ;;  %v4216_v33 = vor.u32 %v4214_v6, %v4212_v49  ;;  %v6689_v6 = vld [vmem:[%s8715_s7 + $0x8c] ss:$16 sps:$4 sm:$0xff]  }
 0x37e   :  { %6507 = vmatprep.subr.bf16.mxu1 %v6655_v61 }
 0x37f   :  { %6446 = vmatpush3.bf16.msra.mxu0 %v6648_v31  ;;  %v4220_v57 = vsel %vm1277_vm10, %v4216_v33, %v4219_v52  ;;  %v4232_v31 = vshll.u32 %v8278_v54, 16  ;;  %v6684_v33 = vld [vmem:[%s8715_s7 + $0x80] ss:$16 sps:$4 sm:$0xff]  }
 0x380   :  { %6476 = vmatmul.mubr.msk.bf16.gmra.mxu1 %vm3083_vm12, %v8237_v34  ;;  %6447 = vmatprep.subr.bf16.mxu0 %v6653_v12 }
 0x381   :  { %6479 = vmatprep.mubr.msk.bf16.mxu1 %vm3083_vm12, %v8242_v38  ;;  %6508 = vmatpush3.bf16.msra.mxu1 %v6655_v61  ;;  %v4226_v61 = vrot.slane %v4224_v56, 1  ;;  %v6687_v56 = vld [vmem:[%s8715_s7 + $0x88] ss:$16 sps:$4 sm:$0xff]  }
 0x382   :  { %6416 = vmatmul.mubr.msk.bf16.gmra.mxu0 %vm3083_vm12, %v8134_v0  ;;  %6509 = vmatprep.subr.bf16.mxu1 %v6660_v39  ;;  %v4394_v0 = vrot.slane %v8242_v38, 1 }
 0x383   :  { %6419 = vmatprep.mubr.msk.bf16.mxu0 %vm3083_vm12, %v8146_v10  ;;  %6448 = vmatpush3.bf16.msra.mxu0 %v6653_v12  ;;  %v3860_v10 = vsel %vm1583_vm14, %v3857_v43, %v3859_v30  ;;  %v4234_v12 = vrot.slane %v4232_v31, 1  ;;  %v6671_v30 = vld [vmem:[%s8715_s7 + $0xec] ss:$16 sps:$4 sm:$0xff]   ;;  %v6692_v31 = vld [vmem:[%s8715_s7 + $0x64] ss:$16 sps:$4 sm:$0xff]  }
 0x384   :  { %6449 = vmatprep.subr.bf16.mxu0 %v6658_v41  ;;  %v4395_v53 = vsel %vm1583_vm14, %v4392_v55, %v4394_v0  ;;  %v4397_v18 = vsel %vm1583_vm14, %v4394_v0, %v4396_v22 }
 0x385   :  { %6510 = vmatpush3.bf16.msra.mxu1 %v6660_v39  ;;  %v4223_v39 = vor.u32 %v4221_v4, %v4219_v52  ;;  %v4238_v7 = vor.u32 %v4236_v23, %v4234_v12  ;;  %v6701_v23 = vld [vmem:[%s8715_s7 + $0x4c] ss:$16 sps:$4 sm:$0xff]  }
 0x386   :  { %5164 = vmatprep.subr.bf16.mxu1 %v6671_v30 }
 0x387   :  { %6450 = vmatpush3.bf16.msra.mxu0 %v6658_v41  ;;  %v4230_v41 = vor.u32 %v4228_v40, %v4226_v61  ;;  %v4227_v60 = vsel %vm1277_vm10, %v4223_v39, %v4226_v61  ;;  %v6695_v61 = vld [vmem:[%s8715_s7 + $0x6c] ss:$16 sps:$4 sm:$0xff]   ;;  %v6693_v39 = vld [vmem:[%s8715_s7 + $0x68] ss:$16 sps:$4 sm:$0xff]  }
 0x388   :  { %6480 = vmatmul.mubr.msk.bf16.gmra.mxu1 %vm3083_vm12, %v5636_v28  ;;  %6483 = vmatprep.subr.bf16.mxu0 %v6661_v50 }
 0x389   :  { %6511 = vmatprep.mubr.msk.bf16.mxu1 %vm3083_vm12, %v4389_v8  ;;  %v4235_v63 = vsel %vm1277_vm10, %v4230_v41, %v4234_v12  ;;  %v6690_v12 = vld [vmem:[%s8715_s7 + $0x60] ss:$16 sps:$4 sm:$0xff]  }
 0x38a   :  { %6420 = vmatmul.mubr.msk.bf16.gmra.mxu0 %vm3083_vm12, %v5574_v26 }
 0x38b   :  { %6451 = vmatprep.mubr.msk.bf16.mxu0 %vm3083_vm12, %v3854_v51 }
 0x390   :  { %6512 = vmatmul.mubr.msk.bf16.vlgmr.msra.gmra.mxu1 %vm3083_vm12, %v4391_v15 }
 0x391   :  { %6515 = vmatprep.mubr.msk.bf16.mxu1 %vm3083_vm12, %v4393_v37 }
 0x392   :  { %6452 = vmatmul.mubr.msk.bf16.vlgmr.msra.gmra.mxu0 %vm3083_vm12, %v3856_v44  ;;  %v6666_v44 = vld [vmem:[%s8715_s7 + $0xe0] ss:$16 sps:$4 sm:$0xff]  }
 0x393   :  { %6484 = vmatpush3.bf16.msra.mxu0 %v6661_v50  ;;  %6455 = vmatprep.mubr.msk.bf16.mxu0 %vm3083_vm12, %v3858_v35 }
 0x394   :  { %6485 = vmatprep.subr.bf16.mxu0 %v6662_v46 }
 0x397   :  { %6486 = vmatpush3.bf16.msra.mxu0 %v6662_v46 }
 0x398   :  { %6516 = vmatmul.mubr.msk.bf16.gmra.mxu1 %vm3083_vm12, %v4395_v53  ;;  %6487 = vmatprep.subr.bf16.mxu0 %v6664_v25 }
 0x399   :  { %6519 = vmatprep.mubr.msk.bf16.mxu1 %vm3083_vm12, %v4397_v18  ;;  %v6672_v18 = vld [vmem:[%s8715_s7 + $0xc0] ss:$16 sps:$4 sm:$0xff]  }
 0x39a   :  { %6456 = vmatmul.mubr.msk.bf16.gmra.mxu0 %vm3083_vm12, %v3860_v10 }
 0x39b   :  { %6459 = vmatprep.mubr.msk.bf16.mxu0 %vm3083_vm12, %v3862_v36  ;;  %6488 = vmatpush3.bf16.msra.mxu0 %v6664_v25  ;;  %v6669_v25 = vld [vmem:[%s8715_s7 + $0xe8] ss:$16 sps:$4 sm:$0xff]  }
 0x39c   :  { %6489 = vmatprep.subr.bf16.mxu0 %v6665_v27  ;;  %5165 = vmatpush1.bf16.msra.mxu1 %v6669_v25  ;;  %v6705_v25 = vld [vmem:[%s8715_s7 + $0x28] ss:$16 sps:$4 sm:$0xff]  }
 0x39d   :  { %5166 = vmatprep.subr.bf16.mxu1 %v6677_v5 }
 0x39f   :  { %6490 = vmatpush3.bf16.msra.mxu0 %v6665_v27  ;;  %v6674_v27 = vld [vmem:[%s8715_s7 + $0xc4] ss:$16 sps:$4 sm:$0xff]  }
 0x3a0   :  { %6520 = vmatmul.mubr.msk.bf16.gmra.mxu1 %vm3083_vm12, %v4396_v22  ;;  %v6668_v22 = vld [vmem:[%s8715_s7 + $0xe4] ss:$16 sps:$4 sm:$0xff]  }
 0x3a1   :  { %5123 = vmatprep.subr.bf16.mxu0 %v6668_v22  ;;  %5167 = vmatpush1.bf16.msra.mxu1 %v6675_v19  ;;  %v6702_v22 = vld [vmem:[%s8715_s7 + $0x20] ss:$16 sps:$4 sm:$0xff]   ;;  %v6713_v19 = vld [vmem:[%s8715_s7 + $0xc] ss:$16 sps:$4 sm:$0xff]  }
 0x3a2   :  { %6460 = vmatmul.mubr.msk.bf16.gmra.mxu0 %vm3083_vm12, %v3861_v59  ;;  %5168 = vmatprep.subr.bf16.mxu1 %v6683_v42  ;;  %v6711_v42 = vld [vmem:[%s8715_s7 + $0x8] ss:$16 sps:$4 sm:$0xff]  }
 0x3a3   :  { %6491 = vmatprep.mubr.msk.bf16.mxu0 %vm3083_vm12, %v4206_v47  ;;  %v6681_v47 = vld [vmem:[%s8715_s7 + $0xa8] ss:$16 sps:$4 sm:$0xff]  }
 0x3a5   :  { %5169 = vmatpush1.bf16.msra.mxu1 %v6681_v47 }
 0x3a6   :  { %5170 = vmatprep.subr.bf16.mxu1 %v6689_v6  ;;  %v6714_v6 = vld [vmem:[%s8715_s7 + $0x1e0] ss:$16 sps:$4 sm:$0xff]  }
 0x3a9   :  { %5171 = vmatpush1.bf16.msra.mxu1 %v6687_v56  ;;  %v6717_v56 = vld [vmem:[%s8715_s7 + $0x1e8] ss:$16 sps:$4 sm:$0xff]  }
 0x3aa   :  { %6492 = vmatmul.mubr.msk.bf16.vlgmr.msra.gmra.mxu0 %vm3083_vm12, %v4213_v14  ;;  %5172 = vmatprep.subr.bf16.mxu1 %v6695_v61 }
 0x3ab   :  { %6495 = vmatprep.mubr.msk.bf16.mxu0 %vm3083_vm12, %v4220_v57  ;;  %5124 = vmatpush1.bf16.msra.mxu0 %v6666_v44 }
 0x3ac   :  { %5125 = vmatprep.subr.bf16.mxu0 %v6674_v27  ;;  %v6710_v27 = vld [vmem:[%s8715_s7 + $0x4] ss:$16 sps:$4 sm:$0xff]  }
 0x3ad   :  { %5173 = vmatpush1.bf16.msra.mxu1 %v6693_v39 }
 0x3ae   :  { %5174 = vmatprep.subr.bf16.mxu1 %v6701_v23  ;;  %v6728_v23 = vld [vmem:[%s8715_s7 + $0x1a4] ss:$16 sps:$4 sm:$0xff]  }
 0x3af   :  { %5126 = vmatpush1.bf16.msra.mxu0 %v6672_v18 }
 0x3b0   :  { %5127 = vmatprep.subr.bf16.mxu0 %v6680_v17 }
 0x3b2   :  { %6496 = vmatmul.mubr.msk.bf16.gmra.mxu0 %vm3083_vm12, %v4227_v60 }
 0x3b3   :  { %6499 = vmatprep.mubr.msk.bf16.mxu0 %vm3083_vm12, %v4235_v63  ;;  %5128 = vmatpush1.bf16.msra.mxu0 %v6678_v9  ;;  %v6698_v63 = vld [vmem:[%s8715_s7 + $0x44] ss:$16 sps:$4 sm:$0xff]   ;;  %v6708_v9 = vld [vmem:[%s8715_s7] ss:$16 sps:$4 sm:$0xff]  }
 0x3b4   :  { %5129 = vmatprep.subr.bf16.mxu0 %v6686_v1  ;;  %v6716_v1 = vld [vmem:[%s8715_s7 + $0x1e4] ss:$16 sps:$4 sm:$0xff]  }
 0x3b7   :  { %5130 = vmatpush1.bf16.msra.mxu0 %v6684_v33 }
 0x3b8   :  { %5131 = vmatprep.subr.bf16.mxu0 %v6692_v31 }
 0x3ba   :  { %6500 = vmatmul.mubr.msk.bf16.gmra.mxu0 %vm3083_vm12, %v4238_v7 }
 0x3bb   :  { %5132 = vmatpush1.bf16.msra.mxu0 %v6690_v12 }
 0x3bc   :  { %5133 = vmatprep.subr.bf16.mxu0 %v6698_v63  ;;  %v6723_v63 = vld [vmem:[%s8715_s7 + $0x1c8] ss:$16 sps:$4 sm:$0xff]  }
 0x3fd   :  { %v8328_v20 = vpop.f32.mrf.mxu1 }
 0x3ff   :  { %v8330_v34 = vpop.f32.mrf.mxu0  ;;  %v8332_v38 = vpop.f32.mrf.mxu1 }
 0x401   :  { %v8334_v29 = vpop.f32.mrf.mxu0  ;;  %v8336_v50 = vpop.f32.mrf.mxu1 }
 0x403   :  { %v8338_v13 = vpop.f32.mrf.mxu0  ;;  %v8340_v32 = vpop.f32.mrf.mxu1 }
 0x405   :  { %v8342_v28 = vpop.f32.mrf.mxu0 }
 0x40d   :  { %v6397_v58 = vpop.f32.mrf.mxu1 }
 0x40f   :  { %v6357_v16 = vpop.f32.mrf.mxu0  ;;  %v3420_v8 = vpop.f32.mrf.mxu1 }
 0x410   :  { %v6696_v16 = vld [vmem:[%s8715_s7 + $0x40] ss:$16 sps:$4 sm:$0xff]   ;;  %v6699_v8 = vld [vmem:[%s8715_s7 + $0x48] ss:$16 sps:$4 sm:$0xff]  }
 0x411   :  { %v3152_v26 = vpop.f32.mrf.mxu0  ;;  %v6398_v62 = vpop.f32.mrf.mxu1  ;;  %5134 = vmatpush1.bf16.msra.mxu0 %v6696_v16  ;;  %5175 = vmatpush1.bf16.msra.mxu1 %v6699_v8  ;;  %v6731_v16 = vld [vmem:[%s8715_s7 + $0x1ac] ss:$16 sps:$4 sm:$0xff]  }
 0x413   :  { %v6358_v51 = vpop.f32.mrf.mxu0  ;;  %v3423_v24 = vpop.f32.mrf.mxu1 }
 0x414   :  { %v6704_v51 = vld [vmem:[%s8715_s7 + $0x24] ss:$16 sps:$4 sm:$0xff]   ;;  %v6707_v24 = vld [vmem:[%s8715_s7 + $0x2c] ss:$16 sps:$4 sm:$0xff]  }
 0x415   :  { %v3155_v55 = vpop.f32.mrf.mxu0  ;;  %5135 = vmatprep.subr.bf16.mxu0 %v6704_v51  ;;  %5176 = vmatprep.subr.bf16.mxu1 %v6707_v24  ;;  %v6726_v24 = vld [vmem:[%s8715_s7 + $0x1a0] ss:$16 sps:$4 sm:$0xff]  }
 0x416   :  { %5136 = vmatpush1.bf16.msra.mxu0 %v6702_v22  ;;  %5177 = vmatpush1.bf16.msra.mxu1 %v6705_v25 }
 0x417   :  { %5137 = vmatprep.subr.bf16.mxu0 %v6710_v27  ;;  %5178 = vmatprep.subr.bf16.mxu1 %v6713_v19  ;;  %v6729_v27 = vld [vmem:[%s8715_s7 + $0x1a8] ss:$16 sps:$4 sm:$0xff]   ;;  %v6734_v19 = vld [vmem:[%s8715_s7 + $0x184] ss:$16 sps:$4 sm:$0xff]  }
 0x418   :  { %v8344_v45 = vpop.f32.mrf.mxu1 }
 0x41a   :  { %v8346_v3 = vpop.f32.mrf.mxu0  ;;  %v8348_v43 = vpop.f32.mrf.mxu1  ;;  %5138 = vmatpush1.bf16.msra.mxu0 %v6708_v9  ;;  %5179 = vmatpush1.bf16.msra.mxu1 %v6711_v42  ;;  %v6737_v9 = vld [vmem:[%s8715_s7 + $0x18c] ss:$16 sps:$4 sm:$0xff]  }
 0x41b   :  { %5139 = vmatprep.subr.bf16.mxu0 %v6716_v1 }
 0x41c   :  { %v8350_v15 = vpop.f32.mrf.mxu0  ;;  %v8352_v37 = vpop.f32.mrf.mxu1 }
 0x41e   :  { %v8354_v46 = vpop.f32.mrf.mxu0  ;;  %v8356_v54 = vpop.f32.mrf.mxu1  ;;  %5140 = vmatpush2.bf16.msra.mxu0 %v6714_v6  ;;  %v6732_v6 = vld [vmem:[%s8715_s7 + $0x180] ss:$16 sps:$4 sm:$0xff]  }
 0x420   :  { %v8361_v35 = vpop.f32.mrf.mxu0  ;;  %v8363_v0 = vpop.f32.mrf.mxu1 }
 0x422   :  { %v8374_v59 = vpop.f32.mrf.mxu0  ;;  %v8376_v53 = vpop.f32.mrf.mxu1 }
 0x424   :  { %v8387_v10 = vpop.f32.mrf.mxu0  ;;  %v8389_v36 = vpop.f32.mrf.mxu1 }
 0x426   :  { %v8397_v48 = vpop.f32.mrf.mxu0  ;;  %v8399_v21 = vpop.f32.mrf.mxu1 }
 0x428   :  { %v8410_v11 = vpop.f32.mrf.mxu0  ;;  %v6437_v49 = vpop.f32.mrf.mxu1 }
 0x42a   :  { %v6377_v52 = vpop.f32.mrf.mxu0  ;;  %v3796_v2 = vpop.f32.mrf.mxu1 }
 0x42b   :  { %v6719_v52 = vld [vmem:[%s8715_s7 + $0x1ec] ss:$16 sps:$4 sm:$0xff]  }
 0x42c   :  { %v3273_v14 = vpop.f32.mrf.mxu0  ;;  %v6438_v57 = vpop.f32.mrf.mxu1  ;;  %5180 = vmatprep.subr.bf16.mxu1 %v6719_v52 }
 0x42d   :  { %v6722_v14 = vld [vmem:[%s8715_s7 + $0x1c4] ss:$16 sps:$4 sm:$0xff]   ;;  %v6725_v57 = vld [vmem:[%s8715_s7 + $0x1cc] ss:$16 sps:$4 sm:$0xff]   ;;  %5181 = vmatpush2.bf16.msra.mxu1 %v6717_v56  ;;  %v6735_v56 = vld [vmem:[%s8715_s7 + $0x188] ss:$16 sps:$4 sm:$0xff]  }
 0x42e   :  { %v6378_v4 = vpop.f32.mrf.mxu0  ;;  %v3799_v40 = vpop.f32.mrf.mxu1  ;;  %5141 = vmatprep.subr.bf16.mxu0 %v6722_v14  ;;  %5182 = vmatprep.subr.bf16.mxu1 %v6725_v57 }
 0x42f   :  { %v6720_v4 = vld [vmem:[%s8715_s7 + $0x1c0] ss:$16 sps:$4 sm:$0xff]  }
 0x430   :  { %v3276_v41 = vpop.f32.mrf.mxu0  ;;  %v8436_v60 = vpop.f32.mrf.mxu1  ;;  %5142 = vmatpush2.bf16.msra.mxu0 %v6720_v4 }
 0x431   :  { %5183 = vmatpush2.bf16.msra.mxu1 %v6723_v63  ;;  %5143 = vmatprep.subr.bf16.mxu0 %v6728_v23  ;;  %v3266_v23 = vadd.f32 %v8374_v59, %v8330_v34  ;;  %v3261_v34 = vadd.f32 %v8410_v11, %v8342_v28 }
 0x432   :  { %v8444_v7 = vpop.f32.mrf.mxu0  ;;  %v8446_v58 = vpop.f32.mrf.mxu1  ;;  %5184 = vmatprep.subr.bf16.mxu1 %v6731_v16 }
 0x434   :  { %v8454_v26 = vpop.f32.mrf.mxu0  ;;  %v8456_v62 = vpop.f32.mrf.mxu1  ;;  %5144 = vmatpush2.bf16.msra.mxu0 %v6726_v24 }
 0x435   :  { %5185 = vmatpush2.bf16.msra.mxu1 %v6729_v27  ;;  %5145 = vmatprep.subr.bf16.mxu0 %v6734_v19  ;;  %v3453_v27 = vadd.f32 %v8328_v20, %v3266_v23  ;;  %v3290_v28 = vadd.f32 %v8454_v26, %v8350_v15 }
 0x436   :  { %v8464_v55 = vpop.f32.mrf.mxu0  ;;  %v8466_v44 = vpop.f32.mrf.mxu1  ;;  %5186 = vmatprep.subr.bf16.mxu1 %v6737_v9 }
 0x438   :  { %v8474_v30 = vpop.f32.mrf.mxu0  ;;  %v8476_v18 = vpop.f32.mrf.mxu1  ;;  %5146 = vmatpush2.bf16.msra.mxu0 %v6732_v6 }
 0x439   :  { %5187 = vmatpush2.bf16.msra.mxu1 %v6735_v56 }
 0x43a   :  { %v8484_v5 = vpop.f32.mrf.mxu0  ;;  %v8486_v17 = vpop.f32.mrf.mxu1 }
 0x43b   :  { %v3639_v6 = vadd.f32 %v8484_v5, %v3453_v27 }
 0x43c   :  { %v8494_v47 = vpop.f32.mrf.mxu0  ;;  %v8496_v49 = vpop.f32.mrf.mxu1 }
 0x43d   :  { %v3829_v20 = vadd.f32 %v8363_v0, %v3639_v6 }
 0x43e   :  { %v8507_v2 = vpop.f32.mrf.mxu0  ;;  %v8509_v33 = vpop.f32.mrf.mxu1 }
 0x440   :  { %v8520_v31 = vpop.f32.mrf.mxu0  ;;  %v6477_v61 = vpop.f32.mrf.mxu1 }
 0x442   :  { %v6417_v40 = vpop.f32.mrf.mxu0  ;;  %v4141_v12 = vpop.f32.mrf.mxu1 }
 0x444   :  { %v3606_v39 = vpop.f32.mrf.mxu0  ;;  %v6478_v41 = vpop.f32.mrf.mxu1 }
 0x446   :  { %v6418_v8 = vpop.f32.mrf.mxu0  ;;  %v4144_v51 = vpop.f32.mrf.mxu1 }
 0x447   :  { %v3258_v51 = vadd.f32 %v8387_v10, %v8334_v29 }
 0x448   :  { %v3609_v22 = vpop.f32.mrf.mxu0  ;;  %v8537_v25 = vpop.f32.mrf.mxu1 }
 0x449   :  { %v3269_v22 = vadd.f32 %v8397_v48, %v8338_v13  ;;  %v3451_v56 = vadd.f32 %v8332_v38, %v3258_v51  ;;  %v3298_v48 = vadd.f32 %v8444_v7, %v8346_v3  ;;  %v3452_v38 = vadd.f32 %v8340_v32, %v3261_v34 }
 0x44a   :  { %v6421_v42 = vpop.f32.mrf.mxu0  ;;  %v8548_v1 = vpop.f32.mrf.mxu1  ;;  %v3293_v3 = vadd.f32 %v8474_v30, %v8361_v35 }
 0x44b   :  { %v3454_v29 = vadd.f32 %v8336_v50, %v3269_v22  ;;  %v3461_v51 = vadd.f32 %v8344_v45, %v3298_v48 }
 0x44c   :  { %v3622_v52 = vpop.f32.mrf.mxu0  ;;  %v8556_v14 = vpop.f32.mrf.mxu1  ;;  %v3460_v30 = vadd.f32 %v8356_v54, %v3293_v3 }
 0x44d   :  { %v3640_v13 = vadd.f32 %v8507_v2, %v3454_v29  ;;  %v3638_v2 = vadd.f32 %v8520_v31, %v3452_v38 }
 0x44e   :  { %v6422_v57 = vpop.f32.mrf.mxu0  ;;  %v8560_v4 = vpop.f32.mrf.mxu1 }
 0x44f   :  { %v3830_v7 = vadd.f32 %v8389_v36, %v3640_v13 }
 0x450   :  { %v8558_v61 = vpop.f32.mrf.mxu0  ;;  %v6513_v39 = vpop.f32.mrf.mxu1 }
 0x452   :  { %v6453_v40 = vpop.f32.mrf.mxu0  ;;  %v4474_v16 = vpop.f32.mrf.mxu1 }
 0x453   :  { %v3988_v11 = vadd.f32 %v6453_v40, %v3829_v20  ;;  %v3828_v40 = vadd.f32 %v8399_v21, %v3638_v2 }
 0x454   :  { %v3939_v12 = vpop.f32.mrf.mxu0  ;;  %v6514_v19 = vpop.f32.mrf.mxu1 }
 0x456   :  { %v6454_v41 = vpop.f32.mrf.mxu0  ;;  %v8575_v10 = vpop.f32.mrf.mxu1 }
 0x457   :  { %v3989_v26 = vadd.f32 %v6454_v41, %v3830_v7 }
 0x458   :  { %v3942_v63 = vpop.f32.mrf.mxu0  ;;  %v6517_v23 = vpop.f32.mrf.mxu1 }
 0x459   :  { %v4175_v21 = vadd.f32 %v8496_v49, %v3989_v26 }
 0x45a   :  { %v6457_v8 = vpop.f32.mrf.mxu0  ;;  %v4490_v22 = vpop.f32.mrf.mxu1 }
 0x45b   :  { %v3637_v8 = vadd.f32 %v8494_v47, %v3451_v56  ;;  %v3301_v47 = vadd.f32 %v8464_v55, %v8354_v46  ;;  %v4174_v46 = vadd.f32 %v8476_v18, %v3988_v11  ;;  %v3647_v55 = vadd.f32 %v6421_v42, %v3461_v51 }
 0x45c   :  { %v3955_v24 = vpop.f32.mrf.mxu0  ;;  %v6518_v41 = vpop.f32.mrf.mxu1  ;;  %v3646_v56 = vadd.f32 %v8558_v61, %v3460_v30 }
 0x45d   :  { %v3827_v50 = vadd.f32 %v8376_v53, %v3637_v8  ;;  %v3459_v53 = vadd.f32 %v8348_v43, %v3290_v28  ;;  %v3462_v31 = vadd.f32 %v8352_v37, %v3301_v47  ;;  %v8607_v43 = vld [vmem:[%s8716_s6] ss:$0 sm:$0xff] }
 0x45e   :  { %v6458_v9 = vpop.f32.mrf.mxu0 }
 0x45f   :  { %v3986_v32 = vadd.f32 %v3939_v12, %v3827_v50  ;;  %v3645_v35 = vadd.f32 %v3622_v52, %v3459_v53  ;;  %v3648_v12 = vadd.f32 %v6422_v57, %v3462_v31  ;;  %v3987_v9 = vadd.f32 %v3942_v63, %v3828_v40 }
 0x460   :  { %v3958_v59 = vpop.f32.mrf.mxu0  ;;  %v3837_v52 = vadd.f32 %v8436_v60, %v3647_v55  ;;  %v4493_v60 = vpop.f32.mrf.mxu1 }
 0x461   :  { %v4172_v45 = vadd.f32 %v8486_v17, %v3986_v32  ;;  %v3835_v54 = vadd.f32 %v8446_v58, %v3645_v35  ;;  %v3838_v34 = vadd.f32 %v8456_v62, %v3648_v12  ;;  %v4173_v59 = vadd.f32 %v8509_v33, %v3987_v9 }
 0x462   :  { %v6461_v24 = vpop.f32.mrf.mxu0  ;;  %v6521_v11 = vpop.f32.mrf.mxu1 }
 0x463   :  { %v3996_v38 = vadd.f32 %v6461_v24, %v3837_v52 }
 0x464   :  { %v8582_v5 = vpop.f32.mrf.mxu0  ;;  %v4506_v7 = vpop.f32.mrf.mxu1 }
 0x465   :  { %v3994_v2 = vadd.f32 %v8582_v5, %v3835_v54  ;;  %v4182_v32 = vadd.f32 %v8537_v25, %v3996_v38 }
 0x466   :  { %v8590_v0 = vpop.f32.mrf.mxu0  ;;  %v6522_v55 = vpop.f32.mrf.mxu1 }
 0x467   :  { %v3997_v24 = vadd.f32 %v8590_v0, %v3838_v34  ;;  %v4180_v5 = vadd.f32 %v8548_v1, %v3994_v2 }
 0x468   :  { %v8596_v15 = vpop.f32.mrf.mxu0  ;;  %v4509_v12 = vpop.f32.mrf.mxu1 }
 0x469   :  { %v4183_v0 = vadd.f32 %v8556_v14, %v3997_v24 }
 0x46a   :  { %v6493_v27 = vpop.f32.mrf.mxu0 }
 0x46b   :  { %v4364_v36 = vadd.f32 %v6493_v27, %v4174_v46 }
 0x46c   :  { %v4315_v18 = vpop.f32.mrf.mxu0 }
 0x46d   :  { %v4523_v42 = vadd.f32 %v6513_v39, %v4364_v36  ;;  %v4362_v37 = vadd.f32 %v4315_v18, %v4172_v45 }
 0x46e   :  { %v6494_v6 = vpop.f32.mrf.mxu0 }
 0x46f   :  { %v4542_v17 = vadd.f32 %v8607_v43, %v4523_v42  ;;  %v4521_v57 = vadd.f32 %v4474_v16, %v4362_v37  ;;  %v4365_v63 = vadd.f32 %v6494_v6, %v4175_v21 }
 0x470   :  { %v4318_v39 = vpop.f32.mrf.mxu0 }
 0x471   :  { %vm4554_vm10 = vcmp.ge.f32.partialorder %v4542_v17, 0.0  ;;  %v4566_v8 = vmul.f32 0.01, %v4542_v17  ;;  %v4540_v49 = vadd.f32 %v8607_v43, %v4521_v57  ;;  %v4524_v29 = vadd.f32 %v6514_v19, %v4365_v63 }
 0x472   :  { %v4363_v13 = vadd.f32 %v4318_v39, %v4173_v59  ;;  %v6497_v20 = vpop.f32.mrf.mxu0  ;;  %v3836_v19 = vadd.f32 %v8466_v44, %v3646_v56 }
 0x473   :  { %v4578_v58 = vsel %vm4554_vm10, %v4542_v17, %v4566_v8  ;;  %vm4552_vm14 = vcmp.ge.f32.partialorder %v4540_v49, 0.0  ;;  %v4564_v48 = vmul.f32 0.01, %v4540_v49  ;;  %v4543_v16 = vadd.f32 %v8607_v43, %v4524_v29  ;;  %v6740_v29 = vld [vmem:[%s8715_s7 + $0x164] ss:$16 sps:$4 sm:$0xff]  }
 0x474   :  { %4590 = vst.msk [vmem:[#allocation6 + $0x10] sm:$0xff] %vm3083_vm12, %v4578_v58  ;;  %v4522_v62 = vadd.f32 %v8575_v10, %v4363_v13  ;;  %v4331_v33 = vpop.f32.mrf.mxu0  ;;  %v3995_v44 = vadd.f32 %v8596_v15, %v3836_v19  ;;  %v4643_v17 = vlaneseq  ;;  %v6771_v20 = vmov 1983009808   ;;  %5147 = vmatprep.subr.bf16.mxu0 %v6740_v29  ;;  %v6755_v29 = vld [vmem:[%s8715_s7 + $0x12c] ss:$16 sps:$4 sm:$0xff]  }
 0x475   :  { %v4576_v61 = vsel %vm4552_vm14, %v4540_v49, %v4564_v48  ;;  %vm4555_vm8 = vcmp.ge.f32.partialorder %v4543_v16, 0.0  ;;  %v4567_v28 = vmul.f32 0.01, %v4543_v16  ;;  %v6738_v49 = vld [vmem:[%s8715_s7 + $0x160] ss:$16 sps:$4 sm:$0xff]   ;;  %v4641_v58 = vunpack.c.l.s4 %v6771_v20 }
 0x476   :  { %4588 = vst.msk [vmem:[#allocation6] sm:$0xff] %vm3083_vm12, %v4576_v61  ;;  %v4541_v50 = vadd.f32 %v8607_v43, %v4522_v62  ;;  %v6498_v47 = vpop.f32.mrf.mxu0  ;;  %v4181_v27 = vadd.f32 %v8560_v4, %v3995_v44  ;;  %v8640_v8 = vshrl.u32 %v4643_v17, 7  ;;  %5148 = vmatpush2.bf16.msra.mxu0 %v6738_v49  ;;  %v6746_v17 = vld [vmem:[%s8715_s7 + $0x144] ss:$16 sps:$4 sm:$0xff]   ;;  %v6750_v20 = vld [vmem:[%s8715_s7 + $0x120] ss:$16 sps:$4 sm:$0xff]  }
 0x477   :  { %v4579_v23 = vsel %vm4555_vm8, %v4543_v16, %v4567_v28  ;;  %5149 = vmatprep.subr.bf16.mxu0 %v6746_v17 }
 0x478   :  { %4591 = vst.msk [vmem:[#allocation6 + $0x18] sm:$0xff] %vm3083_vm12, %v4579_v23  ;;  %vm4553_vm9 = vcmp.ge.f32.partialorder %v4541_v50, 0.0  ;;  %v4565_v10 = vmul.f32 0.01, %v4541_v50  ;;  %v4334_v3 = vpop.f32.mrf.mxu0  ;;  %v6741_v23 = vld [vmem:[%s8715_s7 + $0x168] ss:$16 sps:$4 sm:$0xff]  }
 0x47a   :  { %v4577_v51 = vsel %vm4553_vm9, %v4541_v50, %v4565_v10  ;;  %v6501_v53 = vpop.f32.mrf.mxu0 }
 0x47b   :  { %4589 = vst.msk [vmem:[#allocation6 + $0x8] sm:$0xff] %vm3083_vm12, %v4577_v51  ;;  %v4372_v26 = vadd.f32 %v6501_v53, %v4182_v32  ;;  %v4673_v57 = vld [vmem:[#allocation6 + $0x12] ss:$64 sm:$0x1] }
 0x47c   :  { %v4347_v46 = vpop.f32.mrf.mxu0  ;;  %v4677_v63 = vld [vmem:[#allocation6 + $0x13] ss:$64 sm:$0x1]  ;;  %v4653_v51 = vld [vmem:[#allocation6 + $0x10] ss:$64 sm:$0x1] }
 0x47d   :  { %v4531_v31 = vadd.f32 %v6521_v11, %v4372_v26  ;;  %v4370_v40 = vadd.f32 %v4347_v46, %v4180_v5  ;;  %v4621_v56 = vld [vmem:[#allocation6 + $0x2] ss:$64 sm:$0x1]  ;;  %v4625_v34 = vld [vmem:[#allocation6 + $0x3] ss:$64 sm:$0x1]  ;;  %v4642_v5 = vunpack.c.0.s8 %v4641_v58 }
 0x47e   :  { %v6502_v22 = vpop.f32.mrf.mxu0  ;;  %v4600_v38 = vld [vmem:[#allocation6] ss:$64 sm:$0x1]  ;;  %v4604_v62 = vld [vmem:[#allocation6 + $0x1] ss:$64 sm:$0x1] }
 0x47f   :  { %v4373_v25 = vadd.f32 %v6502_v22, %v4183_v0  ;;  %v4550_v35 = vadd.f32 %v8607_v43, %v4531_v31  ;;  %v4529_v15 = vadd.f32 %v4506_v7, %v4370_v40  ;;  %v4657_v40 = vld [vmem:[#allocation6 + $0x11] ss:$64 sm:$0x1]  ;;  %v4662_v22 = vld [vmem:[#allocation6 + $0x18] ss:$64 sm:$0x1] }
 0x480   :  { %v4350_v30 = vpop.f32.mrf.mxu0  ;;  %v4667_v49 = vld [vmem:[#allocation6 + $0x19] ss:$64 sm:$0x1]  ;;  %v6753_v58 = vld [vmem:[%s8715_s7 + $0x128] ss:$16 sps:$4 sm:$0xff]  }
 0x481   :  { %v4532_v36 = vadd.f32 %v6522_v55, %v4373_v25  ;;  %v4371_v45 = vadd.f32 %v4350_v30, %v4181_v27  ;;  %vm4562_vm11 = vcmp.ge.f32.partialorder %v4550_v35, 0.0  ;;  %v4574_v9 = vmul.f32 0.01, %v4550_v35  ;;  %v4687_v27 = vld [vmem:[#allocation6 + $0x1b] ss:$64 sm:$0x1] }
 0x482   :  { %v4548_v1 = vadd.f32 %v8607_v43, %v4529_v15  ;;  %v4630_v28 = vld [vmem:[#allocation6 + $0xa] ss:$64 sm:$0x1]  ;;  %v4609_v2 = vld [vmem:[#allocation6 + $0x8] ss:$64 sm:$0x1] }
 0x483   :  { %v4551_v14 = vadd.f32 %v8607_v43, %v4532_v36  ;;  %v4530_v18 = vadd.f32 %v4509_v12, %v4371_v45  ;;  %v4586_v42 = vsel %vm4562_vm11, %v4550_v35, %v4574_v9  ;;  %v4635_v10 = vld [vmem:[#allocation6 + $0xb] ss:$64 sm:$0x1]  ;;  %v4614_v55 = vld [vmem:[#allocation6 + $0x9] ss:$64 sm:$0x1] }
 0x484   :  { %vm4560_vm13 = vcmp.ge.f32.partialorder %v4548_v1, 0.0  ;;  %v4572_v37 = vmul.f32 0.01, %v4548_v1  ;;  %4598 = vst.msk [vmem:[#allocation6 + $0x50] sm:$0xff] %vm3083_vm12, %v4586_v42  ;;  %v6743_v15 = vld [vmem:[%s8715_s7 + $0x16c] ss:$16 sps:$4 sm:$0xff]  }
 0x485   :  { %vm4563_vm15 = vcmp.ge.f32.partialorder %v4551_v14, 0.0  ;;  %v4575_v4 = vmul.f32 0.01, %v4551_v14  ;;  %v4549_v21 = vadd.f32 %v8607_v43, %v4530_v18  ;;  %v4682_v43 = vld [vmem:[#allocation6 + $0x1a] ss:$64 sm:$0x1]  ;;  %5188 = vmatprep.subr.bf16.mxu1 %v6743_v15 }
 0x486   :  { %v4584_v41 = vsel %vm4560_vm13, %v4548_v1, %v4572_v37  ;;  %5189 = vmatpush2.bf16.msra.mxu1 %v6741_v23  ;;  %v16_v23 = vstv %s8717_s10 }
 0x487   :  { %4596 = vst.msk [vmem:[#allocation6 + $0x40] sm:$0xff] %vm3083_vm12, %v4584_v41  ;;  %v4587_v52 = vsel %vm4563_vm15, %v4551_v14, %v4575_v4  ;;  %vm4561_vm2 = vcmp.ge.f32.partialorder %v4549_v21, 0.0  ;;  %v4573_v6 = vmul.f32 0.01, %v4549_v21  ;;  %v6744_v41 = vld [vmem:[%s8715_s7 + $0x140] ss:$16 sps:$4 sm:$0xff]  }
 0x488   :  { %4599 = vst.msk [vmem:[#allocation6 + $0x58] sm:$0xf] %vm2936_vm1, %v4587_v52  ;;  %vm4618_vm1 = vcmask 517120   ;;  %5150 = vmatpush2.bf16.msra.mxu0 %v6744_v41  ;;  %17 = vst [vmem:[#allocation8] sm:$0x1] %v16_v23 }
 0x489   :  { %v4585_v54 = vsel %vm4561_vm2, %v4549_v21, %v4573_v6  ;;  %v4645_v6 = vsub.s32 %v4642_v5, %v8640_v8 }
 0x48a   :  { %4597 = vst.msk [vmem:[#allocation6 + $0x48] sm:$0xff] %vm3083_vm12, %v4585_v54  ;;  %vm4650_vm12 = vcmask 1041920  }
 0x48b   :  { %v4674_v59 = vld [vmem:[#allocation6 + $0x12] ss:$64 sm:$0x2]  ;;  %v4678_v39 = vld [vmem:[#allocation6 + $0x13] ss:$64 sm:$0x2] }
 0x48c   :  { %v4675_v48 = vor.u32 %v4674_v59, %v4673_v57  ;;  %v4679_v16 = vor.u32 %v4678_v39, %v4677_v63  ;;  %v4654_v30 = vld [vmem:[#allocation6 + $0x10] ss:$64 sm:$0x2]  ;;  %v4658_v1 = vld [vmem:[#allocation6 + $0x11] ss:$64 sm:$0x2] }
 0x48d   :  { %v4655_v9 = vor.u32 %v4654_v30, %v4653_v51  ;;  %v4659_v37 = vor.u32 %v4658_v1, %v4657_v40  ;;  %v6747_v57 = vld [vmem:[%s8715_s7 + $0x148] ss:$16 sps:$4 sm:$0xff]   ;;  %v6749_v63 = vld [vmem:[%s8715_s7 + $0x14c] ss:$16 sps:$4 sm:$0xff]   ;;  %v6752_v59 = vld [vmem:[%s8715_s7 + $0x124] ss:$16 sps:$4 sm:$0xff]  }
 0x48e   :  { %v4622_v60 = vld [vmem:[#allocation6 + $0x2] ss:$64 sm:$0x2]  ;;  %v4626_v13 = vld [vmem:[#allocation6 + $0x3] ss:$64 sm:$0x2]  ;;  %v4680_v46 = vmax.f32 %v4675_v48, %v4679_v16  ;;  %5190 = vmatprep.subr.bf16.mxu1 %v6749_v63  ;;  %5151 = vmatprep.subr.bf16.mxu0 %v6752_v59 }
 0x48f   :  { %v4623_v33 = vor.u32 %v4622_v60, %v4621_v56  ;;  %v4627_v61 = vor.u32 %v4626_v13, %v4625_v34  ;;  %v4683_v11 = vld [vmem:[#allocation6 + $0x1a] ss:$64 sm:$0x2]  ;;  %v4601_v50 = vld [vmem:[#allocation6] ss:$64 sm:$0x2]  ;;  %v4660_v34 = vmax.f32 %v4655_v9, %v4659_v37  ;;  %5191 = vmatpush2.bf16.msra.mxu1 %v6747_v57  ;;  %5152 = vmatpush2.bf16.msra.mxu0 %v6750_v20 }
 0x490   :  { %v4684_v19 = vor.u32 %v4683_v11, %v4682_v43  ;;  %v4605_v47 = vld [vmem:[#allocation6 + $0x1] ss:$64 sm:$0x2]  ;;  %v4688_v32 = vld [vmem:[#allocation6 + $0x1b] ss:$64 sm:$0x2]  ;;  %v4602_v7 = vor.u32 %v4601_v50, %v4600_v38  ;;  %5192 = vmatprep.subr.bf16.mxu1 %v6755_v29 }
 0x491   :  { %v4631_v24 = vld [vmem:[#allocation6 + $0xa] ss:$64 sm:$0x2]  ;;  %v4636_v3 = vld [vmem:[#allocation6 + $0xb] ss:$64 sm:$0x2]  ;;  %v4606_v44 = vor.u32 %v4605_v47, %v4604_v62  ;;  %v4628_v53 = vmax.f32 %v4623_v33, %v4627_v61  ;;  %v4689_v54 = vor.u32 %v4688_v32, %v4687_v27 }
 0x492   :  { %v4632_v26 = vor.u32 %v4631_v24, %v4630_v28  ;;  %v4610_v0 = vld [vmem:[#allocation6 + $0x8] ss:$64 sm:$0x2]  ;;  %v4615_v31 = vld [vmem:[#allocation6 + $0x9] ss:$64 sm:$0x2]  ;;  %v4637_v45 = vor.u32 %v4636_v3, %v4635_v10  ;;  %v4685_v12 = vmax.f32 %v4680_v46, %v4684_v19 }
 0x493   :  { %v4611_v25 = vor.u32 %v4610_v0, %v4609_v2  ;;  %v4607_v35 = vmax.f32 %v4602_v7, %v4606_v44  ;;  %v4663_v14 = vld [vmem:[#allocation6 + $0x18] ss:$64 sm:$0x2]  ;;  %v4616_v18 = vor.u32 %v4615_v31, %v4614_v55  ;;  %v4668_v21 = vld [vmem:[#allocation6 + $0x19] ss:$64 sm:$0x2]  ;;  %5193 = vmatpush2.bf16.msra.mxu1 %v6753_v58 }
 0x494   :  { %v4633_v36 = vmax.f32 %v4628_v53, %v4632_v26  ;;  %v4664_v4 = vor.u32 %v4663_v14, %v4662_v22  ;;  %v4690_v43 = vmax.f32 %v4685_v12, %v4689_v54  ;;  %v4669_v13 = vor.u32 %v4668_v21, %v4667_v49  ;;  %v6758_v16 = vld [vmem:[%s8715_s7 + $0x104] ss:$16 sps:$4 sm:$0xff]   ;;  %v6761_v38 = vld [vmem:[%s8715_s7 + $0x10c] ss:$16 sps:$4 sm:$0xff]   ;;  %v6756_v33 = vld [vmem:[%s8715_s7 + $0x100] ss:$16 sps:$4 sm:$0xff]  }
 0x495   :  { %v4612_v42 = vmax.f32 %v4607_v35, %v4611_v25  ;;  %v6759_v61 = vld [vmem:[%s8715_s7 + $0x108] ss:$16 sps:$4 sm:$0xff]   ;;  %5153 = vmatprep.subr.bf16.mxu0 %v6758_v16  ;;  %5194 = vmatprep.subr.bf16.mxu1 %v6761_v38  ;;  %v4785_v24 = vsub.s32 0, %v8640_v8  ;;  %v4793_v10 = vsub.s32 2, %v8640_v8  ;;  %v4781_v3 = vld [vmem:[%s8718_s8] sm:$0xf] }
 0x496   :  { %v4638_v52 = vmax.f32 %v4633_v36, %v4637_v45  ;;  %v4665_v60 = vmax.f32 %v4660_v34, %v4664_v4  ;;  %v4698_v62 = vrot.slane %v4690_v43, %v4645_v6  ;;  %5154 = vmatpush2.bf16.msra.mxu0 %v6756_v33  ;;  %v4789_v32 = vsub.s32 1, %v8640_v8  ;;  %v5209_v53 = vld [vmem:[%s8719_s9] sm:$0xf]  ;;  %v5751_v34 = vld [vmem:[#allocation8] ss:$0 sm:$0xff] }
 0x497   :  { %v4617_v56 = vmax.f32 %v4612_v42, %v4616_v18  ;;  %5195 = vmatpush2.bf16.msra.mxu1 %v6759_v61  ;;  %v4797_v7 = vsub.s32 3, %v8640_v8  ;;  %v4786_v44 = vrot.slane %v4781_v3, %v4785_v24  ;;  %v4794_v51 = vrot.slane %v4781_v3, %v4793_v10 }
 0x498   :  { %v4646_v39 = vrot.slane %v4638_v52, %v4645_v6  ;;  %v4670_v48 = vmax.f32 %v4665_v60, %v4669_v13  ;;  %v4790_v26 = vrot.slane %v4781_v3, %v4789_v32  ;;  %v5214_v31 = vrot.slane %v5209_v53, %v4785_v24 }
 0x499   :  { %4619 = vst.msk [vmem:[#allocation7] sm:$0x3] %vm4618_vm1, %v4617_v56  ;;  %v4798_v5 = vrot.slane %v4781_v3, %v4797_v7  ;;  %v5222_v22 = vrot.slane %v5209_v53, %v4793_v10  ;;  %v5218_v25 = vrot.slane %v5209_v53, %v4789_v32  ;;  %v5226_v18 = vrot.slane %v5209_v53, %v4797_v7 }
 0x49a   :  { %4647 = vrot.lane.b32.xlu0 %v4646_v39, %s6772_s19  ;;  %4671 = vst.msk [vmem:[#allocation7 + $0x2] sm:$0x3] %vm4618_vm1, %v4670_v48 }
 0x49e   :  { %4699 = vrot.lane.b32.xlu0 %v4698_v62, %s6772_s19 }
 0x50c   :  { %v4648_v28 = vpop.permute.xlu0 %4647 }
 0x50d   :  { %4651 = vst.msk [vmem:[#allocation7] sm:$0x3] %vm4650_vm12, %v4648_v28 }
 0x510   :  { %v4700_v11 = vpop.permute.xlu0 %4699 }
 0x511   :  { %4702 = vst.msk [vmem:[#allocation7 + $0x2] sm:$0x3] %vm4650_vm12, %v4700_v11 }
 0x518   :  { %v5686_v19 = vld.sshfl [vmem:[#allocation7] sm:$0x33 pattern:$0x76325410] }
 0x519   :  { %v4712_v50 = vcombine.high %v5686_v19, %v5686_v19  ;;  %v4715_v2 = vpack.c.bf16 %v5686_v19, %v5686_v19 }
 0x51b   :  { %v4716_v47 = vpack.c.bf16 %v4712_v50, %v4712_v50 }
 0x51d   :  { %5155 = vmatprep.mubr.bf16.mxu0 %v4716_v47  ;;  %5196 = vmatprep.mubr.bf16.mxu1 %v4716_v47 }
 0x51e   :  { %5156 = vmatmul.mubr.bf16.vlgmr.msra.gmra.mxu0 %v4715_v2  ;;  %5197 = vmatmul.mubr.bf16.vlgmr.msra.gmra.mxu1 %v4715_v2 }
 0x5de   :  { %v5157_v46 = vpop.f32.mrf.mxu0  ;;  %v5198_v0 = vpop.f32.mrf.mxu1 }
 0x5df   :  { %v5158_v55 = vadd.f32 %v5157_v46, %v4786_v44  ;;  %v5199_v40 = vadd.f32 %v5198_v0, %v4794_v51 }
 0x5e0   :  { %v5159_v27 = vpop.f32.mrf.mxu0  ;;  %v5200_v35 = vpop.f32.mrf.mxu1 }
 0x5e1   :  { %v5205_v15 = vmax.f32 %v5158_v55, 0.0  ;;  %v5207_v30 = vmax.f32 %v5199_v40, 0.0  ;;  %v5160_v8 = vadd.f32 %v5159_v27, %v4790_v26  ;;  %v5201_v36 = vadd.f32 %v5200_v35, %v4798_v5 }
 0x5e2   :  { %v5161_v45 = vpop.f32.mrf.mxu0  ;;  %v5202_v12 = vpop.f32.mrf.mxu1 }
 0x5e3   :  { %v5231_v9 = vmul.f32 %v5214_v31, %v5205_v15  ;;  %v5206_v1 = vmax.f32 %v5160_v8, 0.0  ;;  %v5208_v14 = vmax.f32 %v5201_v36, 0.0  ;;  %v5233_v4 = vmul.f32 %v5222_v22, %v5207_v30 }
 0x5e4   :  { %v5162_v42 = vpop.f32.mrf.mxu0  ;;  %v5203_v37 = vpop.f32.mrf.mxu1 }
 0x5e5   :  { %v5232_v21 = vmul.f32 %v5218_v25, %v5206_v1  ;;  %v5234_v41 = vmul.f32 %v5226_v18, %v5208_v14  ;;  %v5236_v52 = vsel %vm5235_vm4, %v5231_v9, 0.0  ;;  %v5239_v17 = vsel %vm5235_vm4, %v5233_v4, 0.0 }
 0x5e7   :  { %v5237_v6 = vsel %vm5235_vm4, %v5232_v21, 0.0  ;;  %v5241_v63 = vsel %vm5235_vm4, %v5234_v41, 0.0 }
 0x5e8   :  { %v5238_v54 = vadd.f32 %v5237_v6, %v5236_v52 }
 0x5ea   :  { %v5240_v57 = vadd.f32 %v5239_v17, %v5238_v54 }
 0x5ec   :  { %v5242_v56 = vadd.f32 %v5241_v63, %v5240_v57 }
 0x5ee   :  { %5243 = vadd.xlane.f32.xlu1 %v5242_v56 }
 0x677   :  { %v5244_v59 = vpop.xlane.xlu1 %5243 }
 0x678   :  { %v5252_v39 = vadd.f32 %v5751_v34, %v5244_v59 }
 0x67a   :  { %v5253_v43 = vand.u32 2147483647, %v5252_v39  ;;  %vm5257_vm6 = vcmp.ge.f32.partialorder %v5252_v39, 0.0 }
 0x67c   :  { %v5254_v49 = vsub.f32 0.0, %v5253_v43 }
 0x67e   :  { %v5255_v29 = vmul.f32 1.442695, %v5254_v49 }
 0x680   :  { %6762 = vpow2.f32 %v5255_v29 }
 0x68d   :  { %v6763_v60 = vpop.eup %6762 }
 0x68e   :  { %v5258_v13 = vadd.f32 1.0, %v6763_v60 }
 0x690   :  { %6764 = vrcp.f32 %v5258_v13 }
 0x69d   :  { %v6765_v20 = vpop.eup %6764 }
 0x69e   :  { %v5261_v58 = vmul.f32 %v6765_v20, %v6763_v60 }
 0x6a0   :  { %v5262_v48 = vsel %vm5257_vm6, %v6765_v20, %v5261_v58 }
 0x6a1   :  { %5264 = vst.msk [vmem:[%s8720_s11] sm:$0x3] %vm5263_vm5, %v5262_v48 }

</bundles_post_ra>
